<compile_context>
chip_gen: v6e
topology: v6e:2x2x1
jax: 0.10.0
libtpu: 0.0.40
codegen_flags: <defaults>
</compile_context>

<pallas_src>
import math

import jax
import jax.numpy as jnp
from jax import lax
from jax.experimental import pallas as pl
from jax.experimental.pallas import tpu as pltpu


def _round_up(n, m):
    return (n + m - 1) // m * m


def _lstm_fused_kernel(idx_ref,                    # SMEM (T, B) int32  (scalar prefetch)
                       wx_ref, whc_ref, b_ref,     # resident weights
                       h0_ref, c0_ref,             # initial state (this batch tile)
                       out_ref, hT_ref, cT_ref):   # outputs
    T = out_ref.shape[0]
    Bt = h0_ref.shape[0]
    H = h0_ref.shape[1]
    NG = 3 * H                                     # i, g, o gate columns
    bt0 = pl.program_id(0) * Bt                    # global batch offset of this tile

    def step(t, carry):
        h, c = carry                                                    # (Bt, H) f32
        # Merged contraction: gates (i,g,o) AND the i2o hidden contribution in
        # one MXU issue: (Bt, 2H) @ (2H, 3H + O_PAD).
        hc = jnp.concatenate([h, c], axis=-1).astype(jnp.bfloat16)       # (Bt, 2H)
        z = jnp.dot(hc, whc_ref[...], preferred_element_type=jnp.float32)

        # x is one-hot -> x @ W is a row gather of the per-letter table (f32, exact).
        rows = [wx_ref[idx_ref[t, bt0 + b]] for b in range(Bt)]          # each (1, NCOL)
        xr = rows[0] if Bt == 1 else jnp.concatenate(rows, axis=0)       # (Bt, NCOL)
        z = z + xr + b_ref[...]                                          # (Bt, NCOL) f32

        # LSTMCell gates (PyTorch order i,f,g,o; f-gate pruned since f*c0 == 0).
        gi = jax.nn.sigmoid(z[:, 0:H])
        gg = jnp.tanh(z[:, H:2 * H])
        go = jax.nn.sigmoid(z[:, 2 * H:NG])
        c_new = gi * gg
        h_new = go * jnp.tanh(c_new)

        # i2o Linear + LogSoftmax.  Pad columns carry a -1e30 bias so
        # exp(pad - m) == 0 and the log-softmax over the real O columns is exact.
        logits = z[:, NG:]                                               # (Bt, O_PAD)
        m = jnp.max(logits, axis=-1, keepdims=True)
        lse = m + jnp.log(jnp.sum(jnp.exp(logits - m), axis=-1, keepdims=True))
        out_ref[t] = logits - lse
        return h_new, c_new

    h, c = lax.fori_loop(0, T, step, (h0_ref[...], c0_ref[...]), unroll=True)
    hT_ref[...] = h
    cT_ref[...] = c


def _prep_weights(params, input_size, H, O, o_pad):
    """Prune f-gate, merge (h,c,Vh) into one matrix, build the per-letter x table."""
    NG = 3 * H
    NCOL = NG + o_pad

    w_ih = params["w_ih"]                                  # (4H, in + 2H), gates i,f,g,o
    w_igo = jnp.concatenate([w_ih[0:H], w_ih[2 * H:3 * H], w_ih[3 * H:4 * H]], axis=0)
    b_sum = params["b_ih"] + params["b_hh"]
    b_igo = jnp.concatenate([b_sum[0:H], b_sum[2 * H:3 * H], b_sum[3 * H:4 * H]])

    w_io = params["w_io"]                                  # (O, in + H)

    # Per-letter x-contribution table, shape (L, 1, NCOL) f32 (gathered by index,
    # leading-dim dynamic indexing; exact, no bf16 loss on the x path).
    wx = jnp.zeros((input_size, 1, NCOL), jnp.float32)
    wx = wx.at[:, 0, :NG].set(w_igo[:, :input_size].T)
    wx = wx.at[:, 0, NG:NG + O].set(w_io[:, :input_size].T)

    # Merged (h;c) matrix: rows 0:H = h contribution (gates + Vh), rows H:2H = c
    # contribution (gates only).  bf16 MXU operand.
    whc = jnp.zeros((2 * H, NCOL), jnp.float32)
    whc = whc.at[:H, :NG].set(w_igo[:, input_size:input_size + H].T)
    whc = whc.at[H:, :NG].set(w_igo[:, input_size + H:].T)
    whc = whc.at[:H, NG:NG + O].set(w_io[:, input_size:].T)
    whc = whc.astype(jnp.bfloat16)

    bias = jnp.full((1, NCOL), -1e30, jnp.float32)         # pad logit columns -> -inf
    bias = bias.at[0, :NG].set(b_igo)
    bias = bias.at[0, NG:NG + O].set(params["b_io"].astype(jnp.float32))
    return wx, whc, bias


def lstm_forward_seq(params, letter_idx, hidden0, cell0, *, batch_tile=None):
    """Run the module forward over a whole sequence in one fused kernel.

    letter_idx: (T, B) int32 letter indices (the module's one-hot line tensors
    are pure one-hot, so the x matmul is a row gather).
    Returns (log_probs (T, B, O), final hidden (B, H), final cell (B, H)).
    """
    T, B = letter_idx.shape
    H = hidden0.shape[1]
    O = params["w_io"].shape[0]
    input_size = params["w_io"].shape[1] - H
    O_PAD = _round_up(O, 128)
    NG = 3 * H
    NCOL = NG + O_PAD

    bt = B if batch_tile is None else batch_tile
    assert B % bt == 0 and (bt == B or bt % 8 == 0), \
        "batch_tile must divide B and be a multiple of 8 (or equal B)"
    n_bt = B // bt            # on v7x pick bt = B//2 (multiple of 8) to use both TCs

    wx, whc, bias = _prep_weights(params, input_size, H, O, O_PAD)

    const3 = lambda i, idx: (0, 0, 0)
    const2 = lambda i, idx: (0, 0)

    out_shapes = (
        jax.ShapeDtypeStruct((T, B, O_PAD), jnp.float32),   # per-step log-softmax
        jax.ShapeDtypeStruct((B, H), jnp.float32),          # final hidden
        jax.ShapeDtypeStruct((B, H), jnp.float32),          # final cell
    )
    outs_pad, h_T, c_T = pl.pallas_call(
        _lstm_fused_kernel,
        out_shape=out_shapes,
        grid_spec=pltpu.PrefetchScalarGridSpec(
            num_scalar_prefetch=1,                           # letter indices -> SMEM
            grid=(n_bt,),                                    # batch tiles only; T is fused
            in_specs=[
                pl.BlockSpec((input_size, 1, NCOL), const3),        # per-letter x rows
                pl.BlockSpec((2 * H, NCOL), const2),                # merged Wh;Wc (+Vh)
                pl.BlockSpec((1, NCOL), const2),                    # merged bias
                pl.BlockSpec((bt, H), lambda i, idx: (i, 0)),       # hidden0 tile
                pl.BlockSpec((bt, H), lambda i, idx: (i, 0)),       # cell0 tile
            ],
            out_specs=(
                pl.BlockSpec((T, bt, O_PAD), lambda i, idx: (0, i, 0)),
                pl.BlockSpec((bt, H), lambda i, idx: (i, 0)),
                pl.BlockSpec((bt, H), lambda i, idx: (i, 0)),
            ),
        ),
        compiler_params=pltpu.CompilerParams(
            # Batch tiles are independent -> "parallel" (uses v7x's 2nd TensorCore
            # when n_bt > 1).  The time recurrence lives inside the kernel body.
            dimension_semantics=("parallel",)),
    )(letter_idx.astype(jnp.int32), wx, whc, bias, hidden0, cell0)

    return outs_pad[:, :, :O], h_T, c_T


def lstm_forward(params, x, hidden, cell):
    """Single-step forward with the module interface (x is a one-hot row)."""
    idx = jnp.argmax(x, axis=-1).astype(jnp.int32)[None, :]   # (1, B)
    out, h_new, c_new = lstm_forward_seq(params, idx, hidden, cell)
    return out[0], h_new, c_new


def lstm_forward_ref(params, x, hidden, cell):
    """Pure-JAX f32 reference mirroring the PyTorch forward exactly."""
    B = x.shape[0]
    H = hidden.shape[1]
    combined_o = jnp.concatenate([x, hidden], axis=1)
    combined_hc = jnp.concatenate([x, hidden, cell], axis=1)
    h0 = jnp.zeros((B, H), jnp.float32)      # LSTMCell default internal state
    c0 = jnp.zeros((B, H), jnp.float32)
    gates = (combined_hc @ params["w_ih"].T + params["b_ih"]
             + h0 @ params["w_hh"].T + params["b_hh"])
    i = jax.nn.sigmoid(gates[:, 0:H])
    f = jax.nn.sigmoid(gates[:, H:2 * H])
    g = jnp.tanh(gates[:, 2 * H:3 * H])
    o = jax.nn.sigmoid(gates[:, 3 * H:4 * H])
    c_new = f * c0 + i * g
    h_new = o * jnp.tanh(c_new)
    logits = combined_o @ params["w_io"].T + params["b_io"]
    out = jax.nn.log_softmax(logits, axis=1)
    return out, h_new, c_new


def lstm_forward_seq_ref(params, xs, hidden, cell):
    outs = []
    for t in range(xs.shape[0]):
        out, hidden, cell = lstm_forward_ref(params, xs[t], hidden, cell)
        outs.append(out)
    return jnp.stack(outs, axis=0), hidden, cell


def init_params(key, input_size, hidden_size, output_size):
    """Deterministic init mimicking PyTorch default U(-1/sqrt(fan), 1/sqrt(fan))."""
    cell_in = input_size + 2 * hidden_size     # LSTMCell input size
    lin_in = input_size + hidden_size          # i2o Linear input size
    k_cell = 1.0 / math.sqrt(hidden_size)
    k_lin = 1.0 / math.sqrt(lin_in)
    ks = jax.random.split(key, 6)
    return {
        "w_ih": jax.random.uniform(ks[0], (4 * hidden_size, cell_in), jnp.float32, -k_cell, k_cell),
        # w_hh exists on the nn.LSTMCell but only ever multiplies its zero
        # internal state, so the kernel never reads it.
        "w_hh": jax.random.uniform(ks[1], (4 * hidden_size, hidden_size), jnp.float32, -k_cell, k_cell),
        "b_ih": jax.random.uniform(ks[2], (4 * hidden_size,), jnp.float32, -k_cell, k_cell),
        "b_hh": jax.random.uniform(ks[3], (4 * hidden_size,), jnp.float32, -k_cell, k_cell),
        "w_io": jax.random.uniform(ks[4], (output_size, lin_in), jnp.float32, -k_lin, k_lin),
        "b_io": jax.random.uniform(ks[5], (output_size,), jnp.float32, -k_lin, k_lin),
    }


if __name__ == "__main__":
    # Shapes implied by the tutorial: n_letters = 57 one-hot input, n_hidden = 128.
    input_size = 57       # len(ascii_letters + " .,;'")
    hidden_size = 128
    output_size = 18      # number of name categories in the tutorial
    seq_len = 8

    key = jax.random.PRNGKey(0)
    k_par, k_idx, k_idx_b = jax.random.split(key, 3)
    params = init_params(k_par, input_size, hidden_size, output_size)

    # ---- tutorial-style single sequence (B = 1), like lineToTensor('Albert..').
    batch = 1
    letter_idx = jax.random.randint(k_idx, (seq_len, batch), 0, input_size, dtype=jnp.int32)
    xs = jax.nn.one_hot(letter_idx, input_size, dtype=jnp.float32)       # (T, B, n_letters)
    hidden0 = jnp.zeros((batch, hidden_size), jnp.float32)
    cell0 = jnp.zeros((batch, hidden_size), jnp.float32)

    outs, h_T, c_T = lstm_forward_seq(params, letter_idx, hidden0, cell0)
    jax.block_until_ready((outs, h_T, c_T))

    out1, h1, c1 = lstm_forward(params, xs[0], hidden0, cell0)
    jax.block_until_ready((out1, h1, c1))

    outs_r, h_r, c_r = lstm_forward_seq_ref(params, xs, hidden0, cell0)
    out1_r, h1_r, c1_r = lstm_forward_ref(params, xs[0], hidden0, cell0)

    assert outs.shape == (seq_len, batch, output_size)
    assert h_T.shape == (batch, hidden_size)
    assert c_T.shape == (batch, hidden_size)
    assert out1.shape == (batch, output_size)

    assert jnp.allclose(outs, outs_r, rtol=2e-2, atol=2e-2)
    assert jnp.allclose(h_T, h_r, rtol=2e-2, atol=2e-2)
    assert jnp.allclose(c_T, c_r, rtol=2e-2, atol=2e-2)
    assert jnp.allclose(out1, out1_r, rtol=2e-2, atol=2e-2)
    assert jnp.allclose(h1, h1_r, rtol=2e-2, atol=2e-2)
    assert jnp.allclose(c1, c1_r, rtol=2e-2, atol=2e-2)

    # ---- batched independent sequences (amortizes the M=1 latency-bound loop).
    batch_b = 8
    letter_idx_b = jax.random.randint(k_idx_b, (seq_len, batch_b), 0, input_size, dtype=jnp.int32)
    xs_b = jax.nn.one_hot(letter_idx_b, input_size, dtype=jnp.float32)
    h0_b = jnp.zeros((batch_b, hidden_size), jnp.float32)
    c0_b = jnp.zeros((batch_b, hidden_size), jnp.float32)

    outs_b, hT_b, cT_b = lstm_forward_seq(params, letter_idx_b, h0_b, c0_b)
    jax.block_until_ready((outs_b, hT_b, cT_b))
    outs_br, h_br, c_br = lstm_forward_seq_ref(params, xs_b, h0_b, c0_b)

    assert jnp.allclose(outs_b, outs_br, rtol=2e-2, atol=2e-2)
    assert jnp.allclose(hT_b, h_br, rtol=2e-2, atol=2e-2)
    assert jnp.allclose(cT_b, c_br, rtol=2e-2, atol=2e-2)

    print("KERNEL_OK")
</pallas_src>

<mosaic_0001>
module attributes {stable_mosaic.version = 11 : i64} {
  func.func @_lstm_fused_kernel(%arg0: i32, %arg1: memref<8x1xi32, #tpu.memory_space<smem>>, %arg2: memref<57x1x512xf32, #tpu.memory_space<vmem>>, %arg3: memref<256x512xbf16, #tpu.memory_space<vmem>>, %arg4: memref<1x512xf32, #tpu.memory_space<vmem>>, %arg5: memref<1x128xf32, #tpu.memory_space<vmem>>, %arg6: memref<1x128xf32, #tpu.memory_space<vmem>>, %arg7: memref<8x1x128xf32, #tpu.memory_space<vmem>>, %arg8: memref<1x128xf32, #tpu.memory_space<vmem>>, %arg9: memref<1x128xf32, #tpu.memory_space<vmem>>) attributes {dimension_semantics = [#tpu.dimension_semantics<parallel>], iteration_bounds = array<i64: 1>, scalar_prefetch = 1 : i64, scratch_operands = 0 : i64, tpu.core_type = #tpu.core_type<tc>, window_params = [{pipeline_mode = #tpu.pipeline_mode<synchronous>, transform_indices = @transform_0, window_bounds = array<i64: 57, 1, 512>}, {pipeline_mode = #tpu.pipeline_mode<synchronous>, transform_indices = @transform_1, window_bounds = array<i64: 256, 512>}, {pipeline_mode = #tpu.pipeline_mode<synchronous>, transform_indices = @transform_2, window_bounds = array<i64: 1, 512>}, {transform_indices = @transform_3, window_bounds = array<i64: 1, 128>}, {transform_indices = @transform_4, window_bounds = array<i64: 1, 128>}, {transform_indices = @transform_5, window_bounds = array<i64: 8, 1, 128>}, {transform_indices = @transform_6, window_bounds = array<i64: 1, 128>}, {transform_indices = @transform_7, window_bounds = array<i64: 1, 128>}]} {
    %c1_i32 = arith.constant 1 : i32
    %0 = arith.muli %arg0, %c1_i32 : i32
    %c0 = arith.constant 0 : index
    %c0_0 = arith.constant 0 : index
    %1 = vector.load %arg5[%c0, %c0_0] : memref<1x128xf32, #tpu.memory_space<vmem>>, vector<1x128xf32>
    %c0_1 = arith.constant 0 : index
    %c0_2 = arith.constant 0 : index
    %2 = vector.load %arg6[%c0_1, %c0_2] : memref<1x128xf32, #tpu.memory_space<vmem>>, vector<1x128xf32>
    %c0_i32 = arith.constant 0 : i32
    %3 = tpu.concatenate %1, %2 in 1 : vector<1x128xf32>, vector<1x128xf32> -> vector<1x256xf32>
    %4 = arith.truncf %3 : vector<1x256xf32> to vector<1x256xbf16>
    %c0_3 = arith.constant 0 : index
    %c0_4 = arith.constant 0 : index
    %5 = vector.load %arg3[%c0_3, %c0_4] : memref<256x512xbf16, #tpu.memory_space<vmem>>, vector<256x512xbf16>
    %cst = arith.constant dense<0.000000e+00> : vector<1x512xf32>
    %6 = tpu.matmul %4, %5, %cst {dimension_numbers = #tpu.dot_dimension_numbers<[1], [0], [0], [1], [0, 0, 1, 1], [], []>} : vector<1x256xbf16>, vector<256x512xbf16>, vector<1x512xf32> -> vector<1x512xf32>
    %c0_i32_5 = arith.constant 0 : i32
    %7 = arith.addi %0, %c0_i32_5 : i32
    %8 = arith.index_cast %c0_i32 : i32 to index
    %9 = arith.index_cast %7 : i32 to index
    %10 = memref.load %arg1[%8, %9] : memref<8x1xi32, #tpu.memory_space<smem>>
    %11 = arith.index_cast %10 : i32 to index
    %c0_6 = arith.constant 0 : index
    %c0_7 = arith.constant 0 : index
    %12 = vector.load %arg2[%11, %c0_6, %c0_7] : memref<57x1x512xf32, #tpu.memory_space<vmem>>, vector<1x1x512xf32>
    %13 = vector.shape_cast %12 : vector<1x1x512xf32> to vector<1x512xf32>
    %14 = arith.addf %6, %13 : vector<1x512xf32>
    %c0_8 = arith.constant 0 : index
    %c0_9 = arith.constant 0 : index
    %15 = vector.load %arg4[%c0_8, %c0_9] : memref<1x512xf32, #tpu.memory_space<vmem>>, vector<1x512xf32>
    %16 = arith.addf %14, %15 : vector<1x512xf32>
    %17 = vector.extract_strided_slice %16 {offsets = [0, 0], sizes = [1, 128], strides = [1, 1]} : vector<1x512xf32> to vector<1x128xf32>
    %18 = arith.negf %17 : vector<1x128xf32>
    %19 = math.exp %18 : vector<1x128xf32>
    %cst_10 = arith.constant 1.000000e+00 : f32
    %20 = vector.broadcast %cst_10 : f32 to vector<1x128xf32>
    %21 = arith.addf %20, %19 : vector<1x128xf32>
    %22 = arith.divf %20, %21 : vector<1x128xf32>
    %23 = vector.extract_strided_slice %16 {offsets = [0, 128], sizes = [1, 128], strides = [1, 1]} : vector<1x512xf32> to vector<1x128xf32>
    %24 = math.tanh %23 : vector<1x128xf32>
    %25 = vector.extract_strided_slice %16 {offsets = [0, 256], sizes = [1, 128], strides = [1, 1]} : vector<1x512xf32> to vector<1x128xf32>
    %26 = arith.negf %25 : vector<1x128xf32>
    %27 = math.exp %26 : vector<1x128xf32>
    %cst_11 = arith.constant 1.000000e+00 : f32
    %28 = vector.broadcast %cst_11 : f32 to vector<1x128xf32>
    %29 = arith.addf %28, %27 : vector<1x128xf32>
    %30 = arith.divf %28, %29 : vector<1x128xf32>
    %31 = arith.mulf %22, %24 : vector<1x128xf32>
    %32 = math.tanh %31 : vector<1x128xf32>
    %33 = arith.mulf %30, %32 : vector<1x128xf32>
    %34 = vector.extract_strided_slice %16 {offsets = [0, 384], sizes = [1, 128], strides = [1, 1]} : vector<1x512xf32> to vector<1x128xf32>
    %cst_12 = arith.constant dense<0xFF800000> : vector<1xf32>
    %35 = vector.multi_reduction <maximumf>, %34, %cst_12 [1] : vector<1x128xf32> to vector<1xf32>
    %36 = vector.shape_cast %35 : vector<1xf32> to vector<1x1xf32>
    %37 = vector.broadcast %36 : vector<1x1xf32> to vector<1x128xf32>
    %38 = arith.subf %34, %37 : vector<1x128xf32>
    %39 = math.exp %38 : vector<1x128xf32>
    %cst_13 = arith.constant dense<0.000000e+00> : vector<1xf32>
    %40 = vector.multi_reduction <add>, %39, %cst_13 [1] : vector<1x128xf32> to vector<1xf32>
    %41 = vector.shape_cast %40 : vector<1xf32> to vector<1x1xf32>
    %42 = math.log %41 : vector<1x1xf32>
    %43 = arith.addf %36, %42 : vector<1x1xf32>
    %44 = vector.broadcast %43 : vector<1x1xf32> to vector<1x128xf32>
    %45 = arith.subf %34, %44 : vector<1x128xf32>
    %46 = arith.index_cast %c0_i32 : i32 to index
    %c0_14 = arith.constant 0 : index
    %c0_15 = arith.constant 0 : index
    %47 = vector.load %arg7[%46, %c0_14, %c0_15] : memref<8x1x128xf32, #tpu.memory_space<vmem>>, vector<1x1x128xf32>
    %48 = vector.shape_cast %47 : vector<1x1x128xf32> to vector<1x128xf32>
    %49 = vector.shape_cast %45 : vector<1x128xf32> to vector<1x1x128xf32>
    tpu.vector_store %arg7[%46, %c0_14, %c0_15], %49 {strides = array<i32>} : memref<8x1x128xf32, #tpu.memory_space<vmem>>, vector<1x1x128xf32>,
    %c1_i32_16 = arith.constant 1 : i32
    %50 = tpu.concatenate %33, %31 in 1 : vector<1x128xf32>, vector<1x128xf32> -> vector<1x256xf32>
    %51 = arith.truncf %50 : vector<1x256xf32> to vector<1x256xbf16>
    %c0_17 = arith.constant 0 : index
    %c0_18 = arith.constant 0 : index
    %52 = vector.load %arg3[%c0_17, %c0_18] : memref<256x512xbf16, #tpu.memory_space<vmem>>, vector<256x512xbf16>
    %cst_19 = arith.constant dense<0.000000e+00> : vector<1x512xf32>
    %53 = tpu.matmul %51, %52, %cst_19 {dimension_numbers = #tpu.dot_dimension_numbers<[1], [0], [0], [1], [0, 0, 1, 1], [], []>} : vector<1x256xbf16>, vector<256x512xbf16>, vector<1x512xf32> -> vector<1x512xf32>
    %c0_i32_20 = arith.constant 0 : i32
    %54 = arith.addi %0, %c0_i32_20 : i32
    %55 = arith.index_cast %c1_i32_16 : i32 to index
    %56 = arith.index_cast %54 : i32 to index
    %57 = memref.load %arg1[%55, %56] : memref<8x1xi32, #tpu.memory_space<smem>>
    %58 = arith.index_cast %57 : i32 to index
    %c0_21 = arith.constant 0 : index
    %c0_22 = arith.constant 0 : index
    %59 = vector.load %arg2[%58, %c0_21, %c0_22] : memref<57x1x512xf32, #tpu.memory_space<vmem>>, vector<1x1x512xf32>
    %60 = vector.shape_cast %59 : vector<1x1x512xf32> to vector<1x512xf32>
    %61 = arith.addf %53, %60 : vector<1x512xf32>
    %c0_23 = arith.constant 0 : index
    %c0_24 = arith.constant 0 : index
    %62 = vector.load %arg4[%c0_23, %c0_24] : memref<1x512xf32, #tpu.memory_space<vmem>>, vector<1x512xf32>
    %63 = arith.addf %61, %62 : vector<1x512xf32>
    %64 = vector.extract_strided_slice %63 {offsets = [0, 0], sizes = [1, 128], strides = [1, 1]} : vector<1x512xf32> to vector<1x128xf32>
    %65 = arith.negf %64 : vector<1x128xf32>
    %66 = math.exp %65 : vector<1x128xf32>
    %cst_25 = arith.constant 1.000000e+00 : f32
    %67 = vector.broadcast %cst_25 : f32 to vector<1x128xf32>
    %68 = arith.addf %67, %66 : vector<1x128xf32>
    %69 = arith.divf %67, %68 : vector<1x128xf32>
    %70 = vector.extract_strided_slice %63 {offsets = [0, 128], sizes = [1, 128], strides = [1, 1]} : vector<1x512xf32> to vector<1x128xf32>
    %71 = math.tanh %70 : vector<1x128xf32>
    %72 = vector.extract_strided_slice %63 {offsets = [0, 256], sizes = [1, 128], strides = [1, 1]} : vector<1x512xf32> to vector<1x128xf32>
    %73 = arith.negf %72 : vector<1x128xf32>
    %74 = math.exp %73 : vector<1x128xf32>
    %cst_26 = arith.constant 1.000000e+00 : f32
    %75 = vector.broadcast %cst_26 : f32 to vector<1x128xf32>
    %76 = arith.addf %75, %74 : vector<1x128xf32>
    %77 = arith.divf %75, %76 : vector<1x128xf32>
    %78 = arith.mulf %69, %71 : vector<1x128xf32>
    %79 = math.tanh %78 : vector<1x128xf32>
    %80 = arith.mulf %77, %79 : vector<1x128xf32>
    %81 = vector.extract_strided_slice %63 {offsets = [0, 384], sizes = [1, 128], strides = [1, 1]} : vector<1x512xf32> to vector<1x128xf32>
    %cst_27 = arith.constant dense<0xFF800000> : vector<1xf32>
    %82 = vector.multi_reduction <maximumf>, %81, %cst_27 [1] : vector<1x128xf32> to vector<1xf32>
    %83 = vector.shape_cast %82 : vector<1xf32> to vector<1x1xf32>
    %84 = vector.broadcast %83 : vector<1x1xf32> to vector<1x128xf32>
    %85 = arith.subf %81, %84 : vector<1x128xf32>
    %86 = math.exp %85 : vector<1x128xf32>
    %cst_28 = arith.constant dense<0.000000e+00> : vector<1xf32>
    %87 = vector.multi_reduction <add>, %86, %cst_28 [1] : vector<1x128xf32> to vector<1xf32>
    %88 = vector.shape_cast %87 : vector<1xf32> to vector<1x1xf32>
    %89 = math.log %88 : vector<1x1xf32>
    %90 = arith.addf %83, %89 : vector<1x1xf32>
    %91 = vector.broadcast %90 : vector<1x1xf32> to vector<1x128xf32>
    %92 = arith.subf %81, %91 : vector<1x128xf32>
    %93 = arith.index_cast %c1_i32_16 : i32 to index
    %c0_29 = arith.constant 0 : index
    %c0_30 = arith.constant 0 : index
    %94 = vector.load %arg7[%93, %c0_29, %c0_30] : memref<8x1x128xf32, #tpu.memory_space<vmem>>, vector<1x1x128xf32>
    %95 = vector.shape_cast %94 : vector<1x1x128xf32> to vector<1x128xf32>
    %96 = vector.shape_cast %92 : vector<1x128xf32> to vector<1x1x128xf32>
    tpu.vector_store %arg7[%93, %c0_29, %c0_30], %96 {strides = array<i32>} : memref<8x1x128xf32, #tpu.memory_space<vmem>>, vector<1x1x128xf32>,
    %c2_i32 = arith.constant 2 : i32
    %97 = tpu.concatenate %80, %78 in 1 : vector<1x128xf32>, vector<1x128xf32> -> vector<1x256xf32>
    %98 = arith.truncf %97 : vector<1x256xf32> to vector<1x256xbf16>
    %c0_31 = arith.constant 0 : index
    %c0_32 = arith.constant 0 : index
    %99 = vector.load %arg3[%c0_31, %c0_32] : memref<256x512xbf16, #tpu.memory_space<vmem>>, vector<256x512xbf16>
    %cst_33 = arith.constant dense<0.000000e+00> : vector<1x512xf32>
    %100 = tpu.matmul %98, %99, %cst_33 {dimension_numbers = #tpu.dot_dimension_numbers<[1], [0], [0], [1], [0, 0, 1, 1], [], []>} : vector<1x256xbf16>, vector<256x512xbf16>, vector<1x512xf32> -> vector<1x512xf32>
    %c0_i32_34 = arith.constant 0 : i32
    %101 = arith.addi %0, %c0_i32_34 : i32
    %102 = arith.index_cast %c2_i32 : i32 to index
    %103 = arith.index_cast %101 : i32 to index
    %104 = memref.load %arg1[%102, %103] : memref<8x1xi32, #tpu.memory_space<smem>>
    %105 = arith.index_cast %104 : i32 to index
    %c0_35 = arith.constant 0 : index
    %c0_36 = arith.constant 0 : index
    %106 = vector.load %arg2[%105, %c0_35, %c0_36] : memref<57x1x512xf32, #tpu.memory_space<vmem>>, vector<1x1x512xf32>
    %107 = vector.shape_cast %106 : vector<1x1x512xf32> to vector<1x512xf32>
    %108 = arith.addf %100, %107 : vector<1x512xf32>
    %c0_37 = arith.constant 0 : index
    %c0_38 = arith.constant 0 : index
    %109 = vector.load %arg4[%c0_37, %c0_38] : memref<1x512xf32, #tpu.memory_space<vmem>>, vector<1x512xf32>
    %110 = arith.addf %108, %109 : vector<1x512xf32>
    %111 = vector.extract_strided_slice %110 {offsets = [0, 0], sizes = [1, 128], strides = [1, 1]} : vector<1x512xf32> to vector<1x128xf32>
    %112 = arith.negf %111 : vector<1x128xf32>
    %113 = math.exp %112 : vector<1x128xf32>
    %cst_39 = arith.constant 1.000000e+00 : f32
    %114 = vector.broadcast %cst_39 : f32 to vector<1x128xf32>
    %115 = arith.addf %114, %113 : vector<1x128xf32>
    %116 = arith.divf %114, %115 : vector<1x128xf32>
    %117 = vector.extract_strided_slice %110 {offsets = [0, 128], sizes = [1, 128], strides = [1, 1]} : vector<1x512xf32> to vector<1x128xf32>
    %118 = math.tanh %117 : vector<1x128xf32>
    %119 = vector.extract_strided_slice %110 {offsets = [0, 256], sizes = [1, 128], strides = [1, 1]} : vector<1x512xf32> to vector<1x128xf32>
    %120 = arith.negf %119 : vector<1x128xf32>
    %121 = math.exp %120 : vector<1x128xf32>
    %cst_40 = arith.constant 1.000000e+00 : f32
    %122 = vector.broadcast %cst_40 : f32 to vector<1x128xf32>
    %123 = arith.addf %122, %121 : vector<1x128xf32>
    %124 = arith.divf %122, %123 : vector<1x128xf32>
    %125 = arith.mulf %116, %118 : vector<1x128xf32>
    %126 = math.tanh %125 : vector<1x128xf32>
    %127 = arith.mulf %124, %126 : vector<1x128xf32>
    %128 = vector.extract_strided_slice %110 {offsets = [0, 384], sizes = [1, 128], strides = [1, 1]} : vector<1x512xf32> to vector<1x128xf32>
    %cst_41 = arith.constant dense<0xFF800000> : vector<1xf32>
    %129 = vector.multi_reduction <maximumf>, %128, %cst_41 [1] : vector<1x128xf32> to vector<1xf32>
    %130 = vector.shape_cast %129 : vector<1xf32> to vector<1x1xf32>
    %131 = vector.broadcast %130 : vector<1x1xf32> to vector<1x128xf32>
    %132 = arith.subf %128, %131 : vector<1x128xf32>
    %133 = math.exp %132 : vector<1x128xf32>
    %cst_42 = arith.constant dense<0.000000e+00> : vector<1xf32>
    %134 = vector.multi_reduction <add>, %133, %cst_42 [1] : vector<1x128xf32> to vector<1xf32>
    %135 = vector.shape_cast %134 : vector<1xf32> to vector<1x1xf32>
    %136 = math.log %135 : vector<1x1xf32>
    %137 = arith.addf %130, %136 : vector<1x1xf32>
    %138 = vector.broadcast %137 : vector<1x1xf32> to vector<1x128xf32>
    %139 = arith.subf %128, %138 : vector<1x128xf32>
    %140 = arith.index_cast %c2_i32 : i32 to index
    %c0_43 = arith.constant 0 : index
    %c0_44 = arith.constant 0 : index
    %141 = vector.load %arg7[%140, %c0_43, %c0_44] : memref<8x1x128xf32, #tpu.memory_space<vmem>>, vector<1x1x128xf32>
    %142 = vector.shape_cast %141 : vector<1x1x128xf32> to vector<1x128xf32>
    %143 = vector.shape_cast %139 : vector<1x128xf32> to vector<1x1x128xf32>
    tpu.vector_store %arg7[%140, %c0_43, %c0_44], %143 {strides = array<i32>} : memref<8x1x128xf32, #tpu.memory_space<vmem>>, vector<1x1x128xf32>,
    %c3_i32 = arith.constant 3 : i32
    %144 = tpu.concatenate %127, %125 in 1 : vector<1x128xf32>, vector<1x128xf32> -> vector<1x256xf32>
    %145 = arith.truncf %144 : vector<1x256xf32> to vector<1x256xbf16>
    %c0_45 = arith.constant 0 : index
    %c0_46 = arith.constant 0 : index
    %146 = vector.load %arg3[%c0_45, %c0_46] : memref<256x512xbf16, #tpu.memory_space<vmem>>, vector<256x512xbf16>
    %cst_47 = arith.constant dense<0.000000e+00> : vector<1x512xf32>
    %147 = tpu.matmul %145, %146, %cst_47 {dimension_numbers = #tpu.dot_dimension_numbers<[1], [0], [0], [1], [0, 0, 1, 1], [], []>} : vector<1x256xbf16>, vector<256x512xbf16>, vector<1x512xf32> -> vector<1x512xf32>
    %c0_i32_48 = arith.constant 0 : i32
    %148 = arith.addi %0, %c0_i32_48 : i32
    %149 = arith.index_cast %c3_i32 : i32 to index
    %150 = arith.index_cast %148 : i32 to index
    %151 = memref.load %arg1[%149, %150] : memref<8x1xi32, #tpu.memory_space<smem>>
    %152 = arith.index_cast %151 : i32 to index
    %c0_49 = arith.constant 0 : index
    %c0_50 = arith.constant 0 : index
    %153 = vector.load %arg2[%152, %c0_49, %c0_50] : memref<57x1x512xf32, #tpu.memory_space<vmem>>, vector<1x1x512xf32>
    %154 = vector.shape_cast %153 : vector<1x1x512xf32> to vector<1x512xf32>
    %155 = arith.addf %147, %154 : vector<1x512xf32>
    %c0_51 = arith.constant 0 : index
    %c0_52 = arith.constant 0 : index
    %156 = vector.load %arg4[%c0_51, %c0_52] : memref<1x512xf32, #tpu.memory_space<vmem>>, vector<1x512xf32>
    %157 = arith.addf %155, %156 : vector<1x512xf32>
    %158 = vector.extract_strided_slice %157 {offsets = [0, 0], sizes = [1, 128], strides = [1, 1]} : vector<1x512xf32> to vector<1x128xf32>
    %159 = arith.negf %158 : vector<1x128xf32>
    %160 = math.exp %159 : vector<1x128xf32>
    %cst_53 = arith.constant 1.000000e+00 : f32
    %161 = vector.broadcast %cst_53 : f32 to vector<1x128xf32>
    %162 = arith.addf %161, %160 : vector<1x128xf32>
    %163 = arith.divf %161, %162 : vector<1x128xf32>
    %164 = vector.extract_strided_slice %157 {offsets = [0, 128], sizes = [1, 128], strides = [1, 1]} : vector<1x512xf32> to vector<1x128xf32>
    %165 = math.tanh %164 : vector<1x128xf32>
    %166 = vector.extract_strided_slice %157 {offsets = [0, 256], sizes = [1, 128], strides = [1, 1]} : vector<1x512xf32> to vector<1x128xf32>
    %167 = arith.negf %166 : vector<1x128xf32>
    %168 = math.exp %167 : vector<1x128xf32>
    %cst_54 = arith.constant 1.000000e+00 : f32
    %169 = vector.broadcast %cst_54 : f32 to vector<1x128xf32>
    %170 = arith.addf %169, %168 : vector<1x128xf32>
    %171 = arith.divf %169, %170 : vector<1x128xf32>
    %172 = arith.mulf %163, %165 : vector<1x128xf32>
    %173 = math.tanh %172 : vector<1x128xf32>
    %174 = arith.mulf %171, %173 : vector<1x128xf32>
    %175 = vector.extract_strided_slice %157 {offsets = [0, 384], sizes = [1, 128], strides = [1, 1]} : vector<1x512xf32> to vector<1x128xf32>
    %cst_55 = arith.constant dense<0xFF800000> : vector<1xf32>
    %176 = vector.multi_reduction <maximumf>, %175, %cst_55 [1] : vector<1x128xf32> to vector<1xf32>
    %177 = vector.shape_cast %176 : vector<1xf32> to vector<1x1xf32>
    %178 = vector.broadcast %177 : vector<1x1xf32> to vector<1x128xf32>
    %179 = arith.subf %175, %178 : vector<1x128xf32>
    %180 = math.exp %179 : vector<1x128xf32>
    %cst_56 = arith.constant dense<0.000000e+00> : vector<1xf32>
    %181 = vector.multi_reduction <add>, %180, %cst_56 [1] : vector<1x128xf32> to vector<1xf32>
    %182 = vector.shape_cast %181 : vector<1xf32> to vector<1x1xf32>
    %183 = math.log %182 : vector<1x1xf32>
    %184 = arith.addf %177, %183 : vector<1x1xf32>
    %185 = vector.broadcast %184 : vector<1x1xf32> to vector<1x128xf32>
    %186 = arith.subf %175, %185 : vector<1x128xf32>
    %187 = arith.index_cast %c3_i32 : i32 to index
    %c0_57 = arith.constant 0 : index
    %c0_58 = arith.constant 0 : index
    %188 = vector.load %arg7[%187, %c0_57, %c0_58] : memref<8x1x128xf32, #tpu.memory_space<vmem>>, vector<1x1x128xf32>
    %189 = vector.shape_cast %188 : vector<1x1x128xf32> to vector<1x128xf32>
    %190 = vector.shape_cast %186 : vector<1x128xf32> to vector<1x1x128xf32>
    tpu.vector_store %arg7[%187, %c0_57, %c0_58], %190 {strides = array<i32>} : memref<8x1x128xf32, #tpu.memory_space<vmem>>, vector<1x1x128xf32>,
    %c4_i32 = arith.constant 4 : i32
    %191 = tpu.concatenate %174, %172 in 1 : vector<1x128xf32>, vector<1x128xf32> -> vector<1x256xf32>
    %192 = arith.truncf %191 : vector<1x256xf32> to vector<1x256xbf16>
    %c0_59 = arith.constant 0 : index
    %c0_60 = arith.constant 0 : index
    %193 = vector.load %arg3[%c0_59, %c0_60] : memref<256x512xbf16, #tpu.memory_space<vmem>>, vector<256x512xbf16>
    %cst_61 = arith.constant dense<0.000000e+00> : vector<1x512xf32>
    %194 = tpu.matmul %192, %193, %cst_61 {dimension_numbers = #tpu.dot_dimension_numbers<[1], [0], [0], [1], [0, 0, 1, 1], [], []>} : vector<1x256xbf16>, vector<256x512xbf16>, vector<1x512xf32> -> vector<1x512xf32>
    %c0_i32_62 = arith.constant 0 : i32
    %195 = arith.addi %0, %c0_i32_62 : i32
    %196 = arith.index_cast %c4_i32 : i32 to index
    %197 = arith.index_cast %195 : i32 to index
    %198 = memref.load %arg1[%196, %197] : memref<8x1xi32, #tpu.memory_space<smem>>
    %199 = arith.index_cast %198 : i32 to index
    %c0_63 = arith.constant 0 : index
    %c0_64 = arith.constant 0 : index
    %200 = vector.load %arg2[%199, %c0_63, %c0_64] : memref<57x1x512xf32, #tpu.memory_space<vmem>>, vector<1x1x512xf32>
    %201 = vector.shape_cast %200 : vector<1x1x512xf32> to vector<1x512xf32>
    %202 = arith.addf %194, %201 : vector<1x512xf32>
    %c0_65 = arith.constant 0 : index
    %c0_66 = arith.constant 0 : index
    %203 = vector.load %arg4[%c0_65, %c0_66] : memref<1x512xf32, #tpu.memory_space<vmem>>, vector<1x512xf32>
    %204 = arith.addf %202, %203 : vector<1x512xf32>
    %205 = vector.extract_strided_slice %204 {offsets = [0, 0], sizes = [1, 128], strides = [1, 1]} : vector<1x512xf32> to vector<1x128xf32>
    %206 = arith.negf %205 : vector<1x128xf32>
    %207 = math.exp %206 : vector<1x128xf32>
    %cst_67 = arith.constant 1.000000e+00 : f32
    %208 = vector.broadcast %cst_67 : f32 to vector<1x128xf32>
    %209 = arith.addf %208, %207 : vector<1x128xf32>
    %210 = arith.divf %208, %209 : vector<1x128xf32>
    %211 = vector.extract_strided_slice %204 {offsets = [0, 128], sizes = [1, 128], strides = [1, 1]} : vector<1x512xf32> to vector<1x128xf32>
    %212 = math.tanh %211 : vector<1x128xf32>
    %213 = vector.extract_strided_slice %204 {offsets = [0, 256], sizes = [1, 128], strides = [1, 1]} : vector<1x512xf32> to vector<1x128xf32>
    %214 = arith.negf %213 : vector<1x128xf32>
    %215 = math.exp %214 : vector<1x128xf32>
    %cst_68 = arith.constant 1.000000e+00 : f32
    %216 = vector.broadcast %cst_68 : f32 to vector<1x128xf32>
    %217 = arith.addf %216, %215 : vector<1x128xf32>
    %218 = arith.divf %216, %217 : vector<1x128xf32>
    %219 = arith.mulf %210, %212 : vector<1x128xf32>
    %220 = math.tanh %219 : vector<1x128xf32>
    %221 = arith.mulf %218, %220 : vector<1x128xf32>
    %222 = vector.extract_strided_slice %204 {offsets = [0, 384], sizes = [1, 128], strides = [1, 1]} : vector<1x512xf32> to vector<1x128xf32>
    %cst_69 = arith.constant dense<0xFF800000> : vector<1xf32>
    %223 = vector.multi_reduction <maximumf>, %222, %cst_69 [1] : vector<1x128xf32> to vector<1xf32>
    %224 = vector.shape_cast %223 : vector<1xf32> to vector<1x1xf32>
    %225 = vector.broadcast %224 : vector<1x1xf32> to vector<1x128xf32>
    %226 = arith.subf %222, %225 : vector<1x128xf32>
    %227 = math.exp %226 : vector<1x128xf32>
    %cst_70 = arith.constant dense<0.000000e+00> : vector<1xf32>
    %228 = vector.multi_reduction <add>, %227, %cst_70 [1] : vector<1x128xf32> to vector<1xf32>
    %229 = vector.shape_cast %228 : vector<1xf32> to vector<1x1xf32>
    %230 = math.log %229 : vector<1x1xf32>
    %231 = arith.addf %224, %230 : vector<1x1xf32>
    %232 = vector.broadcast %231 : vector<1x1xf32> to vector<1x128xf32>
    %233 = arith.subf %222, %232 : vector<1x128xf32>
    %234 = arith.index_cast %c4_i32 : i32 to index
    %c0_71 = arith.constant 0 : index
    %c0_72 = arith.constant 0 : index
    %235 = vector.load %arg7[%234, %c0_71, %c0_72] : memref<8x1x128xf32, #tpu.memory_space<vmem>>, vector<1x1x128xf32>
    %236 = vector.shape_cast %235 : vector<1x1x128xf32> to vector<1x128xf32>
    %237 = vector.shape_cast %233 : vector<1x128xf32> to vector<1x1x128xf32>
    tpu.vector_store %arg7[%234, %c0_71, %c0_72], %237 {strides = array<i32>} : memref<8x1x128xf32, #tpu.memory_space<vmem>>, vector<1x1x128xf32>,
    %c5_i32 = arith.constant 5 : i32
    %238 = tpu.concatenate %221, %219 in 1 : vector<1x128xf32>, vector<1x128xf32> -> vector<1x256xf32>
    %239 = arith.truncf %238 : vector<1x256xf32> to vector<1x256xbf16>
    %c0_73 = arith.constant 0 : index
    %c0_74 = arith.constant 0 : index
    %240 = vector.load %arg3[%c0_73, %c0_74] : memref<256x512xbf16, #tpu.memory_space<vmem>>, vector<256x512xbf16>
    %cst_75 = arith.constant dense<0.000000e+00> : vector<1x512xf32>
    %241 = tpu.matmul %239, %240, %cst_75 {dimension_numbers = #tpu.dot_dimension_numbers<[1], [0], [0], [1], [0, 0, 1, 1], [], []>} : vector<1x256xbf16>, vector<256x512xbf16>, vector<1x512xf32> -> vector<1x512xf32>
    %c0_i32_76 = arith.constant 0 : i32
    %242 = arith.addi %0, %c0_i32_76 : i32
    %243 = arith.index_cast %c5_i32 : i32 to index
    %244 = arith.index_cast %242 : i32 to index
    %245 = memref.load %arg1[%243, %244] : memref<8x1xi32, #tpu.memory_space<smem>>
    %246 = arith.index_cast %245 : i32 to index
    %c0_77 = arith.constant 0 : index
    %c0_78 = arith.constant 0 : index
    %247 = vector.load %arg2[%246, %c0_77, %c0_78] : memref<57x1x512xf32, #tpu.memory_space<vmem>>, vector<1x1x512xf32>
    %248 = vector.shape_cast %247 : vector<1x1x512xf32> to vector<1x512xf32>
    %249 = arith.addf %241, %248 : vector<1x512xf32>
    %c0_79 = arith.constant 0 : index
    %c0_80 = arith.constant 0 : index
    %250 = vector.load %arg4[%c0_79, %c0_80] : memref<1x512xf32, #tpu.memory_space<vmem>>, vector<1x512xf32>
    %251 = arith.addf %249, %250 : vector<1x512xf32>
    %252 = vector.extract_strided_slice %251 {offsets = [0, 0], sizes = [1, 128], strides = [1, 1]} : vector<1x512xf32> to vector<1x128xf32>
    %253 = arith.negf %252 : vector<1x128xf32>
    %254 = math.exp %253 : vector<1x128xf32>
    %cst_81 = arith.constant 1.000000e+00 : f32
    %255 = vector.broadcast %cst_81 : f32 to vector<1x128xf32>
    %256 = arith.addf %255, %254 : vector<1x128xf32>
    %257 = arith.divf %255, %256 : vector<1x128xf32>
    %258 = vector.extract_strided_slice %251 {offsets = [0, 128], sizes = [1, 128], strides = [1, 1]} : vector<1x512xf32> to vector<1x128xf32>
    %259 = math.tanh %258 : vector<1x128xf32>
    %260 = vector.extract_strided_slice %251 {offsets = [0, 256], sizes = [1, 128], strides = [1, 1]} : vector<1x512xf32> to vector<1x128xf32>
    %261 = arith.negf %260 : vector<1x128xf32>
    %262 = math.exp %261 : vector<1x128xf32>
    %cst_82 = arith.constant 1.000000e+00 : f32
    %263 = vector.broadcast %cst_82 : f32 to vector<1x128xf32>
    %264 = arith.addf %263, %262 : vector<1x128xf32>
    %265 = arith.divf %263, %264 : vector<1x128xf32>
    %266 = arith.mulf %257, %259 : vector<1x128xf32>
    %267 = math.tanh %266 : vector<1x128xf32>
    %268 = arith.mulf %265, %267 : vector<1x128xf32>
    %269 = vector.extract_strided_slice %251 {offsets = [0, 384], sizes = [1, 128], strides = [1, 1]} : vector<1x512xf32> to vector<1x128xf32>
    %cst_83 = arith.constant dense<0xFF800000> : vector<1xf32>
    %270 = vector.multi_reduction <maximumf>, %269, %cst_83 [1] : vector<1x128xf32> to vector<1xf32>
    %271 = vector.shape_cast %270 : vector<1xf32> to vector<1x1xf32>
    %272 = vector.broadcast %271 : vector<1x1xf32> to vector<1x128xf32>
    %273 = arith.subf %269, %272 : vector<1x128xf32>
    %274 = math.exp %273 : vector<1x128xf32>
    %cst_84 = arith.constant dense<0.000000e+00> : vector<1xf32>
    %275 = vector.multi_reduction <add>, %274, %cst_84 [1] : vector<1x128xf32> to vector<1xf32>
    %276 = vector.shape_cast %275 : vector<1xf32> to vector<1x1xf32>
    %277 = math.log %276 : vector<1x1xf32>
    %278 = arith.addf %271, %277 : vector<1x1xf32>
    %279 = vector.broadcast %278 : vector<1x1xf32> to vector<1x128xf32>
    %280 = arith.subf %269, %279 : vector<1x128xf32>
    %281 = arith.index_cast %c5_i32 : i32 to index
    %c0_85 = arith.constant 0 : index
    %c0_86 = arith.constant 0 : index
    %282 = vector.load %arg7[%281, %c0_85, %c0_86] : memref<8x1x128xf32, #tpu.memory_space<vmem>>, vector<1x1x128xf32>
    %283 = vector.shape_cast %282 : vector<1x1x128xf32> to vector<1x128xf32>
    %284 = vector.shape_cast %280 : vector<1x128xf32> to vector<1x1x128xf32>
    tpu.vector_store %arg7[%281, %c0_85, %c0_86], %284 {strides = array<i32>} : memref<8x1x128xf32, #tpu.memory_space<vmem>>, vector<1x1x128xf32>,
    %c6_i32 = arith.constant 6 : i32
    %285 = tpu.concatenate %268, %266 in 1 : vector<1x128xf32>, vector<1x128xf32> -> vector<1x256xf32>
    %286 = arith.truncf %285 : vector<1x256xf32> to vector<1x256xbf16>
    %c0_87 = arith.constant 0 : index
    %c0_88 = arith.constant 0 : index
    %287 = vector.load %arg3[%c0_87, %c0_88] : memref<256x512xbf16, #tpu.memory_space<vmem>>, vector<256x512xbf16>
    %cst_89 = arith.constant dense<0.000000e+00> : vector<1x512xf32>
    %288 = tpu.matmul %286, %287, %cst_89 {dimension_numbers = #tpu.dot_dimension_numbers<[1], [0], [0], [1], [0, 0, 1, 1], [], []>} : vector<1x256xbf16>, vector<256x512xbf16>, vector<1x512xf32> -> vector<1x512xf32>
    %c0_i32_90 = arith.constant 0 : i32
    %289 = arith.addi %0, %c0_i32_90 : i32
    %290 = arith.index_cast %c6_i32 : i32 to index
    %291 = arith.index_cast %289 : i32 to index
    %292 = memref.load %arg1[%290, %291] : memref<8x1xi32, #tpu.memory_space<smem>>
    %293 = arith.index_cast %292 : i32 to index
    %c0_91 = arith.constant 0 : index
    %c0_92 = arith.constant 0 : index
    %294 = vector.load %arg2[%293, %c0_91, %c0_92] : memref<57x1x512xf32, #tpu.memory_space<vmem>>, vector<1x1x512xf32>
    %295 = vector.shape_cast %294 : vector<1x1x512xf32> to vector<1x512xf32>
    %296 = arith.addf %288, %295 : vector<1x512xf32>
    %c0_93 = arith.constant 0 : index
    %c0_94 = arith.constant 0 : index
    %297 = vector.load %arg4[%c0_93, %c0_94] : memref<1x512xf32, #tpu.memory_space<vmem>>, vector<1x512xf32>
    %298 = arith.addf %296, %297 : vector<1x512xf32>
    %299 = vector.extract_strided_slice %298 {offsets = [0, 0], sizes = [1, 128], strides = [1, 1]} : vector<1x512xf32> to vector<1x128xf32>
    %300 = arith.negf %299 : vector<1x128xf32>
    %301 = math.exp %300 : vector<1x128xf32>
    %cst_95 = arith.constant 1.000000e+00 : f32
    %302 = vector.broadcast %cst_95 : f32 to vector<1x128xf32>
    %303 = arith.addf %302, %301 : vector<1x128xf32>
    %304 = arith.divf %302, %303 : vector<1x128xf32>
    %305 = vector.extract_strided_slice %298 {offsets = [0, 128], sizes = [1, 128], strides = [1, 1]} : vector<1x512xf32> to vector<1x128xf32>
    %306 = math.tanh %305 : vector<1x128xf32>
    %307 = vector.extract_strided_slice %298 {offsets = [0, 256], sizes = [1, 128], strides = [1, 1]} : vector<1x512xf32> to vector<1x128xf32>
    %308 = arith.negf %307 : vector<1x128xf32>
    %309 = math.exp %308 : vector<1x128xf32>
    %cst_96 = arith.constant 1.000000e+00 : f32
    %310 = vector.broadcast %cst_96 : f32 to vector<1x128xf32>
    %311 = arith.addf %310, %309 : vector<1x128xf32>
    %312 = arith.divf %310, %311 : vector<1x128xf32>
    %313 = arith.mulf %304, %306 : vector<1x128xf32>
    %314 = math.tanh %313 : vector<1x128xf32>
    %315 = arith.mulf %312, %314 : vector<1x128xf32>
    %316 = vector.extract_strided_slice %298 {offsets = [0, 384], sizes = [1, 128], strides = [1, 1]} : vector<1x512xf32> to vector<1x128xf32>
    %cst_97 = arith.constant dense<0xFF800000> : vector<1xf32>
    %317 = vector.multi_reduction <maximumf>, %316, %cst_97 [1] : vector<1x128xf32> to vector<1xf32>
    %318 = vector.shape_cast %317 : vector<1xf32> to vector<1x1xf32>
    %319 = vector.broadcast %318 : vector<1x1xf32> to vector<1x128xf32>
    %320 = arith.subf %316, %319 : vector<1x128xf32>
    %321 = math.exp %320 : vector<1x128xf32>
    %cst_98 = arith.constant dense<0.000000e+00> : vector<1xf32>
    %322 = vector.multi_reduction <add>, %321, %cst_98 [1] : vector<1x128xf32> to vector<1xf32>
    %323 = vector.shape_cast %322 : vector<1xf32> to vector<1x1xf32>
    %324 = math.log %323 : vector<1x1xf32>
    %325 = arith.addf %318, %324 : vector<1x1xf32>
    %326 = vector.broadcast %325 : vector<1x1xf32> to vector<1x128xf32>
    %327 = arith.subf %316, %326 : vector<1x128xf32>
    %328 = arith.index_cast %c6_i32 : i32 to index
    %c0_99 = arith.constant 0 : index
    %c0_100 = arith.constant 0 : index
    %329 = vector.load %arg7[%328, %c0_99, %c0_100] : memref<8x1x128xf32, #tpu.memory_space<vmem>>, vector<1x1x128xf32>
    %330 = vector.shape_cast %329 : vector<1x1x128xf32> to vector<1x128xf32>
    %331 = vector.shape_cast %327 : vector<1x128xf32> to vector<1x1x128xf32>
    tpu.vector_store %arg7[%328, %c0_99, %c0_100], %331 {strides = array<i32>} : memref<8x1x128xf32, #tpu.memory_space<vmem>>, vector<1x1x128xf32>,
    %c7_i32 = arith.constant 7 : i32
    %332 = tpu.concatenate %315, %313 in 1 : vector<1x128xf32>, vector<1x128xf32> -> vector<1x256xf32>
    %333 = arith.truncf %332 : vector<1x256xf32> to vector<1x256xbf16>
    %c0_101 = arith.constant 0 : index
    %c0_102 = arith.constant 0 : index
    %334 = vector.load %arg3[%c0_101, %c0_102] : memref<256x512xbf16, #tpu.memory_space<vmem>>, vector<256x512xbf16>
    %cst_103 = arith.constant dense<0.000000e+00> : vector<1x512xf32>
    %335 = tpu.matmul %333, %334, %cst_103 {dimension_numbers = #tpu.dot_dimension_numbers<[1], [0], [0], [1], [0, 0, 1, 1], [], []>} : vector<1x256xbf16>, vector<256x512xbf16>, vector<1x512xf32> -> vector<1x512xf32>
    %c0_i32_104 = arith.constant 0 : i32
    %336 = arith.addi %0, %c0_i32_104 : i32
    %337 = arith.index_cast %c7_i32 : i32 to index
    %338 = arith.index_cast %336 : i32 to index
    %339 = memref.load %arg1[%337, %338] : memref<8x1xi32, #tpu.memory_space<smem>>
    %340 = arith.index_cast %339 : i32 to index
    %c0_105 = arith.constant 0 : index
    %c0_106 = arith.constant 0 : index
    %341 = vector.load %arg2[%340, %c0_105, %c0_106] : memref<57x1x512xf32, #tpu.memory_space<vmem>>, vector<1x1x512xf32>
    %342 = vector.shape_cast %341 : vector<1x1x512xf32> to vector<1x512xf32>
    %343 = arith.addf %335, %342 : vector<1x512xf32>
    %c0_107 = arith.constant 0 : index
    %c0_108 = arith.constant 0 : index
    %344 = vector.load %arg4[%c0_107, %c0_108] : memref<1x512xf32, #tpu.memory_space<vmem>>, vector<1x512xf32>
    %345 = arith.addf %343, %344 : vector<1x512xf32>
    %346 = vector.extract_strided_slice %345 {offsets = [0, 0], sizes = [1, 128], strides = [1, 1]} : vector<1x512xf32> to vector<1x128xf32>
    %347 = arith.negf %346 : vector<1x128xf32>
    %348 = math.exp %347 : vector<1x128xf32>
    %cst_109 = arith.constant 1.000000e+00 : f32
    %349 = vector.broadcast %cst_109 : f32 to vector<1x128xf32>
    %350 = arith.addf %349, %348 : vector<1x128xf32>
    %351 = arith.divf %349, %350 : vector<1x128xf32>
    %352 = vector.extract_strided_slice %345 {offsets = [0, 128], sizes = [1, 128], strides = [1, 1]} : vector<1x512xf32> to vector<1x128xf32>
    %353 = math.tanh %352 : vector<1x128xf32>
    %354 = vector.extract_strided_slice %345 {offsets = [0, 256], sizes = [1, 128], strides = [1, 1]} : vector<1x512xf32> to vector<1x128xf32>
    %355 = arith.negf %354 : vector<1x128xf32>
    %356 = math.exp %355 : vector<1x128xf32>
    %cst_110 = arith.constant 1.000000e+00 : f32
    %357 = vector.broadcast %cst_110 : f32 to vector<1x128xf32>
    %358 = arith.addf %357, %356 : vector<1x128xf32>
    %359 = arith.divf %357, %358 : vector<1x128xf32>
    %360 = arith.mulf %351, %353 : vector<1x128xf32>
    %361 = math.tanh %360 : vector<1x128xf32>
    %362 = arith.mulf %359, %361 : vector<1x128xf32>
    %363 = vector.extract_strided_slice %345 {offsets = [0, 384], sizes = [1, 128], strides = [1, 1]} : vector<1x512xf32> to vector<1x128xf32>
    %cst_111 = arith.constant dense<0xFF800000> : vector<1xf32>
    %364 = vector.multi_reduction <maximumf>, %363, %cst_111 [1] : vector<1x128xf32> to vector<1xf32>
    %365 = vector.shape_cast %364 : vector<1xf32> to vector<1x1xf32>
    %366 = vector.broadcast %365 : vector<1x1xf32> to vector<1x128xf32>
    %367 = arith.subf %363, %366 : vector<1x128xf32>
    %368 = math.exp %367 : vector<1x128xf32>
    %cst_112 = arith.constant dense<0.000000e+00> : vector<1xf32>
    %369 = vector.multi_reduction <add>, %368, %cst_112 [1] : vector<1x128xf32> to vector<1xf32>
    %370 = vector.shape_cast %369 : vector<1xf32> to vector<1x1xf32>
    %371 = math.log %370 : vector<1x1xf32>
    %372 = arith.addf %365, %371 : vector<1x1xf32>
    %373 = vector.broadcast %372 : vector<1x1xf32> to vector<1x128xf32>
    %374 = arith.subf %363, %373 : vector<1x128xf32>
    %375 = arith.index_cast %c7_i32 : i32 to index
    %c0_113 = arith.constant 0 : index
    %c0_114 = arith.constant 0 : index
    %376 = vector.load %arg7[%375, %c0_113, %c0_114] : memref<8x1x128xf32, #tpu.memory_space<vmem>>, vector<1x1x128xf32>
    %377 = vector.shape_cast %376 : vector<1x1x128xf32> to vector<1x128xf32>
    %378 = vector.shape_cast %374 : vector<1x128xf32> to vector<1x1x128xf32>
    tpu.vector_store %arg7[%375, %c0_113, %c0_114], %378 {strides = array<i32>} : memref<8x1x128xf32, #tpu.memory_space<vmem>>, vector<1x1x128xf32>,
    %c8_i32 = arith.constant 8 : i32
    %c0_115 = arith.constant 0 : index
    %c0_116 = arith.constant 0 : index
    %379 = vector.load %arg8[%c0_115, %c0_116] : memref<1x128xf32, #tpu.memory_space<vmem>>, vector<1x128xf32>
    tpu.vector_store %arg8[%c0_115, %c0_116], %362 {strides = array<i32>} : memref<1x128xf32, #tpu.memory_space<vmem>>, vector<1x128xf32>,
    %c0_117 = arith.constant 0 : index
    %c0_118 = arith.constant 0 : index
    %380 = vector.load %arg9[%c0_117, %c0_118] : memref<1x128xf32, #tpu.memory_space<vmem>>, vector<1x128xf32>
    tpu.vector_store %arg9[%c0_117, %c0_118], %360 {strides = array<i32>} : memref<1x128xf32, #tpu.memory_space<vmem>>, vector<1x128xf32>,
    return
  }
  func.func @transform_0(%arg0: i32, %arg1: memref<8x1xi32, #tpu.memory_space<smem>>) -> (i32, i32, i32) {
    %c0_i32 = arith.constant 0 : i32
    %c0_i32_0 = arith.constant 0 : i32
    %c0_i32_1 = arith.constant 0 : i32
    %c0_i32_2 = arith.constant 0 : i32
    return %c0_i32, %c0_i32_0, %c0_i32_1 : i32, i32, i32
  }
  func.func @transform_1(%arg0: i32, %arg1: memref<8x1xi32, #tpu.memory_space<smem>>) -> (i32, i32) {
    %c0_i32 = arith.constant 0 : i32
    %c0_i32_0 = arith.constant 0 : i32
    %c0_i32_1 = arith.constant 0 : i32
    return %c0_i32, %c0_i32_0 : i32, i32
  }
  func.func @transform_2(%arg0: i32, %arg1: memref<8x1xi32, #tpu.memory_space<smem>>) -> (i32, i32) {
    %c0_i32 = arith.constant 0 : i32
    %c0_i32_0 = arith.constant 0 : i32
    %c0_i32_1 = arith.constant 0 : i32
    return %c0_i32, %c0_i32_0 : i32, i32
  }
  func.func @transform_3(%arg0: i32, %arg1: memref<8x1xi32, #tpu.memory_space<smem>>) -> (i32, i32) {
    %c0_i32 = arith.constant 0 : i32
    %c0_i32_0 = arith.constant 0 : i32
    return %arg0, %c0_i32 : i32, i32
  }
  func.func @transform_4(%arg0: i32, %arg1: memref<8x1xi32, #tpu.memory_space<smem>>) -> (i32, i32) {
    %c0_i32 = arith.constant 0 : i32
    %c0_i32_0 = arith.constant 0 : i32
    return %arg0, %c0_i32 : i32, i32
  }
  func.func @transform_5(%arg0: i32, %arg1: memref<8x1xi32, #tpu.memory_space<smem>>) -> (i32, i32, i32) {
    %c0_i32 = arith.constant 0 : i32
    %c0_i32_0 = arith.constant 0 : i32
    %c0_i32_1 = arith.constant 0 : i32
    return %c0_i32, %arg0, %c0_i32_0 : i32, i32, i32
  }
  func.func @transform_6(%arg0: i32, %arg1: memref<8x1xi32, #tpu.memory_space<smem>>) -> (i32, i32) {
    %c0_i32 = arith.constant 0 : i32
    %c0_i32_0 = arith.constant 0 : i32
    return %arg0, %c0_i32 : i32, i32
  }
  func.func @transform_7(%arg0: i32, %arg1: memref<8x1xi32, #tpu.memory_space<smem>>) -> (i32, i32) {
    %c0_i32 = arith.constant 0 : i32
    %c0_i32_0 = arith.constant 0 : i32
    return %arg0, %c0_i32 : i32, i32
  }
}

</mosaic_0001>

<bundles_post_ra>
// kernel: tpu_custom_call.1
= control target key start
LH: loop header
LB: loop body
LE: loop exit
PB: predicated region body
PF: predicated region fallthrough
CT: control target
= control target key end

     0   :  { %s6797_s0 = inlined_call_operand.vmem [shape: s32[8,1], index: 0, kind: input, shape index: {}]   ;;  %s6798_s1 = inlined_call_operand.hbm [shape: f32[57,1,512], index: 1, kind: input, shape index: {}]   ;;  %s6799_s2 = inlined_call_operand.hbm [shape: bf16[256,512], index: 2, kind: input, shape index: {}]   ;;  %s6800_s3 = inlined_call_operand.vmem [shape: f32[1,512], index: 3, kind: input, shape index: {}]   ;;  %s6801_s4 = inlined_call_operand.vmem [shape: f32[1,128], index: 4, kind: input, shape index: {}]   ;;  %s6802_s5 = inlined_call_operand.vmem [shape: f32[1,128], index: 5, kind: input, shape index: {}]   ;;  %s6803_s6 = inlined_call_operand.hbm [shape: f32[8,1,128], index: 6, kind: output, shape index: {0}]   ;;  %s6804_s7 = inlined_call_operand.hbm [shape: f32[1,128], index: 7, kind: output, shape index: {1}]   ;;  %s6805_s8 = inlined_call_operand.hbm [shape: f32[1,128], index: 8, kind: output, shape index: {2}]  }
   0x1   :  { %s14_s29 = sshll.u32 %s6797_s0, 4  ;;  %s15_s29 = int_to_ptr.vmem [resolvable:$true] %s14_s29 }
   0x2   :  { %s5516_s30 = scalar_lea.vmem %s15_s29, 128  ;;  %p5521_p1 = scmp.lt.s32.totalorder %s15_s29, %s15_s29 }
   0x3   :  { %p5517_p0 = scmp.ne.s32.totalorder %s15_s29, %s5516_s30  ;;  %p5522_p2 = scmp.lt.s32.totalorder %s5516_s30, %s5516_s30 }
   0x5   :  { %p5523_p3 = por %p5522_p2, %p5521_p1 }
   0x7   :  { %p5524_p4 = pnand %p5523_p3, %p5517_p0 }
   0x9   :  { %5527 = shalt.err (!%p5524_p4)  }
   0xa   :  { %s5638_s9 = smov [#allocation3]  }
   0xb   :  { %17 = dma.vmem_to_smem %s15_s29, 128, %s5638_s9, [#allocation2] }
   0xc   :  { %5628 = dma.done.wait [#allocation2], 128 }
   0xd   :  { %5629 = vsyncadd [#allocation2], 4294967168 }
   0xe   :  { %19 = sfence }
   0xf   :  { %20 = vsyncpa [#allocation5], 0 }
  0x10   :  { %21 = vsyncpa [#allocation8], 0 }
  0x11   :  { %22 = vsyncpa [#allocation6], 0 }
  0x12   :  { %23 = vsyncpa [#allocation11], 0  ;;  %s5639_s10 = smov [#allocation4]  }
  0x13   :  { %s29_s11 = sshll.u32 %s5639_s10, 4  ;;  %s30_s11 = int_to_ptr.vmem [resolvable:$true] %s29_s11 }
  0x14   :  { %s5536_s0 = scalar_lea.vmem %s30_s11, 3648  ;;  %p5541_p6 = scmp.lt.s32.totalorder %s30_s11, %s30_s11 }
  0x15   :  { %p5537_p5 = scmp.ne.s32.totalorder %s30_s11, %s5536_s0  ;;  %p5542_p7 = scmp.lt.s32.totalorder %s5536_s0, %s5536_s0 }
  0x17   :  { %p5543_p8 = por %p5542_p7, %p5541_p6 }
  0x19   :  { %p5544_p9 = pnand %p5543_p8, %p5537_p5 }
  0x1b   :  { %5547 = shalt.err (!%p5544_p9)
}
  0x1c   :  { %s5640_s12 = smov 64   ;;  %s5641_s13 = smov 4  }
  0x1d   :  { %35 = dma.hbm_to_vmem [thread:$0]  %s6798_s1, 3648, %s30_s11, [#allocation5], %s5640_s12, %s5640_s12, %s5641_s13  }
  0x1e   :  { %s5642_s16 = smov [#allocation7]  }
  0x1f   :  { %s41_s17 = sshll.u32 %s5642_s16, 4  ;;  %s42_s17 = int_to_ptr.vmem [resolvable:$true] %s41_s17 }
  0x20   :  { %s5556_s18 = scalar_lea.vmem %s42_s17, 8192  ;;  %p5561_p11 = scmp.lt.s32.totalorder %s42_s17, %s42_s17 }
  0x21   :  { %p5557_p10 = scmp.ne.s32.totalorder %s42_s17, %s5556_s18  ;;  %p5562_p12 = scmp.lt.s32.totalorder %s5556_s18, %s5556_s18 }
  0x23   :  { %p5563_p13 = por %p5562_p12, %p5561_p11 }
  0x25   :  { %p5564_p0 = pnand %p5563_p13, %p5557_p10 }
  0x27   :  { %5567 = shalt.err (!%p5564_p0)
}
  0x28   :  { %s5643_s19 = smov 256   ;;  %s5644_s20 = smov 16  }
  0x29   :  { %47 = dma.hbm_to_vmem [thread:$0]  %s6799_s2, 8192, %s42_s17, [#allocation8], %s5643_s19, %s5643_s19, %s5644_s20  }
  0x2a   :  { %5630 = dma.done.wait [#allocation5], 3648  }
  0x2b   :  { %5631 = vsyncadd [#allocation5], 4294963648 }
  0x2c   :  { %5632 = dma.done.wait [#allocation8], 8192  }
  0x2d   :  { %5633 = vsyncadd [#allocation8], 4294959104  ;;  %v5704_v0 = vld [vmem:[#allocation7 + $0xe4] ss:$16 sps:$4 sm:$0xff]   ;;  %v5706_v1 = vld [vmem:[#allocation7 + $0xec] ss:$16 sps:$4 sm:$0xff]  }
  0x2e   :  { %473 = vmatprep.subr.bf16.mxu0 %v5704_v0  ;;  %v5709_v2 = vld [vmem:[#allocation7 + $0xe0] ss:$16 sps:$4 sm:$0xff]   ;;  %v5711_v3 = vld [vmem:[#allocation7 + $0xe8] ss:$16 sps:$4 sm:$0xff]   ;;  %514 = vmatprep.subr.bf16.mxu1 %v5706_v1  ;;  %v5714_v4 = vld [vmem:[#allocation7 + $0xc4] ss:$16 sps:$4 sm:$0xff]  }
  0x2f   :  { %474 = vmatpush1.bf16.msra.mxu0 %v5709_v2  ;;  %515 = vmatpush1.bf16.msra.mxu1 %v5711_v3  ;;  %v5718_v5 = vld [vmem:[#allocation7 + $0xcc] ss:$16 sps:$4 sm:$0xff]   ;;  %v5720_v6 = vld [vmem:[#allocation7 + $0xc0] ss:$16 sps:$4 sm:$0xff]   ;;  %v5723_v7 = vld [vmem:[#allocation7 + $0xc8] ss:$16 sps:$4 sm:$0xff]  }
  0x30   :  { %475 = vmatprep.subr.bf16.mxu0 %v5714_v4  ;;  %516 = vmatprep.subr.bf16.mxu1 %v5718_v5  ;;  %v5726_v8 = vld [vmem:[#allocation7 + $0xa4] ss:$16 sps:$4 sm:$0xff]   ;;  %v5728_v9 = vld [vmem:[#allocation7 + $0xac] ss:$16 sps:$4 sm:$0xff]   ;;  %v5730_v10 = vld [vmem:[#allocation7 + $0xa0] ss:$16 sps:$4 sm:$0xff]  }
  0x31   :  { %v5732_v11 = vld [vmem:[#allocation7 + $0xa8] ss:$16 sps:$4 sm:$0xff]   ;;  %v5736_v12 = vld [vmem:[#allocation7 + $0x84] ss:$16 sps:$4 sm:$0xff]   ;;  %v5740_v13 = vld [vmem:[#allocation7 + $0x8c] ss:$16 sps:$4 sm:$0xff]  }
  0x32   :  { %v5742_v14 = vld [vmem:[#allocation7 + $0x80] ss:$16 sps:$4 sm:$0xff]   ;;  %v5746_v15 = vld [vmem:[#allocation7 + $0x88] ss:$16 sps:$4 sm:$0xff]   ;;  %v5748_v16 = vld [vmem:[#allocation7 + $0x64] ss:$16 sps:$4 sm:$0xff]  }
  0x33   :  { %476 = vmatpush1.bf16.msra.mxu0 %v5720_v6  ;;  %517 = vmatpush1.bf16.msra.mxu1 %v5723_v7  ;;  %v5752_v17 = vld [vmem:[#allocation7 + $0x6c] ss:$16 sps:$4 sm:$0xff]   ;;  %v5754_v18 = vld [vmem:[#allocation7 + $0x60] ss:$16 sps:$4 sm:$0xff]   ;;  %v5756_v19 = vld [vmem:[#allocation7 + $0x68] ss:$16 sps:$4 sm:$0xff]  }
  0x34   :  { %477 = vmatprep.subr.bf16.mxu0 %v5726_v8  ;;  %518 = vmatprep.subr.bf16.mxu1 %v5728_v9  ;;  %v5760_v20 = vld [vmem:[#allocation7 + $0x44] ss:$16 sps:$4 sm:$0xff]   ;;  %v5764_v21 = vld [vmem:[#allocation7 + $0x4c] ss:$16 sps:$4 sm:$0xff]   ;;  %v5766_v22 = vld [vmem:[#allocation7 + $0x40] ss:$16 sps:$4 sm:$0xff]  }
  0x35   :  { %v5770_v23 = vld [vmem:[#allocation7 + $0x48] ss:$16 sps:$4 sm:$0xff]   ;;  %v5772_v24 = vld [vmem:[#allocation7 + $0x24] ss:$16 sps:$4 sm:$0xff]   ;;  %v5776_v25 = vld [vmem:[#allocation7 + $0x2c] ss:$16 sps:$4 sm:$0xff]  }
  0x36   :  { %v5778_v26 = vld [vmem:[#allocation7 + $0x20] ss:$16 sps:$4 sm:$0xff]   ;;  %v5780_v27 = vld [vmem:[#allocation7 + $0x28] ss:$16 sps:$4 sm:$0xff]   ;;  %v5784_v28 = vld [vmem:[#allocation7 + $0x4] ss:$16 sps:$4 sm:$0xff]  }
  0x37   :  { %478 = vmatpush1.bf16.msra.mxu0 %v5730_v10  ;;  %519 = vmatpush1.bf16.msra.mxu1 %v5732_v11  ;;  %v5788_v29 = vld [vmem:[#allocation7 + $0xc] ss:$16 sps:$4 sm:$0xff]   ;;  %v5790_v30 = vld [vmem:[#allocation7] ss:$16 sps:$4 sm:$0xff]   ;;  %v5794_v31 = vld [vmem:[#allocation7 + $0x8] ss:$16 sps:$4 sm:$0xff]  }
  0x38   :  { %479 = vmatprep.subr.bf16.mxu0 %v5736_v12  ;;  %520 = vmatprep.subr.bf16.mxu1 %v5740_v13  ;;  %v5796_v32 = vld [vmem:[#allocation7 + $0x1e4] ss:$16 sps:$4 sm:$0xff]   ;;  %v5800_v33 = vld [vmem:[#allocation7 + $0x1ec] ss:$16 sps:$4 sm:$0xff]   ;;  %v5802_v34 = vld [vmem:[#allocation7 + $0x1e0] ss:$16 sps:$4 sm:$0xff]  }
  0x39   :  { %v5804_v35 = vld [vmem:[#allocation7 + $0x1e8] ss:$16 sps:$4 sm:$0xff]   ;;  %v5808_v36 = vld [vmem:[#allocation7 + $0x1c4] ss:$16 sps:$4 sm:$0xff]   ;;  %v5812_v37 = vld [vmem:[#allocation7 + $0x1cc] ss:$16 sps:$4 sm:$0xff]  }
  0x3a   :  { %v5814_v38 = vld [vmem:[#allocation7 + $0x1c0] ss:$16 sps:$4 sm:$0xff]   ;;  %v5818_v39 = vld [vmem:[#allocation7 + $0x1c8] ss:$16 sps:$4 sm:$0xff]   ;;  %v5820_v40 = vld [vmem:[#allocation7 + $0x1a4] ss:$16 sps:$4 sm:$0xff]  }
  0x3b   :  { %480 = vmatpush1.bf16.msra.mxu0 %v5742_v14  ;;  %521 = vmatpush1.bf16.msra.mxu1 %v5746_v15  ;;  %v5824_v41 = vld [vmem:[#allocation7 + $0x1ac] ss:$16 sps:$4 sm:$0xff]   ;;  %v5826_v42 = vld [vmem:[#allocation7 + $0x1a0] ss:$16 sps:$4 sm:$0xff]   ;;  %v5828_v43 = vld [vmem:[#allocation7 + $0x1a8] ss:$16 sps:$4 sm:$0xff]  }
  0x3c   :  { %481 = vmatprep.subr.bf16.mxu0 %v5748_v16  ;;  %522 = vmatprep.subr.bf16.mxu1 %v5752_v17  ;;  %6921 = vst [vmem:[#allocation18_spill] sm:$0xff] %v5826_v42  ;;  %6922 = vst [vmem:[#allocation19_spill] sm:$0xff] %v5828_v43  ;;  %v5832_v44 = vld [vmem:[#allocation7 + $0x184] ss:$16 sps:$4 sm:$0xff]   ;;  %v5836_v45 = vld [vmem:[#allocation7 + $0x18c] ss:$16 sps:$4 sm:$0xff]  }
  0x3d   :  { %6923 = vst [vmem:[#allocation20_spill] sm:$0xff] %v5832_v44  ;;  %6924 = vst [vmem:[#allocation21_spill] sm:$0xff] %v5836_v45  ;;  %v5838_v46 = vld [vmem:[#allocation7 + $0x180] ss:$16 sps:$4 sm:$0xff]   ;;  %v5840_v47 = vld [vmem:[#allocation7 + $0x188] ss:$16 sps:$4 sm:$0xff]  }
  0x3e   :  { %6925 = vst [vmem:[#allocation22_spill] sm:$0xff] %v5838_v46  ;;  %6926 = vst [vmem:[#allocation23_spill] sm:$0xff] %v5840_v47  ;;  %v61_v48 = vld [vmem:[%s6802_s5] sm:$0x1]  ;;  %v5845_v49 = vld [vmem:[#allocation7 + $0x164] ss:$16 sps:$4 sm:$0xff]  }
  0x3f   :  { %482 = vmatpush1.bf16.msra.mxu0 %v5754_v18  ;;  %523 = vmatpush1.bf16.msra.mxu1 %v5756_v19  ;;  %6927 = vst [vmem:[#allocation24_spill] sm:$0xff] %v5845_v49  ;;  %v5847_v50 = vld [vmem:[#allocation7 + $0x16c] ss:$16 sps:$4 sm:$0xff]   ;;  %v63_v51 = vpack.c.bf16 %v61_v48, %v61_v48  ;;  %v5853_v52 = vld [vmem:[#allocation7 + $0x160] ss:$16 sps:$4 sm:$0xff]   ;;  %vm597_vm0 = vcmask 1040384  }
  0x40   :  { %483 = vmatprep.subr.bf16.mxu0 %v5760_v20  ;;  %524 = vmatprep.subr.bf16.mxu1 %v5764_v21  ;;  %6928 = vst [vmem:[#allocation25_spill] sm:$0xff] %v5847_v50  ;;  %6929 = vst [vmem:[#allocation26_spill] sm:$0xff] %v5853_v52  ;;  %v5855_v53 = vld [vmem:[#allocation7 + $0x168] ss:$16 sps:$4 sm:$0xff]   ;;  %v5857_v54 = vld [vmem:[#allocation7 + $0x144] ss:$16 sps:$4 sm:$0xff]  }
  0x41   :  { %6930 = vst [vmem:[#allocation27_spill] sm:$0xff] %v5855_v53  ;;  %505 = vmatprep.mubr.bf16.mxu0 %v63_v51  ;;  %546 = vmatprep.mubr.bf16.mxu1 %v63_v51  ;;  %6931 = vst [vmem:[#allocation28_spill] sm:$0xff] %v5857_v54  ;;  %v5859_v55 = vld [vmem:[#allocation7 + $0x14c] ss:$16 sps:$4 sm:$0xff]   ;;  %v5865_v56 = vld [vmem:[#allocation7 + $0x140] ss:$16 sps:$4 sm:$0xff]  }
  0x42   :  { %6932 = vst [vmem:[#allocation29_spill] sm:$0xff] %v5859_v55  ;;  %6933 = vst [vmem:[#allocation30_spill] sm:$0xff] %v5865_v56  ;;  %v5867_v57 = vld [vmem:[#allocation7 + $0x148] ss:$16 sps:$4 sm:$0xff]   ;;  %v5869_v58 = vld [vmem:[#allocation7 + $0x124] ss:$16 sps:$4 sm:$0xff]  }
  0x43   :  { %484 = vmatpush1.bf16.msra.mxu0 %v5766_v22  ;;  %525 = vmatpush1.bf16.msra.mxu1 %v5770_v23  ;;  %6934 = vst [vmem:[#allocation31_spill] sm:$0xff] %v5867_v57  ;;  %6935 = vst [vmem:[#allocation32_spill] sm:$0xff] %v5869_v58  ;;  %v5871_v59 = vld [vmem:[#allocation7 + $0x12c] ss:$16 sps:$4 sm:$0xff]   ;;  %v5877_v60 = vld [vmem:[#allocation7 + $0x120] ss:$16 sps:$4 sm:$0xff]  }
  0x44   :  { %485 = vmatprep.subr.bf16.mxu0 %v5772_v24  ;;  %526 = vmatprep.subr.bf16.mxu1 %v5776_v25  ;;  %6936 = vst [vmem:[#allocation33_spill] sm:$0xff] %v5871_v59  ;;  %6937 = vst [vmem:[#allocation34_spill] sm:$0xff] %v5877_v60  ;;  %v5879_v61 = vld [vmem:[#allocation7 + $0x128] ss:$16 sps:$4 sm:$0xff]   ;;  %v5881_v62 = vld [vmem:[#allocation7 + $0x104] ss:$16 sps:$4 sm:$0xff]  }
  0x45   :  { %6938 = vst [vmem:[#allocation35_spill] sm:$0xff] %v5879_v61  ;;  %6939 = vst [vmem:[#allocation36_spill] sm:$0xff] %v5881_v62  ;;  %v5883_v63 = vld [vmem:[#allocation7 + $0x10c] ss:$16 sps:$4 sm:$0xff]   ;;  %v5889_v48 = vld [vmem:[#allocation7 + $0x100] ss:$16 sps:$4 sm:$0xff]  }
  0x46   :  { %6940 = vst [vmem:[#allocation37_spill] sm:$0xff] %v5883_v63  ;;  %6941 = vst [vmem:[#allocation38_spill] sm:$0xff] %v5889_v48  ;;  %v5891_v51 = vld [vmem:[#allocation7 + $0x108] ss:$16 sps:$4 sm:$0xff]   ;;  %s4613_s28 = sld [smem:[#allocation3 + $0x80]] }
  0x47   :  { %486 = vmatpush1.bf16.msra.mxu0 %v5778_v26  ;;  %527 = vmatpush1.bf16.msra.mxu1 %v5780_v27  ;;  %6942 = vst [vmem:[#allocation39_spill] sm:$0xff] %v5891_v51  ;;  %s4681_s11 = sld [smem:[#allocation3 + $0x100]] }
  0x48   :  { %487 = vmatprep.subr.bf16.mxu0 %v5784_v28  ;;  %528 = vmatprep.subr.bf16.mxu1 %v5788_v29  ;;  %s4749_s15 = sld [smem:[#allocation3 + $0x180]] }
  0x49   :  { %s4817_s21 = sld [smem:[#allocation3 + $0x200]] }
  0x4a   :  { %s4885_s23 = sld [smem:[#allocation3 + $0x280]] }
  0x4b   :  { %488 = vmatpush1.bf16.msra.mxu0 %v5790_v30  ;;  %529 = vmatpush1.bf16.msra.mxu1 %v5794_v31  ;;  %s4953_s27 = sld [smem:[#allocation3 + $0x300]] }
  0x4c   :  { %489 = vmatprep.subr.bf16.mxu0 %v5796_v32  ;;  %530 = vmatprep.subr.bf16.mxu1 %v5800_v33  ;;  %s4614_s29 = sshll.u32 %s4613_s28, 2  ;;  %s5021_s10 = sld [smem:[#allocation3 + $0x380]] }
  0x4d   :  { %s683_s30 = scalar_lea.vmem [#allocation4], %s4614_s29  ;;  %s4682_s0 = sshll.u32 %s4681_s11, 2 }
  0x4e   :  { %s1236_s12 = scalar_lea.vmem [#allocation4], %s4682_s0  ;;  %s4750_s16 = sshll.u32 %s4749_s15, 2 }
  0x4f   :  { %490 = vmatpush2.bf16.msra.mxu0 %v5802_v34  ;;  %531 = vmatpush2.bf16.msra.mxu1 %v5804_v35  ;;  %s1789_s17 = scalar_lea.vmem [#allocation4], %s4750_s16  ;;  %s4818_s22 = sshll.u32 %s4817_s21, 2 }
  0x50   :  { %491 = vmatprep.subr.bf16.mxu0 %v5808_v36  ;;  %532 = vmatprep.subr.bf16.mxu1 %v5812_v37  ;;  %s2342_s1 = scalar_lea.vmem [#allocation4], %s4818_s22 }
  0x51   :  { %s4954_s28 = sshll.u32 %s4953_s27, 2 }
  0x52   :  { %s3448_s29 = scalar_lea.vmem [#allocation4], %s4954_s28  ;;  %s5022_s11 = sshll.u32 %s5021_s10, 2 }
  0x53   :  { %492 = vmatpush2.bf16.msra.mxu0 %v5814_v38  ;;  %533 = vmatpush2.bf16.msra.mxu1 %v5818_v39  ;;  %s4001_s0 = scalar_lea.vmem [#allocation4], %s5022_s11 }
  0x54   :  { %493 = vmatprep.subr.bf16.mxu0 %v5820_v40  ;;  %534 = vmatprep.subr.bf16.mxu1 %v5824_v41 }
  0x57   :  { %494 = vmatpush2.bf16.msra.mxu0 %v5826_v42  ;;  %535 = vmatpush2.bf16.msra.mxu1 %v5828_v43 }
  0x58   :  { %495 = vmatprep.subr.bf16.mxu0 %v5832_v44  ;;  %536 = vmatprep.subr.bf16.mxu1 %v5836_v45 }
  0x5b   :  { %496 = vmatpush2.bf16.msra.mxu0 %v5838_v46  ;;  %537 = vmatpush2.bf16.msra.mxu1 %v5840_v47 }
  0x5c   :  { %497 = vmatprep.subr.bf16.mxu0 %v5845_v49  ;;  %538 = vmatprep.subr.bf16.mxu1 %v5847_v50 }
  0x5f   :  { %498 = vmatpush2.bf16.msra.mxu0 %v5853_v52  ;;  %539 = vmatpush2.bf16.msra.mxu1 %v5855_v53 }
  0x60   :  { %499 = vmatprep.subr.bf16.mxu0 %v5857_v54  ;;  %540 = vmatprep.subr.bf16.mxu1 %v5859_v55  ;;  %v60_v55 = vld [vmem:[%s6801_s4] sm:$0x1]  ;;  %s128_s4 = sld [smem:[#allocation3]] }
  0x63   :  { %500 = vmatpush2.bf16.msra.mxu0 %v5865_v56  ;;  %541 = vmatpush2.bf16.msra.mxu1 %v5867_v57  ;;  %v62_v57 = vpack.c.bf16 %v60_v55, %v60_v55  ;;  %v6943_v55 = vld [vmem:[#allocation29_spill] sm:$0xff] }
  0x64   :  { %501 = vmatprep.subr.bf16.mxu0 %v5869_v58  ;;  %542 = vmatprep.subr.bf16.mxu1 %v5871_v59 }
  0x66   :  { %s4546_s24 = sshll.u32 %s128_s4, 2  ;;  %s4886_s4 = sshll.u32 %s4885_s23, 2 }
  0x67   :  { %502 = vmatpush2.bf16.msra.mxu0 %v5877_v60  ;;  %543 = vmatpush2.bf16.msra.mxu1 %v5879_v61  ;;  %s130_s25 = scalar_lea.vmem [#allocation4], %s4546_s24  ;;  %s2895_s24 = scalar_lea.vmem [#allocation4], %s4886_s4 }
  0x68   :  { %503 = vmatprep.subr.bf16.mxu0 %v5881_v62  ;;  %544 = vmatprep.subr.bf16.mxu1 %v5883_v63 }
  0x6b   :  { %504 = vmatpush2.bf16.msra.mxu0 %v5889_v48  ;;  %545 = vmatpush2.bf16.msra.mxu1 %v5891_v51 }
  0x6c   :  { %1026 = vmatprep.subr.bf16.mxu0 %v5704_v0  ;;  %1067 = vmatprep.subr.bf16.mxu1 %v5706_v1 }
  0x6e   :  { %506 = vmatmul.mubr.bf16.vlgmr.msra.gmra.mxu0 %v62_v57  ;;  %547 = vmatmul.mubr.bf16.vlgmr.msra.gmra.mxu1 %v62_v57  ;;  %v6944_v57 = vld [vmem:[#allocation31_spill] sm:$0xff] }
  0x6f   :  { %1027 = vmatpush1.bf16.msra.mxu0 %v5709_v2  ;;  %1068 = vmatpush1.bf16.msra.mxu1 %v5711_v3 }
  0x70   :  { %1028 = vmatprep.subr.bf16.mxu0 %v5714_v4  ;;  %1069 = vmatprep.subr.bf16.mxu1 %v5718_v5 }
  0x73   :  { %1029 = vmatpush1.bf16.msra.mxu0 %v5720_v6  ;;  %1070 = vmatpush1.bf16.msra.mxu1 %v5723_v7 }
  0x74   :  { %1030 = vmatprep.subr.bf16.mxu0 %v5726_v8  ;;  %1071 = vmatprep.subr.bf16.mxu1 %v5728_v9 }
  0x77   :  { %1031 = vmatpush1.bf16.msra.mxu0 %v5730_v10  ;;  %1072 = vmatpush1.bf16.msra.mxu1 %v5732_v11 }
  0x78   :  { %1032 = vmatprep.subr.bf16.mxu0 %v5736_v12  ;;  %1073 = vmatprep.subr.bf16.mxu1 %v5740_v13 }
  0x7b   :  { %1033 = vmatpush1.bf16.msra.mxu0 %v5742_v14  ;;  %1074 = vmatpush1.bf16.msra.mxu1 %v5746_v15 }
  0x7c   :  { %1034 = vmatprep.subr.bf16.mxu0 %v5748_v16  ;;  %1075 = vmatprep.subr.bf16.mxu1 %v5752_v17 }
  0x7f   :  { %1035 = vmatpush1.bf16.msra.mxu0 %v5754_v18  ;;  %1076 = vmatpush1.bf16.msra.mxu1 %v5756_v19 }
  0x80   :  { %1036 = vmatprep.subr.bf16.mxu0 %v5760_v20  ;;  %1077 = vmatprep.subr.bf16.mxu1 %v5764_v21 }
  0x83   :  { %1037 = vmatpush1.bf16.msra.mxu0 %v5766_v22  ;;  %1078 = vmatpush1.bf16.msra.mxu1 %v5770_v23 }
  0x84   :  { %1038 = vmatprep.subr.bf16.mxu0 %v5772_v24  ;;  %1079 = vmatprep.subr.bf16.mxu1 %v5776_v25 }
  0x87   :  { %1039 = vmatpush1.bf16.msra.mxu0 %v5778_v26  ;;  %1080 = vmatpush1.bf16.msra.mxu1 %v5780_v27 }
  0x88   :  { %1040 = vmatprep.subr.bf16.mxu0 %v5784_v28  ;;  %1081 = vmatprep.subr.bf16.mxu1 %v5788_v29 }
  0x8b   :  { %1041 = vmatpush1.bf16.msra.mxu0 %v5790_v30  ;;  %1082 = vmatpush1.bf16.msra.mxu1 %v5794_v31 }
  0x8c   :  { %1042 = vmatprep.subr.bf16.mxu0 %v5796_v32  ;;  %1083 = vmatprep.subr.bf16.mxu1 %v5800_v33 }
  0x8f   :  { %1043 = vmatpush2.bf16.msra.mxu0 %v5802_v34  ;;  %1084 = vmatpush2.bf16.msra.mxu1 %v5804_v35 }
  0x90   :  { %1044 = vmatprep.subr.bf16.mxu0 %v5808_v36  ;;  %1085 = vmatprep.subr.bf16.mxu1 %v5812_v37 }
  0x93   :  { %1045 = vmatpush2.bf16.msra.mxu0 %v5814_v38  ;;  %1086 = vmatpush2.bf16.msra.mxu1 %v5818_v39 }
  0x94   :  { %1046 = vmatprep.subr.bf16.mxu0 %v5820_v40  ;;  %1087 = vmatprep.subr.bf16.mxu1 %v5824_v41 }
  0x97   :  { %1047 = vmatpush2.bf16.msra.mxu0 %v5826_v42  ;;  %1088 = vmatpush2.bf16.msra.mxu1 %v5828_v43 }
  0x98   :  { %1048 = vmatprep.subr.bf16.mxu0 %v5832_v44  ;;  %1089 = vmatprep.subr.bf16.mxu1 %v5836_v45 }
  0x9b   :  { %1049 = vmatpush2.bf16.msra.mxu0 %v5838_v46  ;;  %1090 = vmatpush2.bf16.msra.mxu1 %v5840_v47 }
  0x9c   :  { %1050 = vmatprep.subr.bf16.mxu0 %v5845_v49  ;;  %1091 = vmatprep.subr.bf16.mxu1 %v5847_v50 }
  0x9f   :  { %1051 = vmatpush2.bf16.msra.mxu0 %v5853_v52  ;;  %1092 = vmatpush2.bf16.msra.mxu1 %v5855_v53 }
  0xa0   :  { %1052 = vmatprep.subr.bf16.mxu0 %v5857_v54  ;;  %1093 = vmatprep.subr.bf16.mxu1 %v6943_v55 }
  0xa3   :  { %1053 = vmatpush2.bf16.msra.mxu0 %v5865_v56  ;;  %1094 = vmatpush2.bf16.msra.mxu1 %v6944_v57 }
  0xa4   :  { %1054 = vmatprep.subr.bf16.mxu0 %v5869_v58  ;;  %1095 = vmatprep.subr.bf16.mxu1 %v5871_v59  ;;  %v453_v58 = vlaneseq }
  0xa6   :  { %v454_v59 = vshrl.u32 %v453_v58, 7 }
  0xa7   :  { %1055 = vmatpush2.bf16.msra.mxu0 %v5877_v60  ;;  %1096 = vmatpush2.bf16.msra.mxu1 %v5879_v61  ;;  %v131_v61 = vld [vmem:[%s130_s25] sm:$0xf] }
  0xa8   :  { %1056 = vmatprep.subr.bf16.mxu0 %v5881_v62  ;;  %1097 = vmatprep.subr.bf16.mxu1 %v5883_v63  ;;  %v5968_v57 = vsub.s32 0, %v454_v59  ;;  %v5970_v60 = vsub.s32 3, %v454_v59  ;;  %v5976_v63 = vsub.s32 2, %v454_v59  ;;  %v5985_v42 = vsub.s32 1, %v454_v59 }
  0xaa   :  { %6945 = vst [vmem:[#allocation40_spill] sm:$0xff] %v5968_v57  ;;  %6946 = vst [vmem:[#allocation41_spill] sm:$0xff] %v5970_v60  ;;  %v464_v55 = vrot.slane %v131_v61, %v5976_v63 }
  0xab   :  { %1057 = vmatpush2.bf16.msra.mxu0 %v5889_v48  ;;  %1098 = vmatpush2.bf16.msra.mxu1 %v5891_v51  ;;  %v555_v48 = vld [vmem:[%s6800_s3] sm:$0xf]  ;;  %v456_v51 = vrot.slane %v131_v61, %v5968_v57 }
  0xac   :  { %1579 = vmatprep.subr.bf16.mxu0 %v5704_v0  ;;  %1620 = vmatprep.subr.bf16.mxu1 %v5706_v1  ;;  %v560_v0 = vrot.slane %v555_v48, %v5968_v57  ;;  %v468_v1 = vrot.slane %v131_v61, %v5970_v60  ;;  %v572_v54 = vrot.slane %v555_v48, %v5970_v60 }
  0xad   :  { %v568_v57 = vrot.slane %v555_v48, %v5976_v63 }
 0x12e   :  { %v507_v62 = vpop.f32.mrf.mxu0  ;;  %v548_v58 = vpop.f32.mrf.mxu1 }
 0x12f   :  { %v508_v56 = vadd.f32 %v507_v62, %v456_v51  ;;  %v549_v44 = vadd.f32 %v548_v58, %v464_v55 }
 0x130   :  { %v509_v53 = vpop.f32.mrf.mxu0  ;;  %v550_v52 = vpop.f32.mrf.mxu1 }
 0x131   :  { %v577_v50 = vadd.f32 %v560_v0, %v508_v56  ;;  %v551_v49 = vadd.f32 %v550_v52, %v468_v1  ;;  %v579_v56 = vadd.f32 %v568_v57, %v549_v44 }
 0x132   :  { %v511_v47 = vpop.f32.mrf.mxu0  ;;  %v552_v46 = vpop.f32.mrf.mxu1 }
 0x133   :  { %v4611_v45 = vmul.f32 -1.442695, %v577_v50  ;;  %v5983_v43 = vadd.f32 %v572_v54, %v551_v49  ;;  %v460_v47 = vrot.slane %v131_v61, %v5985_v42  ;;  %v4612_v52 = vmul.f32 -1.442695, %v579_v56 }
 0x134   :  { %v512_v62 = vpop.f32.mrf.mxu0  ;;  %v553_v51 = vpop.f32.mrf.mxu1  ;;  %v564_v50 = vrot.slane %v555_v48, %v5985_v42 }
 0x135   :  { %6947 = vst [vmem:[#allocation42_spill] sm:$0xff] %v5983_v43  ;;  %5388 = vpow2.f32 %v4611_v45  ;;  %v598_v60 = vsel %vm597_vm0, %v5983_v43, -inf  ;;  %v510_v46 = vadd.f32 %v509_v53, %v460_v47  ;;  %v6242_v43 = vld [vmem:[#allocation7 + $0x128] ss:$16 sps:$4 sm:$0xff]  }
 0x136   :  { %599 = vmax.xlane.f32.xlu0 %v598_v60  ;;  %5390 = vpow2.f32 %v4612_v52 }
 0x137   :  { %v578_v55 = vadd.f32 %v564_v50, %v510_v46 }
 0x139   :  { %5392 = vtanh.f32 %v578_v55 }
 0x142   :  { %v5389_v49 = vpop.eup %5388 }
 0x143   :  { %v584_v54 = vadd.f32 1.0, %v5389_v49  ;;  %v5391_v59 = vpop.eup %5390 }
 0x144   :  { %v591_v0 = vadd.f32 1.0, %v5391_v59 }
 0x145   :  { %5394 = vrcp.f32 %v584_v54 }
 0x146   :  { %v5393_v45 = vpop.eup %5392  ;;  %5396 = vrcp.f32 %v591_v0 }
 0x152   :  { %v5395_v1 = vpop.eup %5394 }
 0x153   :  { %v594_v58 = vmul.f32 %v5395_v1, %v5393_v45  ;;  %v5397_v60 = vpop.eup %5396 }
 0x155   :  { %5398 = vtanh.f32 %v594_v58  ;;  %v613_v44 = vpack.c.bf16 %v594_v58, %v594_v58  ;;  %v6068_v58 = vld [vmem:[#allocation7 + $0xe4] ss:$16 sps:$4 sm:$0xff]  }
 0x157   :  { %1058 = vmatprep.mubr.bf16.mxu0 %v613_v44  ;;  %1099 = vmatprep.mubr.bf16.mxu1 %v613_v44  ;;  %v6070_v44 = vld [vmem:[#allocation7 + $0xec] ss:$16 sps:$4 sm:$0xff]  }
 0x162   :  { %v5399_v53 = vpop.eup %5398 }
 0x163   :  { %v596_v61 = vmul.f32 %v5399_v53, %v5397_v60 }
 0x165   :  { %v612_v48 = vpack.c.bf16 %v596_v61, %v596_v61 }
 0x167   :  { %1059 = vmatmul.mubr.bf16.vlgmr.msra.gmra.mxu0 %v612_v48  ;;  %1100 = vmatmul.mubr.bf16.vlgmr.msra.gmra.mxu1 %v612_v48 }
 0x168   :  { %1580 = vmatpush1.bf16.msra.mxu0 %v5709_v2  ;;  %1621 = vmatpush1.bf16.msra.mxu1 %v5711_v3  ;;  %v6948_v2 = vld [vmem:[#allocation18_spill] sm:$0xff]  ;;  %v6949_v3 = vld [vmem:[#allocation19_spill] sm:$0xff] }
 0x169   :  { %1581 = vmatprep.subr.bf16.mxu0 %v5714_v4  ;;  %1622 = vmatprep.subr.bf16.mxu1 %v5718_v5  ;;  %v6950_v4 = vld [vmem:[#allocation20_spill] sm:$0xff]  ;;  %v6951_v5 = vld [vmem:[#allocation21_spill] sm:$0xff]  ;;  %6973 = vst [vmem:[#allocation19_spill] sm:$0xff] %v6068_v58 }
 0x16a   :  { %6974 = vst [vmem:[#allocation20_spill] sm:$0xff] %v6070_v44 }
 0x16c   :  { %1582 = vmatpush1.bf16.msra.mxu0 %v5720_v6  ;;  %1623 = vmatpush1.bf16.msra.mxu1 %v5723_v7  ;;  %v6952_v6 = vld [vmem:[#allocation22_spill] sm:$0xff]  ;;  %v6953_v7 = vld [vmem:[#allocation23_spill] sm:$0xff] }
 0x16d   :  { %1583 = vmatprep.subr.bf16.mxu0 %v5726_v8  ;;  %1624 = vmatprep.subr.bf16.mxu1 %v5728_v9  ;;  %v6954_v8 = vld [vmem:[#allocation24_spill] sm:$0xff]  ;;  %v6955_v9 = vld [vmem:[#allocation25_spill] sm:$0xff] }
 0x170   :  { %1584 = vmatpush1.bf16.msra.mxu0 %v5730_v10  ;;  %1625 = vmatpush1.bf16.msra.mxu1 %v5732_v11  ;;  %v6956_v10 = vld [vmem:[#allocation26_spill] sm:$0xff]  ;;  %v6957_v11 = vld [vmem:[#allocation27_spill] sm:$0xff] }
 0x171   :  { %1585 = vmatprep.subr.bf16.mxu0 %v5736_v12  ;;  %1626 = vmatprep.subr.bf16.mxu1 %v5740_v13  ;;  %v6958_v12 = vld [vmem:[#allocation28_spill] sm:$0xff]  ;;  %v6959_v13 = vld [vmem:[#allocation29_spill] sm:$0xff] }
 0x174   :  { %1586 = vmatpush1.bf16.msra.mxu0 %v5742_v14  ;;  %1627 = vmatpush1.bf16.msra.mxu1 %v5746_v15  ;;  %v6960_v14 = vld [vmem:[#allocation30_spill] sm:$0xff]  ;;  %v6961_v15 = vld [vmem:[#allocation31_spill] sm:$0xff] }
 0x175   :  { %1587 = vmatprep.subr.bf16.mxu0 %v5748_v16  ;;  %1628 = vmatprep.subr.bf16.mxu1 %v5752_v17  ;;  %v6962_v16 = vld [vmem:[#allocation32_spill] sm:$0xff]  ;;  %v6963_v17 = vld [vmem:[#allocation33_spill] sm:$0xff] }
 0x178   :  { %1588 = vmatpush1.bf16.msra.mxu0 %v5754_v18  ;;  %1629 = vmatpush1.bf16.msra.mxu1 %v5756_v19  ;;  %v6964_v18 = vld [vmem:[#allocation34_spill] sm:$0xff]  ;;  %v6965_v19 = vld [vmem:[#allocation35_spill] sm:$0xff] }
 0x179   :  { %1589 = vmatprep.subr.bf16.mxu0 %v5760_v20  ;;  %1630 = vmatprep.subr.bf16.mxu1 %v5764_v21  ;;  %v6966_v20 = vld [vmem:[#allocation36_spill] sm:$0xff]  ;;  %v6967_v21 = vld [vmem:[#allocation37_spill] sm:$0xff] }
 0x17c   :  { %1590 = vmatpush1.bf16.msra.mxu0 %v5766_v22  ;;  %1631 = vmatpush1.bf16.msra.mxu1 %v5770_v23  ;;  %v6968_v22 = vld [vmem:[#allocation38_spill] sm:$0xff]  ;;  %v6969_v23 = vld [vmem:[#allocation39_spill] sm:$0xff] }
 0x17d   :  { %1591 = vmatprep.subr.bf16.mxu0 %v5772_v24  ;;  %1632 = vmatprep.subr.bf16.mxu1 %v5776_v25  ;;  %v684_v24 = vld [vmem:[%s683_s30] sm:$0xf]  ;;  %6993 = vst [vmem:[#allocation39_spill] sm:$0xff] %v6242_v43 }
 0x17e   :  { %v1108_v25 = vld [vmem:[%s6800_s3] sm:$0xf]  ;;  %v1013_v55 = vrot.slane %v684_v24, %v5985_v42 }
 0x17f   :  { %v1121_v56 = vrot.slane %v1108_v25, %v5976_v63  ;;  %v1117_v59 = vrot.slane %v1108_v25, %v5985_v42 }
 0x180   :  { %1592 = vmatpush1.bf16.msra.mxu0 %v5778_v26  ;;  %1633 = vmatpush1.bf16.msra.mxu1 %v5780_v27  ;;  %v6970_v26 = vld [vmem:[#allocation40_spill] sm:$0xff] }
 0x181   :  { %1593 = vmatprep.subr.bf16.mxu0 %v5784_v28  ;;  %1634 = vmatprep.subr.bf16.mxu1 %v5788_v29  ;;  %v1009_v27 = vrot.slane %v684_v24, %v6970_v26  ;;  %v1113_v28 = vrot.slane %v1108_v25, %v6970_v26  ;;  %v6971_v29 = vld [vmem:[#allocation41_spill] sm:$0xff] }
 0x184   :  { %1594 = vmatpush1.bf16.msra.mxu0 %v5790_v30  ;;  %1635 = vmatpush1.bf16.msra.mxu1 %v5794_v31  ;;  %v1021_v30 = vrot.slane %v684_v24, %v6971_v29 }
 0x185   :  { %1595 = vmatprep.subr.bf16.mxu0 %v5796_v32  ;;  %1636 = vmatprep.subr.bf16.mxu1 %v5800_v33 }
 0x188   :  { %1596 = vmatpush2.bf16.msra.mxu0 %v5802_v34  ;;  %1637 = vmatpush2.bf16.msra.mxu1 %v5804_v35  ;;  %v1125_v34 = vrot.slane %v1108_v25, %v6971_v29  ;;  %v1017_v35 = vrot.slane %v684_v24, %v5976_v63  ;;  %v6120_v24 = vld [vmem:[#allocation7 + $0x60] ss:$16 sps:$4 sm:$0xff]   ;;  %v6122_v25 = vld [vmem:[#allocation7 + $0x68] ss:$16 sps:$4 sm:$0xff]  }
 0x189   :  { %1597 = vmatprep.subr.bf16.mxu0 %v5808_v36  ;;  %1638 = vmatprep.subr.bf16.mxu1 %v5812_v37 }
 0x18c   :  { %1598 = vmatpush2.bf16.msra.mxu0 %v5814_v38  ;;  %1639 = vmatpush2.bf16.msra.mxu1 %v5818_v39 }
 0x18d   :  { %1599 = vmatprep.subr.bf16.mxu0 %v5820_v40  ;;  %1640 = vmatprep.subr.bf16.mxu1 %v5824_v41 }
 0x190   :  { %1600 = vmatpush2.bf16.msra.mxu0 %v6948_v2  ;;  %1641 = vmatpush2.bf16.msra.mxu1 %v6949_v3 }
 0x191   :  { %1601 = vmatprep.subr.bf16.mxu0 %v6950_v4  ;;  %1642 = vmatprep.subr.bf16.mxu1 %v6951_v5 }
 0x194   :  { %1602 = vmatpush2.bf16.msra.mxu0 %v6952_v6  ;;  %1643 = vmatpush2.bf16.msra.mxu1 %v6953_v7  ;;  %v6074_v7 = vld [vmem:[#allocation7 + $0xe0] ss:$16 sps:$4 sm:$0xff]  }
 0x195   :  { %1603 = vmatprep.subr.bf16.mxu0 %v6954_v8  ;;  %1644 = vmatprep.subr.bf16.mxu1 %v6955_v9  ;;  %v6076_v8 = vld [vmem:[#allocation7 + $0xe8] ss:$16 sps:$4 sm:$0xff]  }
 0x198   :  { %1604 = vmatpush2.bf16.msra.mxu0 %v6956_v10  ;;  %1645 = vmatpush2.bf16.msra.mxu1 %v6957_v11  ;;  %v6078_v10 = vld [vmem:[#allocation7 + $0xc4] ss:$16 sps:$4 sm:$0xff]   ;;  %v6080_v11 = vld [vmem:[#allocation7 + $0xcc] ss:$16 sps:$4 sm:$0xff]  }
 0x199   :  { %1605 = vmatprep.subr.bf16.mxu0 %v6958_v12  ;;  %1646 = vmatprep.subr.bf16.mxu1 %v6959_v13  ;;  %v6084_v12 = vld [vmem:[#allocation7 + $0xc0] ss:$16 sps:$4 sm:$0xff]   ;;  %v6086_v13 = vld [vmem:[#allocation7 + $0xc8] ss:$16 sps:$4 sm:$0xff]  }
 0x19c   :  { %1606 = vmatpush2.bf16.msra.mxu0 %v6960_v14  ;;  %1647 = vmatpush2.bf16.msra.mxu1 %v6961_v15  ;;  %v6092_v14 = vld [vmem:[#allocation7 + $0xa4] ss:$16 sps:$4 sm:$0xff]   ;;  %v6094_v15 = vld [vmem:[#allocation7 + $0xac] ss:$16 sps:$4 sm:$0xff]  }
 0x19d   :  { %1607 = vmatprep.subr.bf16.mxu0 %v6962_v16  ;;  %1648 = vmatprep.subr.bf16.mxu1 %v6963_v17  ;;  %v6096_v16 = vld [vmem:[#allocation7 + $0xa0] ss:$16 sps:$4 sm:$0xff]   ;;  %v6098_v17 = vld [vmem:[#allocation7 + $0xa8] ss:$16 sps:$4 sm:$0xff]  }
 0x1a0   :  { %1608 = vmatpush2.bf16.msra.mxu0 %v6964_v18  ;;  %1649 = vmatpush2.bf16.msra.mxu1 %v6965_v19  ;;  %v6104_v18 = vld [vmem:[#allocation7 + $0x84] ss:$16 sps:$4 sm:$0xff]   ;;  %v6106_v19 = vld [vmem:[#allocation7 + $0x8c] ss:$16 sps:$4 sm:$0xff]  }
 0x1a1   :  { %1609 = vmatprep.subr.bf16.mxu0 %v6966_v20  ;;  %1650 = vmatprep.subr.bf16.mxu1 %v6967_v21  ;;  %v6108_v20 = vld [vmem:[#allocation7 + $0x80] ss:$16 sps:$4 sm:$0xff]   ;;  %v6110_v21 = vld [vmem:[#allocation7 + $0x88] ss:$16 sps:$4 sm:$0xff]  }
 0x1a4   :  { %1610 = vmatpush2.bf16.msra.mxu0 %v6968_v22  ;;  %1651 = vmatpush2.bf16.msra.mxu1 %v6969_v23  ;;  %v6116_v22 = vld [vmem:[#allocation7 + $0x64] ss:$16 sps:$4 sm:$0xff]   ;;  %v6118_v23 = vld [vmem:[#allocation7 + $0x6c] ss:$16 sps:$4 sm:$0xff]  }
 0x1a5   :  { %2132 = vmatprep.subr.bf16.mxu0 %v6068_v58  ;;  %2173 = vmatprep.subr.bf16.mxu1 %v6070_v44 }
 0x227   :  { %v1060_v31 = vpop.f32.mrf.mxu0  ;;  %v1101_v32 = vpop.f32.mrf.mxu1 }
 0x228   :  { %v1061_v33 = vadd.f32 %v1060_v31, %v1009_v27  ;;  %v1102_v51 = vadd.f32 %v1101_v32, %v1017_v35  ;;  %v6128_v27 = vld [vmem:[#allocation7 + $0x44] ss:$16 sps:$4 sm:$0xff]   ;;  %v6134_v31 = vld [vmem:[#allocation7 + $0x48] ss:$16 sps:$4 sm:$0xff]  }
 0x229   :  { %v1062_v36 = vpop.f32.mrf.mxu0  ;;  %v1103_v37 = vpop.f32.mrf.mxu1  ;;  %v6140_v32 = vld [vmem:[#allocation7 + $0x24] ss:$16 sps:$4 sm:$0xff]   ;;  %v6146_v35 = vld [vmem:[#allocation7 + $0x28] ss:$16 sps:$4 sm:$0xff]  }
 0x22a   :  { %v1130_v38 = vadd.f32 %v1113_v28, %v1061_v33  ;;  %v1104_v39 = vadd.f32 %v1103_v37, %v1021_v30  ;;  %v1132_v50 = vadd.f32 %v1121_v56, %v1102_v51  ;;  %v1063_v54 = vadd.f32 %v1062_v36, %v1013_v55  ;;  %v6130_v28 = vld [vmem:[#allocation7 + $0x4c] ss:$16 sps:$4 sm:$0xff]   ;;  %v6132_v30 = vld [vmem:[#allocation7 + $0x40] ss:$16 sps:$4 sm:$0xff]   ;;  %v6152_v36 = vld [vmem:[#allocation7 + $0x4] ss:$16 sps:$4 sm:$0xff]  }
 0x22b   :  { %v1064_v40 = vpop.f32.mrf.mxu0  ;;  %v1105_v41 = vpop.f32.mrf.mxu1  ;;  %v6142_v33 = vld [vmem:[#allocation7 + $0x2c] ss:$16 sps:$4 sm:$0xff]   ;;  %v6172_v56 = vld [vmem:[#allocation7 + $0x1c4] ss:$16 sps:$4 sm:$0xff]  }
 0x22c   :  { %v4679_v57 = vmul.f32 -1.442695, %v1130_v38  ;;  %v6061_v62 = vadd.f32 %v1125_v34, %v1104_v39  ;;  %v4680_v49 = vmul.f32 -1.442695, %v1132_v50  ;;  %v1131_v0 = vadd.f32 %v1117_v59, %v1063_v54  ;;  %v6144_v34 = vld [vmem:[#allocation7 + $0x20] ss:$16 sps:$4 sm:$0xff]  }
 0x22d   :  { %v1065_v47 = vpop.f32.mrf.mxu0  ;;  %v1106_v52 = vpop.f32.mrf.mxu1  ;;  %v6154_v37 = vld [vmem:[#allocation7 + $0xc] ss:$16 sps:$4 sm:$0xff]   ;;  %v6156_v38 = vld [vmem:[#allocation7] ss:$16 sps:$4 sm:$0xff]   ;;  %v6158_v39 = vld [vmem:[#allocation7 + $0x8] ss:$16 sps:$4 sm:$0xff]  }
 0x22e   :  { %6972 = vst [vmem:[#allocation18_spill] sm:$0xff] %v6061_v62  ;;  %5400 = vpow2.f32 %v4679_v57  ;;  %v1150_v46 = vsel %vm597_vm0, %v6061_v62, -inf  ;;  %v6164_v40 = vld [vmem:[#allocation7 + $0x1e0] ss:$16 sps:$4 sm:$0xff]   ;;  %v6166_v41 = vld [vmem:[#allocation7 + $0x1e4] ss:$16 sps:$4 sm:$0xff]  }
 0x22f   :  { %1151 = vmax.xlane.f32.xlu0 %v1150_v46  ;;  %5402 = vpow2.f32 %v4680_v49  ;;  %v6168_v57 = vld [vmem:[#allocation7 + $0x1e8] ss:$16 sps:$4 sm:$0xff]   ;;  %v6170_v51 = vld [vmem:[#allocation7 + $0x1ec] ss:$16 sps:$4 sm:$0xff]   ;;  %v6180_v52 = vld [vmem:[#allocation7 + $0x1c0] ss:$16 sps:$4 sm:$0xff]  }
 0x230   :  { %5404 = vtanh.f32 %v1131_v0  ;;  %v6175_v47 = vld [vmem:[#allocation7 + $0x1cc] ss:$16 sps:$4 sm:$0xff]   ;;  %v6182_v46 = vld [vmem:[#allocation7 + $0x1c8] ss:$16 sps:$4 sm:$0xff]   ;;  %v6186_v50 = vld [vmem:[#allocation7 + $0x1a4] ss:$16 sps:$4 sm:$0xff]  }
 0x231   :  { %v6188_v55 = vld [vmem:[#allocation7 + $0x1ac] ss:$16 sps:$4 sm:$0xff]   ;;  %v6192_v49 = vld [vmem:[#allocation7 + $0x1a0] ss:$16 sps:$4 sm:$0xff]   ;;  %v6194_v54 = vld [vmem:[#allocation7 + $0x1a8] ss:$16 sps:$4 sm:$0xff]  }
 0x232   :  { %6975 = vst [vmem:[#allocation21_spill] sm:$0xff] %v6188_v55  ;;  %6976 = vst [vmem:[#allocation22_spill] sm:$0xff] %v6192_v49  ;;  %v6198_v59 = vld [vmem:[#allocation7 + $0x184] ss:$16 sps:$4 sm:$0xff]   ;;  %v6200_v0 = vld [vmem:[#allocation7 + $0x18c] ss:$16 sps:$4 sm:$0xff]  }
 0x233   :  { %6977 = vst [vmem:[#allocation23_spill] sm:$0xff] %v6194_v54  ;;  %6978 = vst [vmem:[#allocation24_spill] sm:$0xff] %v6198_v59  ;;  %v6240_v62 = vld [vmem:[#allocation7 + $0x120] ss:$16 sps:$4 sm:$0xff]  }
 0x234   :  { %6979 = vst [vmem:[#allocation25_spill] sm:$0xff] %v6200_v0  ;;  %6992 = vst [vmem:[#allocation38_spill] sm:$0xff] %v6240_v62 }
 0x23b   :  { %v5401_v45 = vpop.eup %5400 }
 0x23c   :  { %v1137_v1 = vadd.f32 1.0, %v5401_v45  ;;  %v5403_v60 = vpop.eup %5402  ;;  %v6204_v45 = vld [vmem:[#allocation7 + $0x180] ss:$16 sps:$4 sm:$0xff]  }
 0x23d   :  { %v1144_v53 = vadd.f32 1.0, %v5403_v60  ;;  %v5405_v61 = vpop.eup %5404  ;;  %6980 = vst [vmem:[#allocation26_spill] sm:$0xff] %v6204_v45  ;;  %v6210_v60 = vld [vmem:[#allocation7 + $0x164] ss:$16 sps:$4 sm:$0xff]  }
 0x23e   :  { %5406 = vrcp.f32 %v1137_v1  ;;  %v6206_v1 = vld [vmem:[#allocation7 + $0x188] ss:$16 sps:$4 sm:$0xff]   ;;  %6982 = vst [vmem:[#allocation28_spill] sm:$0xff] %v6210_v60 }
 0x23f   :  { %5408 = vrcp.f32 %v1144_v53  ;;  %6981 = vst [vmem:[#allocation27_spill] sm:$0xff] %v6206_v1  ;;  %v6214_v53 = vld [vmem:[#allocation7 + $0x160] ss:$16 sps:$4 sm:$0xff]  }
 0x240   :  { %6983 = vst [vmem:[#allocation29_spill] sm:$0xff] %v6214_v53 }
 0x24b   :  { %v5407_v48 = vpop.eup %5406 }
 0x24c   :  { %v1147_v2 = vmul.f32 %v5407_v48, %v5405_v61  ;;  %v5409_v4 = vpop.eup %5408  ;;  %v6217_v61 = vld [vmem:[#allocation7 + $0x168] ss:$16 sps:$4 sm:$0xff]   ;;  %v6219_v48 = vld [vmem:[#allocation7 + $0x16c] ss:$16 sps:$4 sm:$0xff]  }
 0x24d   :  { %6984 = vst [vmem:[#allocation30_spill] sm:$0xff] %v6217_v61  ;;  %6985 = vst [vmem:[#allocation31_spill] sm:$0xff] %v6219_v48 }
 0x24e   :  { %5410 = vtanh.f32 %v1147_v2  ;;  %v1166_v3 = vpack.c.bf16 %v1147_v2, %v1147_v2  ;;  %v6221_v2 = vld [vmem:[#allocation7 + $0x144] ss:$16 sps:$4 sm:$0xff]  }
 0x24f   :  { %6986 = vst [vmem:[#allocation32_spill] sm:$0xff] %v6221_v2 }
 0x250   :  { %1611 = vmatprep.mubr.bf16.mxu0 %v1166_v3  ;;  %1652 = vmatprep.mubr.bf16.mxu1 %v1166_v3  ;;  %v6223_v3 = vld [vmem:[#allocation7 + $0x14c] ss:$16 sps:$4 sm:$0xff]  }
 0x251   :  { %6987 = vst [vmem:[#allocation33_spill] sm:$0xff] %v6223_v3 }
 0x25b   :  { %v5411_v5 = vpop.eup %5410 }
 0x25c   :  { %v1149_v6 = vmul.f32 %v5411_v5, %v5409_v4  ;;  %v6228_v4 = vld [vmem:[#allocation7 + $0x140] ss:$16 sps:$4 sm:$0xff]   ;;  %v6230_v5 = vld [vmem:[#allocation7 + $0x148] ss:$16 sps:$4 sm:$0xff]  }
 0x25d   :  { %6988 = vst [vmem:[#allocation34_spill] sm:$0xff] %v6228_v4  ;;  %6989 = vst [vmem:[#allocation35_spill] sm:$0xff] %v6230_v5 }
 0x25e   :  { %v1165_v9 = vpack.c.bf16 %v1149_v6, %v1149_v6  ;;  %v6234_v6 = vld [vmem:[#allocation7 + $0x124] ss:$16 sps:$4 sm:$0xff]  }
 0x25f   :  { %6990 = vst [vmem:[#allocation36_spill] sm:$0xff] %v6234_v6 }
 0x260   :  { %1612 = vmatmul.mubr.bf16.vlgmr.msra.gmra.mxu0 %v1165_v9  ;;  %1653 = vmatmul.mubr.bf16.vlgmr.msra.gmra.mxu1 %v1165_v9  ;;  %v6236_v9 = vld [vmem:[#allocation7 + $0x12c] ss:$16 sps:$4 sm:$0xff]  }
 0x261   :  { %2133 = vmatpush1.bf16.msra.mxu0 %v6074_v7  ;;  %2174 = vmatpush1.bf16.msra.mxu1 %v6076_v8  ;;  %6991 = vst [vmem:[#allocation37_spill] sm:$0xff] %v6236_v9 }
 0x262   :  { %2134 = vmatprep.subr.bf16.mxu0 %v6078_v10  ;;  %2175 = vmatprep.subr.bf16.mxu1 %v6080_v11 }
 0x265   :  { %2135 = vmatpush1.bf16.msra.mxu0 %v6084_v12  ;;  %2176 = vmatpush1.bf16.msra.mxu1 %v6086_v13 }
 0x266   :  { %2136 = vmatprep.subr.bf16.mxu0 %v6092_v14  ;;  %2177 = vmatprep.subr.bf16.mxu1 %v6094_v15 }
 0x269   :  { %2137 = vmatpush1.bf16.msra.mxu0 %v6096_v16  ;;  %2178 = vmatpush1.bf16.msra.mxu1 %v6098_v17 }
 0x26a   :  { %2138 = vmatprep.subr.bf16.mxu0 %v6104_v18  ;;  %2179 = vmatprep.subr.bf16.mxu1 %v6106_v19 }
 0x26d   :  { %2139 = vmatpush1.bf16.msra.mxu0 %v6108_v20  ;;  %2180 = vmatpush1.bf16.msra.mxu1 %v6110_v21 }
 0x26e   :  { %2140 = vmatprep.subr.bf16.mxu0 %v6116_v22  ;;  %2181 = vmatprep.subr.bf16.mxu1 %v6118_v23 }
 0x271   :  { %2141 = vmatpush1.bf16.msra.mxu0 %v6120_v24  ;;  %2182 = vmatpush1.bf16.msra.mxu1 %v6122_v25 }
 0x272   :  { %2142 = vmatprep.subr.bf16.mxu0 %v6128_v27  ;;  %2183 = vmatprep.subr.bf16.mxu1 %v6130_v28 }
 0x275   :  { %2143 = vmatpush1.bf16.msra.mxu0 %v6132_v30  ;;  %2184 = vmatpush1.bf16.msra.mxu1 %v6134_v31 }
 0x276   :  { %2144 = vmatprep.subr.bf16.mxu0 %v6140_v32  ;;  %2185 = vmatprep.subr.bf16.mxu1 %v6142_v33 }
 0x279   :  { %2145 = vmatpush1.bf16.msra.mxu0 %v6144_v34  ;;  %2186 = vmatpush1.bf16.msra.mxu1 %v6146_v35 }
 0x27a   :  { %2146 = vmatprep.subr.bf16.mxu0 %v6152_v36  ;;  %2187 = vmatprep.subr.bf16.mxu1 %v6154_v37 }
 0x27d   :  { %2147 = vmatpush1.bf16.msra.mxu0 %v6156_v38  ;;  %2188 = vmatpush1.bf16.msra.mxu1 %v6158_v39 }
 0x27e   :  { %2148 = vmatprep.subr.bf16.mxu0 %v6166_v41  ;;  %2189 = vmatprep.subr.bf16.mxu1 %v6170_v51 }
 0x281   :  { %2149 = vmatpush2.bf16.msra.mxu0 %v6164_v40  ;;  %2190 = vmatpush2.bf16.msra.mxu1 %v6168_v57 }
 0x282   :  { %2150 = vmatprep.subr.bf16.mxu0 %v6172_v56  ;;  %2191 = vmatprep.subr.bf16.mxu1 %v6175_v47 }
 0x285   :  { %2151 = vmatpush2.bf16.msra.mxu0 %v6180_v52  ;;  %2192 = vmatpush2.bf16.msra.mxu1 %v6182_v46 }
 0x286   :  { %2152 = vmatprep.subr.bf16.mxu0 %v6186_v50  ;;  %2193 = vmatprep.subr.bf16.mxu1 %v6188_v55 }
 0x289   :  { %2153 = vmatpush2.bf16.msra.mxu0 %v6192_v49  ;;  %2194 = vmatpush2.bf16.msra.mxu1 %v6194_v54 }
 0x28a   :  { %2154 = vmatprep.subr.bf16.mxu0 %v6198_v59  ;;  %2195 = vmatprep.subr.bf16.mxu1 %v6200_v0 }
 0x28d   :  { %2155 = vmatpush2.bf16.msra.mxu0 %v6204_v45  ;;  %2196 = vmatpush2.bf16.msra.mxu1 %v6206_v1 }
 0x28e   :  { %2156 = vmatprep.subr.bf16.mxu0 %v6210_v60  ;;  %2197 = vmatprep.subr.bf16.mxu1 %v6219_v48 }
 0x291   :  { %2157 = vmatpush2.bf16.msra.mxu0 %v6214_v53  ;;  %2198 = vmatpush2.bf16.msra.mxu1 %v6217_v61  ;;  %v6246_v61 = vld [vmem:[#allocation7 + $0x104] ss:$16 sps:$4 sm:$0xff]  }
 0x292   :  { %2158 = vmatprep.subr.bf16.mxu0 %v6221_v2  ;;  %2199 = vmatprep.subr.bf16.mxu1 %v6223_v3  ;;  %6994 = vst [vmem:[#allocation43_spill] sm:$0xff] %v6246_v61  ;;  %v6248_v2 = vld [vmem:[#allocation7 + $0x10c] ss:$16 sps:$4 sm:$0xff]   ;;  %v6252_v3 = vld [vmem:[#allocation7 + $0x100] ss:$16 sps:$4 sm:$0xff]  }
 0x293   :  { %6995 = vst [vmem:[#allocation44_spill] sm:$0xff] %v6248_v2  ;;  %6996 = vst [vmem:[#allocation45_spill] sm:$0xff] %v6252_v3 }
 0x295   :  { %2159 = vmatpush2.bf16.msra.mxu0 %v6228_v4  ;;  %2200 = vmatpush2.bf16.msra.mxu1 %v6230_v5  ;;  %v6254_v4 = vld [vmem:[#allocation7 + $0x108] ss:$16 sps:$4 sm:$0xff]  }
 0x296   :  { %2160 = vmatprep.subr.bf16.mxu0 %v6234_v6  ;;  %2201 = vmatprep.subr.bf16.mxu1 %v6236_v9  ;;  %6997 = vst [vmem:[#allocation46_spill] sm:$0xff] %v6254_v4 }
 0x299   :  { %2161 = vmatpush2.bf16.msra.mxu0 %v6240_v62  ;;  %2202 = vmatpush2.bf16.msra.mxu1 %v6242_v43  ;;  %v1237_v43 = vld [vmem:[%s1236_s12] sm:$0xf] }
 0x29a   :  { %2162 = vmatprep.subr.bf16.mxu0 %v6246_v61  ;;  %2203 = vmatprep.subr.bf16.mxu1 %v6248_v2  ;;  %v1661_v62 = vld [vmem:[%s6800_s3] sm:$0xf]  ;;  %v1562_v61 = vrot.slane %v1237_v43, %v6970_v26 }
 0x29b   :  { %v1666_v2 = vrot.slane %v1661_v62, %v6970_v26  ;;  %v1674_v26 = vrot.slane %v1661_v62, %v5976_v63 }
 0x29d   :  { %2163 = vmatpush2.bf16.msra.mxu0 %v6252_v3  ;;  %2204 = vmatpush2.bf16.msra.mxu1 %v6254_v4  ;;  %v1574_v3 = vrot.slane %v1237_v43, %v6971_v29 }
 0x29e   :  { %2685 = vmatprep.subr.bf16.mxu0 %v6068_v58  ;;  %2726 = vmatprep.subr.bf16.mxu1 %v6070_v44  ;;  %v1678_v58 = vrot.slane %v1661_v62, %v6971_v29  ;;  %v1570_v44 = vrot.slane %v1237_v43, %v5976_v63  ;;  %v1566_v29 = vrot.slane %v1237_v43, %v5985_v42 }
 0x320   :  { %v1613_v9 = vpop.f32.mrf.mxu0  ;;  %v1654_v4 = vpop.f32.mrf.mxu1 }
 0x321   :  { %v1614_v6 = vadd.f32 %v1613_v9, %v1562_v61  ;;  %v1655_v54 = vadd.f32 %v1654_v4, %v1570_v44  ;;  %v7000_v4 = vld [vmem:[#allocation22_spill] sm:$0xff] }
 0x322   :  { %v1615_v5 = vpop.f32.mrf.mxu0  ;;  %v1656_v53 = vpop.f32.mrf.mxu1 }
 0x323   :  { %v1683_v48 = vadd.f32 %v1666_v2, %v1614_v6  ;;  %v1657_v60 = vadd.f32 %v1656_v53, %v1574_v3  ;;  %v1685_v9 = vadd.f32 %v1674_v26, %v1655_v54  ;;  %v1616_v53 = vadd.f32 %v1615_v5, %v1566_v29  ;;  %v6999_v3 = vld [vmem:[#allocation21_spill] sm:$0xff]  ;;  %v7001_v5 = vld [vmem:[#allocation23_spill] sm:$0xff]  ;;  %v7002_v6 = vld [vmem:[#allocation24_spill] sm:$0xff] }
 0x324   :  { %v1617_v1 = vpop.f32.mrf.mxu0  ;;  %v1658_v45 = vpop.f32.mrf.mxu1 }
 0x325   :  { %v4747_v0 = vmul.f32 -1.442695, %v1683_v48  ;;  %v6270_v59 = vadd.f32 %v1678_v58, %v1657_v60  ;;  %v4748_v2 = vmul.f32 -1.442695, %v1685_v9  ;;  %v1670_v45 = vrot.slane %v1661_v62, %v5985_v42  ;;  %v7004_v9 = vld [vmem:[#allocation26_spill] sm:$0xff] }
 0x326   :  { %v1618_v49 = vpop.f32.mrf.mxu0  ;;  %v1659_v55 = vpop.f32.mrf.mxu1 }
 0x327   :  { %6998 = vst [vmem:[#allocation47_spill] sm:$0xff] %v6270_v59  ;;  %5412 = vpow2.f32 %v4747_v0  ;;  %v1703_v61 = vsel %vm597_vm0, %v6270_v59, -inf  ;;  %v1684_v58 = vadd.f32 %v1670_v45, %v1616_v53  ;;  %v7006_v53 = vld [vmem:[#allocation28_spill] sm:$0xff]  ;;  %v7007_v45 = vld [vmem:[#allocation31_spill] sm:$0xff]  ;;  %v7021_v59 = vld [vmem:[#allocation46_spill] sm:$0xff] }
 0x328   :  { %1704 = vmax.xlane.f32.xlu1 %v1703_v61  ;;  %5414 = vpow2.f32 %v4748_v2  ;;  %v7003_v61 = vld [vmem:[#allocation25_spill] sm:$0xff]  ;;  %v7005_v2 = vld [vmem:[#allocation27_spill] sm:$0xff] }
 0x329   :  { %5416 = vtanh.f32 %v1684_v58  ;;  %v7008_v58 = vld [vmem:[#allocation29_spill] sm:$0xff] }
 0x334   :  { %v5413_v1 = vpop.eup %5412 }
 0x335   :  { %v1690_v44 = vadd.f32 1.0, %v5413_v1  ;;  %v5415_v49 = vpop.eup %5414  ;;  %v7009_v1 = vld [vmem:[#allocation30_spill] sm:$0xff] }
 0x336   :  { %v1697_v55 = vadd.f32 1.0, %v5415_v49  ;;  %v5417_v0 = vpop.eup %5416  ;;  %v7011_v49 = vld [vmem:[#allocation33_spill] sm:$0xff] }
 0x337   :  { %5418 = vrcp.f32 %v1690_v44  ;;  %v7010_v44 = vld [vmem:[#allocation32_spill] sm:$0xff] }
 0x338   :  { %5420 = vrcp.f32 %v1697_v55  ;;  %v7012_v55 = vld [vmem:[#allocation34_spill] sm:$0xff] }
 0x344   :  { %v5419_v60 = vpop.eup %5418 }
 0x345   :  { %v1700_v48 = vmul.f32 %v5419_v60, %v5417_v0  ;;  %v5421_v43 = vpop.eup %5420  ;;  %v7013_v0 = vld [vmem:[#allocation35_spill] sm:$0xff]  ;;  %v7014_v60 = vld [vmem:[#allocation36_spill] sm:$0xff] }
 0x347   :  { %5422 = vtanh.f32 %v1700_v48  ;;  %v1719_v26 = vpack.c.bf16 %v1700_v48, %v1700_v48  ;;  %v7015_v48 = vld [vmem:[#allocation37_spill] sm:$0xff] }
 0x349   :  { %2164 = vmatprep.mubr.bf16.mxu0 %v1719_v26  ;;  %2205 = vmatprep.mubr.bf16.mxu1 %v1719_v26  ;;  %v7016_v26 = vld [vmem:[#allocation38_spill] sm:$0xff] }
 0x354   :  { %v5423_v29 = vpop.eup %5422 }
 0x355   :  { %v1702_v54 = vmul.f32 %v5423_v29, %v5421_v43  ;;  %v7017_v43 = vld [vmem:[#allocation39_spill] sm:$0xff] }
 0x356   :  { %v7018_v29 = vld [vmem:[#allocation43_spill] sm:$0xff] }
 0x357   :  { %v1718_v62 = vpack.c.bf16 %v1702_v54, %v1702_v54  ;;  %v7019_v54 = vld [vmem:[#allocation44_spill] sm:$0xff] }
 0x359   :  { %2165 = vmatmul.mubr.bf16.vlgmr.msra.gmra.mxu0 %v1718_v62  ;;  %2206 = vmatmul.mubr.bf16.vlgmr.msra.gmra.mxu1 %v1718_v62  ;;  %v7020_v62 = vld [vmem:[#allocation45_spill] sm:$0xff] }
 0x35a   :  { %2686 = vmatpush1.bf16.msra.mxu0 %v6074_v7  ;;  %2727 = vmatpush1.bf16.msra.mxu1 %v6076_v8 }
 0x35b   :  { %2687 = vmatprep.subr.bf16.mxu0 %v6078_v10  ;;  %2728 = vmatprep.subr.bf16.mxu1 %v6080_v11 }
 0x35e   :  { %2688 = vmatpush1.bf16.msra.mxu0 %v6084_v12  ;;  %2729 = vmatpush1.bf16.msra.mxu1 %v6086_v13 }
 0x35f   :  { %2689 = vmatprep.subr.bf16.mxu0 %v6092_v14  ;;  %2730 = vmatprep.subr.bf16.mxu1 %v6094_v15 }
 0x362   :  { %2690 = vmatpush1.bf16.msra.mxu0 %v6096_v16  ;;  %2731 = vmatpush1.bf16.msra.mxu1 %v6098_v17 }
 0x363   :  { %2691 = vmatprep.subr.bf16.mxu0 %v6104_v18  ;;  %2732 = vmatprep.subr.bf16.mxu1 %v6106_v19 }
 0x366   :  { %2692 = vmatpush1.bf16.msra.mxu0 %v6108_v20  ;;  %2733 = vmatpush1.bf16.msra.mxu1 %v6110_v21 }
 0x367   :  { %2693 = vmatprep.subr.bf16.mxu0 %v6116_v22  ;;  %2734 = vmatprep.subr.bf16.mxu1 %v6118_v23 }
 0x36a   :  { %2694 = vmatpush1.bf16.msra.mxu0 %v6120_v24  ;;  %2735 = vmatpush1.bf16.msra.mxu1 %v6122_v25 }
 0x36b   :  { %2695 = vmatprep.subr.bf16.mxu0 %v6128_v27  ;;  %2736 = vmatprep.subr.bf16.mxu1 %v6130_v28 }
 0x36e   :  { %2696 = vmatpush1.bf16.msra.mxu0 %v6132_v30  ;;  %2737 = vmatpush1.bf16.msra.mxu1 %v6134_v31 }
 0x36f   :  { %2697 = vmatprep.subr.bf16.mxu0 %v6140_v32  ;;  %2738 = vmatprep.subr.bf16.mxu1 %v6142_v33 }
 0x372   :  { %2698 = vmatpush1.bf16.msra.mxu0 %v6144_v34  ;;  %2739 = vmatpush1.bf16.msra.mxu1 %v6146_v35 }
 0x373   :  { %2699 = vmatprep.subr.bf16.mxu0 %v6152_v36  ;;  %2740 = vmatprep.subr.bf16.mxu1 %v6154_v37 }
 0x376   :  { %2700 = vmatpush1.bf16.msra.mxu0 %v6156_v38  ;;  %2741 = vmatpush1.bf16.msra.mxu1 %v6158_v39 }
 0x377   :  { %2701 = vmatprep.subr.bf16.mxu0 %v6166_v41  ;;  %2742 = vmatprep.subr.bf16.mxu1 %v6170_v51 }
 0x37a   :  { %2702 = vmatpush2.bf16.msra.mxu0 %v6164_v40  ;;  %2743 = vmatpush2.bf16.msra.mxu1 %v6168_v57 }
 0x37b   :  { %2703 = vmatprep.subr.bf16.mxu0 %v6172_v56  ;;  %2744 = vmatprep.subr.bf16.mxu1 %v6175_v47 }
 0x37e   :  { %2704 = vmatpush2.bf16.msra.mxu0 %v6180_v52  ;;  %2745 = vmatpush2.bf16.msra.mxu1 %v6182_v46 }
 0x37f   :  { %2705 = vmatprep.subr.bf16.mxu0 %v6186_v50  ;;  %2746 = vmatprep.subr.bf16.mxu1 %v6999_v3 }
 0x382   :  { %2706 = vmatpush2.bf16.msra.mxu0 %v7000_v4  ;;  %2747 = vmatpush2.bf16.msra.mxu1 %v7001_v5 }
 0x383   :  { %2707 = vmatprep.subr.bf16.mxu0 %v7002_v6  ;;  %2748 = vmatprep.subr.bf16.mxu1 %v7003_v61 }
 0x386   :  { %2708 = vmatpush2.bf16.msra.mxu0 %v7004_v9  ;;  %2749 = vmatpush2.bf16.msra.mxu1 %v7005_v2 }
 0x387   :  { %2709 = vmatprep.subr.bf16.mxu0 %v7006_v53  ;;  %2750 = vmatprep.subr.bf16.mxu1 %v7007_v45 }
 0x38a   :  { %2710 = vmatpush2.bf16.msra.mxu0 %v7008_v58  ;;  %2751 = vmatpush2.bf16.msra.mxu1 %v7009_v1 }
 0x38b   :  { %2711 = vmatprep.subr.bf16.mxu0 %v7010_v44  ;;  %2752 = vmatprep.subr.bf16.mxu1 %v7011_v49  ;;  %v7022_v49 = vld [vmem:[#allocation19_spill] sm:$0xff] }
 0x38e   :  { %2712 = vmatpush2.bf16.msra.mxu0 %v7012_v55  ;;  %2753 = vmatpush2.bf16.msra.mxu1 %v7013_v0  ;;  %v7023_v55 = vld [vmem:[#allocation20_spill] sm:$0xff] }
 0x38f   :  { %2713 = vmatprep.subr.bf16.mxu0 %v7014_v60  ;;  %2754 = vmatprep.subr.bf16.mxu1 %v7015_v48  ;;  %v1790_v48 = vld [vmem:[%s1789_s17] sm:$0xf]  ;;  %v7025_v60 = vld [vmem:[#allocation41_spill] sm:$0xff] }
 0x392   :  { %2714 = vmatpush2.bf16.msra.mxu0 %v7016_v26  ;;  %2755 = vmatpush2.bf16.msra.mxu1 %v7017_v43  ;;  %v2214_v43 = vld [vmem:[%s6800_s3] sm:$0xf] }
 0x393   :  { %2715 = vmatprep.subr.bf16.mxu0 %v7018_v29  ;;  %2756 = vmatprep.subr.bf16.mxu1 %v7019_v54  ;;  %v7024_v26 = vld [vmem:[#allocation40_spill] sm:$0xff] }
 0x394   :  { %v2115_v29 = vrot.slane %v1790_v48, %v7024_v26  ;;  %v2219_v54 = vrot.slane %v2214_v43, %v7024_v26  ;;  %v2227_v26 = vrot.slane %v2214_v43, %v5976_v63 }
 0x396   :  { %2716 = vmatpush2.bf16.msra.mxu0 %v7020_v62  ;;  %2757 = vmatpush2.bf16.msra.mxu1 %v7021_v59  ;;  %v2127_v62 = vrot.slane %v1790_v48, %v7025_v60 }
 0x397   :  { %3238 = vmatprep.subr.bf16.mxu0 %v7022_v49  ;;  %3279 = vmatprep.subr.bf16.mxu1 %v7023_v55  ;;  %v2231_v49 = vrot.slane %v2214_v43, %v7025_v60  ;;  %v2123_v55 = vrot.slane %v1790_v48, %v5976_v63  ;;  %v2119_v60 = vrot.slane %v1790_v48, %v5985_v42 }
 0x419   :  { %v2166_v0 = vpop.f32.mrf.mxu0  ;;  %v2207_v59 = vpop.f32.mrf.mxu1 }
 0x41a   :  { %v2167_v44 = vadd.f32 %v2166_v0, %v2115_v29  ;;  %v2208_v5 = vadd.f32 %v2207_v59, %v2123_v55 }
 0x41b   :  { %v2168_v1 = vpop.f32.mrf.mxu0  ;;  %v2209_v58 = vpop.f32.mrf.mxu1 }
 0x41c   :  { %v2236_v45 = vadd.f32 %v2219_v54, %v2167_v44  ;;  %v2210_v53 = vadd.f32 %v2209_v58, %v2127_v62  ;;  %v2238_v29 = vadd.f32 %v2227_v26, %v2208_v5  ;;  %v2169_v58 = vadd.f32 %v2168_v1, %v2119_v60 }
 0x41d   :  { %v2170_v2 = vpop.f32.mrf.mxu0  ;;  %v2211_v9 = vpop.f32.mrf.mxu1 }
 0x41e   :  { %v4815_v61 = vmul.f32 -1.442695, %v2236_v45  ;;  %v6349_v6 = vadd.f32 %v2231_v49, %v2210_v53  ;;  %v4816_v44 = vmul.f32 -1.442695, %v2238_v29  ;;  %v2223_v9 = vrot.slane %v2214_v43, %v5985_v42 }
 0x41f   :  { %v2171_v4 = vpop.f32.mrf.mxu0  ;;  %v2212_v3 = vpop.f32.mrf.mxu1 }
 0x420   :  { %7026 = vst [vmem:[#allocation19_spill] sm:$0xff] %v6349_v6  ;;  %5424 = vpow2.f32 %v4815_v61  ;;  %v2256_v0 = vsel %vm597_vm0, %v6349_v6, -inf  ;;  %v2237_v2 = vadd.f32 %v2223_v9, %v2169_v58  ;;  %v6605_v6 = vld [vmem:[#allocation7 + $0x120] ss:$16 sps:$4 sm:$0xff]  }
 0x421   :  { %2257 = vmax.xlane.f32.xlu1 %v2256_v0  ;;  %5426 = vpow2.f32 %v4816_v44 }
 0x422   :  { %5428 = vtanh.f32 %v2237_v2 }
 0x42d   :  { %v5425_v53 = vpop.eup %5424 }
 0x42e   :  { %v2243_v59 = vadd.f32 1.0, %v5425_v53  ;;  %v5427_v4 = vpop.eup %5426 }
 0x42f   :  { %v2250_v3 = vadd.f32 1.0, %v5427_v4  ;;  %v5429_v61 = vpop.eup %5428 }
 0x430   :  { %5430 = vrcp.f32 %v2243_v59 }
 0x431   :  { %5432 = vrcp.f32 %v2250_v3 }
 0x43d   :  { %v5431_v45 = vpop.eup %5430 }
 0x43e   :  { %v2253_v54 = vmul.f32 %v5431_v45, %v5429_v61  ;;  %v5433_v48 = vpop.eup %5432 }
 0x440   :  { %5434 = vtanh.f32 %v2253_v54  ;;  %v2272_v5 = vpack.c.bf16 %v2253_v54, %v2253_v54 }
 0x442   :  { %2717 = vmatprep.mubr.bf16.mxu0 %v2272_v5  ;;  %2758 = vmatprep.mubr.bf16.mxu1 %v2272_v5  ;;  %v6433_v5 = vld [vmem:[#allocation7 + $0xe4] ss:$16 sps:$4 sm:$0xff]  }
 0x44d   :  { %v5435_v1 = vpop.eup %5434 }
 0x44e   :  { %v2255_v60 = vmul.f32 %v5435_v1, %v5433_v48  ;;  %v6435_v48 = vld [vmem:[#allocation7 + $0xec] ss:$16 sps:$4 sm:$0xff]  }
 0x450   :  { %v2271_v26 = vpack.c.bf16 %v2255_v60, %v2255_v60 }
 0x452   :  { %2718 = vmatmul.mubr.bf16.vlgmr.msra.gmra.mxu0 %v2271_v26  ;;  %2759 = vmatmul.mubr.bf16.vlgmr.msra.gmra.mxu1 %v2271_v26 }
 0x453   :  { %3239 = vmatpush1.bf16.msra.mxu0 %v6074_v7  ;;  %3280 = vmatpush1.bf16.msra.mxu1 %v6076_v8  ;;  %v7027_v7 = vld [vmem:[#allocation21_spill] sm:$0xff]  ;;  %v7028_v8 = vld [vmem:[#allocation22_spill] sm:$0xff] }
 0x454   :  { %3240 = vmatprep.subr.bf16.mxu0 %v6078_v10  ;;  %3281 = vmatprep.subr.bf16.mxu1 %v6080_v11  ;;  %v7029_v10 = vld [vmem:[#allocation23_spill] sm:$0xff]  ;;  %v7030_v11 = vld [vmem:[#allocation24_spill] sm:$0xff] }
 0x457   :  { %3241 = vmatpush1.bf16.msra.mxu0 %v6084_v12  ;;  %3282 = vmatpush1.bf16.msra.mxu1 %v6086_v13  ;;  %v7031_v12 = vld [vmem:[#allocation25_spill] sm:$0xff]  ;;  %v7032_v13 = vld [vmem:[#allocation26_spill] sm:$0xff] }
 0x458   :  { %3242 = vmatprep.subr.bf16.mxu0 %v6092_v14  ;;  %3283 = vmatprep.subr.bf16.mxu1 %v6094_v15  ;;  %v7033_v14 = vld [vmem:[#allocation27_spill] sm:$0xff]  ;;  %v7034_v15 = vld [vmem:[#allocation28_spill] sm:$0xff] }
 0x45b   :  { %3243 = vmatpush1.bf16.msra.mxu0 %v6096_v16  ;;  %3284 = vmatpush1.bf16.msra.mxu1 %v6098_v17  ;;  %v7035_v16 = vld [vmem:[#allocation31_spill] sm:$0xff]  ;;  %v7036_v17 = vld [vmem:[#allocation29_spill] sm:$0xff] }
 0x45c   :  { %3244 = vmatprep.subr.bf16.mxu0 %v6104_v18  ;;  %3285 = vmatprep.subr.bf16.mxu1 %v6106_v19  ;;  %v7037_v18 = vld [vmem:[#allocation30_spill] sm:$0xff]  ;;  %v7038_v19 = vld [vmem:[#allocation32_spill] sm:$0xff] }
 0x45f   :  { %3245 = vmatpush1.bf16.msra.mxu0 %v6108_v20  ;;  %3286 = vmatpush1.bf16.msra.mxu1 %v6110_v21  ;;  %v7039_v20 = vld [vmem:[#allocation33_spill] sm:$0xff]  ;;  %v7040_v21 = vld [vmem:[#allocation34_spill] sm:$0xff] }
 0x460   :  { %3246 = vmatprep.subr.bf16.mxu0 %v6116_v22  ;;  %3287 = vmatprep.subr.bf16.mxu1 %v6118_v23  ;;  %v7041_v22 = vld [vmem:[#allocation35_spill] sm:$0xff]  ;;  %v7042_v23 = vld [vmem:[#allocation36_spill] sm:$0xff] }
 0x463   :  { %3247 = vmatpush1.bf16.msra.mxu0 %v6120_v24  ;;  %3288 = vmatpush1.bf16.msra.mxu1 %v6122_v25  ;;  %v7043_v24 = vld [vmem:[#allocation37_spill] sm:$0xff]  ;;  %v7044_v25 = vld [vmem:[#allocation38_spill] sm:$0xff] }
 0x464   :  { %3248 = vmatprep.subr.bf16.mxu0 %v6128_v27  ;;  %3289 = vmatprep.subr.bf16.mxu1 %v6130_v28  ;;  %v7045_v27 = vld [vmem:[#allocation39_spill] sm:$0xff]  ;;  %7070 = vst [vmem:[#allocation38_spill] sm:$0xff] %v6605_v6 }
 0x465   :  { %v7046_v28 = vld [vmem:[#allocation43_spill] sm:$0xff] }
 0x467   :  { %3249 = vmatpush1.bf16.msra.mxu0 %v6132_v30  ;;  %3290 = vmatpush1.bf16.msra.mxu1 %v6134_v31  ;;  %v7047_v30 = vld [vmem:[#allocation44_spill] sm:$0xff]  ;;  %v7048_v31 = vld [vmem:[#allocation45_spill] sm:$0xff] }
 0x468   :  { %3250 = vmatprep.subr.bf16.mxu0 %v6140_v32  ;;  %3291 = vmatprep.subr.bf16.mxu1 %v6142_v33  ;;  %v7049_v32 = vld [vmem:[#allocation46_spill] sm:$0xff]  ;;  %v2343_v33 = vld [vmem:[%s2342_s1] sm:$0xf] }
 0x469   :  { %v2672_v53 = vrot.slane %v2343_v33, %v5985_v42 }
 0x46b   :  { %3251 = vmatpush1.bf16.msra.mxu0 %v6144_v34  ;;  %3292 = vmatpush1.bf16.msra.mxu1 %v6146_v35  ;;  %v2767_v34 = vld [vmem:[%s6800_s3] sm:$0xf] }
 0x46c   :  { %3252 = vmatprep.subr.bf16.mxu0 %v6152_v36  ;;  %3293 = vmatprep.subr.bf16.mxu1 %v6154_v37  ;;  %v7050_v35 = vld [vmem:[#allocation40_spill] sm:$0xff]  ;;  %v2780_v29 = vrot.slane %v2767_v34, %v5976_v63  ;;  %v2776_v3 = vrot.slane %v2767_v34, %v5985_v42 }
 0x46d   :  { %v2668_v36 = vrot.slane %v2343_v33, %v7050_v35  ;;  %v2772_v37 = vrot.slane %v2767_v34, %v7050_v35 }
 0x46f   :  { %3253 = vmatpush1.bf16.msra.mxu0 %v6156_v38  ;;  %3294 = vmatpush1.bf16.msra.mxu1 %v6158_v39  ;;  %v7051_v38 = vld [vmem:[#allocation41_spill] sm:$0xff] }
 0x470   :  { %3254 = vmatprep.subr.bf16.mxu0 %v6166_v41  ;;  %3295 = vmatprep.subr.bf16.mxu1 %v6170_v51  ;;  %v2680_v39 = vrot.slane %v2343_v33, %v7051_v38  ;;  %v2784_v51 = vrot.slane %v2767_v34, %v7051_v38  ;;  %v6487_v34 = vld [vmem:[#allocation7 + $0x68] ss:$16 sps:$4 sm:$0xff]  }
 0x473   :  { %3255 = vmatpush2.bf16.msra.mxu0 %v6164_v40  ;;  %3296 = vmatpush2.bf16.msra.mxu1 %v6168_v57 }
 0x474   :  { %3256 = vmatprep.subr.bf16.mxu0 %v6172_v56  ;;  %3297 = vmatprep.subr.bf16.mxu1 %v6175_v47  ;;  %v2676_v56 = vrot.slane %v2343_v33, %v5976_v63  ;;  %v6485_v33 = vld [vmem:[#allocation7 + $0x60] ss:$16 sps:$4 sm:$0xff]  }
 0x477   :  { %3257 = vmatpush2.bf16.msra.mxu0 %v6180_v52  ;;  %3298 = vmatpush2.bf16.msra.mxu1 %v6182_v46 }
 0x478   :  { %3258 = vmatprep.subr.bf16.mxu0 %v6186_v50  ;;  %3299 = vmatprep.subr.bf16.mxu1 %v7027_v7 }
 0x47b   :  { %3259 = vmatpush2.bf16.msra.mxu0 %v7028_v8  ;;  %3300 = vmatpush2.bf16.msra.mxu1 %v7029_v10 }
 0x47c   :  { %3260 = vmatprep.subr.bf16.mxu0 %v7030_v11  ;;  %3301 = vmatprep.subr.bf16.mxu1 %v7031_v12 }
 0x47f   :  { %3261 = vmatpush2.bf16.msra.mxu0 %v7032_v13  ;;  %3302 = vmatpush2.bf16.msra.mxu1 %v7033_v14  ;;  %v6439_v14 = vld [vmem:[#allocation7 + $0xe0] ss:$16 sps:$4 sm:$0xff]  }
 0x480   :  { %3262 = vmatprep.subr.bf16.mxu0 %v7034_v15  ;;  %3303 = vmatprep.subr.bf16.mxu1 %v7035_v16  ;;  %v6441_v15 = vld [vmem:[#allocation7 + $0xe8] ss:$16 sps:$4 sm:$0xff]  }
 0x483   :  { %3263 = vmatpush2.bf16.msra.mxu0 %v7036_v17  ;;  %3304 = vmatpush2.bf16.msra.mxu1 %v7037_v18  ;;  %v6443_v17 = vld [vmem:[#allocation7 + $0xc4] ss:$16 sps:$4 sm:$0xff]   ;;  %v6445_v18 = vld [vmem:[#allocation7 + $0xcc] ss:$16 sps:$4 sm:$0xff]  }
 0x484   :  { %3264 = vmatprep.subr.bf16.mxu0 %v7038_v19  ;;  %3305 = vmatprep.subr.bf16.mxu1 %v7039_v20  ;;  %v6449_v19 = vld [vmem:[#allocation7 + $0xc0] ss:$16 sps:$4 sm:$0xff]   ;;  %v6451_v20 = vld [vmem:[#allocation7 + $0xc8] ss:$16 sps:$4 sm:$0xff]  }
 0x487   :  { %3265 = vmatpush2.bf16.msra.mxu0 %v7040_v21  ;;  %3306 = vmatpush2.bf16.msra.mxu1 %v7041_v22  ;;  %v6457_v21 = vld [vmem:[#allocation7 + $0xa4] ss:$16 sps:$4 sm:$0xff]   ;;  %v6459_v22 = vld [vmem:[#allocation7 + $0xac] ss:$16 sps:$4 sm:$0xff]  }
 0x488   :  { %3266 = vmatprep.subr.bf16.mxu0 %v7042_v23  ;;  %3307 = vmatprep.subr.bf16.mxu1 %v7043_v24  ;;  %v6461_v23 = vld [vmem:[#allocation7 + $0xa0] ss:$16 sps:$4 sm:$0xff]   ;;  %v6463_v24 = vld [vmem:[#allocation7 + $0xa8] ss:$16 sps:$4 sm:$0xff]  }
 0x48b   :  { %3267 = vmatpush2.bf16.msra.mxu0 %v7044_v25  ;;  %3308 = vmatpush2.bf16.msra.mxu1 %v7045_v27  ;;  %v6469_v25 = vld [vmem:[#allocation7 + $0x84] ss:$16 sps:$4 sm:$0xff]   ;;  %v6471_v27 = vld [vmem:[#allocation7 + $0x8c] ss:$16 sps:$4 sm:$0xff]  }
 0x48c   :  { %3268 = vmatprep.subr.bf16.mxu0 %v7046_v28  ;;  %3309 = vmatprep.subr.bf16.mxu1 %v7047_v30  ;;  %v6473_v28 = vld [vmem:[#allocation7 + $0x80] ss:$16 sps:$4 sm:$0xff]   ;;  %v6475_v30 = vld [vmem:[#allocation7 + $0x88] ss:$16 sps:$4 sm:$0xff]  }
 0x48f   :  { %3269 = vmatpush2.bf16.msra.mxu0 %v7048_v31  ;;  %3310 = vmatpush2.bf16.msra.mxu1 %v7049_v32  ;;  %v6481_v31 = vld [vmem:[#allocation7 + $0x64] ss:$16 sps:$4 sm:$0xff]   ;;  %v6483_v32 = vld [vmem:[#allocation7 + $0x6c] ss:$16 sps:$4 sm:$0xff]  }
 0x490   :  { %3791 = vmatprep.subr.bf16.mxu0 %v6433_v5  ;;  %3832 = vmatprep.subr.bf16.mxu1 %v6435_v48 }
 0x512   :  { %v2719_v40 = vpop.f32.mrf.mxu0  ;;  %v2760_v41 = vpop.f32.mrf.mxu1 }
 0x513   :  { %v2720_v57 = vadd.f32 %v2719_v40, %v2668_v36  ;;  %v2761_v0 = vadd.f32 %v2760_v41, %v2676_v56  ;;  %v6493_v36 = vld [vmem:[#allocation7 + $0x44] ss:$16 sps:$4 sm:$0xff]   ;;  %v6499_v40 = vld [vmem:[#allocation7 + $0x48] ss:$16 sps:$4 sm:$0xff]  }
 0x514   :  { %v2721_v47 = vpop.f32.mrf.mxu0  ;;  %v2762_v52 = vpop.f32.mrf.mxu1  ;;  %v6505_v41 = vld [vmem:[#allocation7 + $0x24] ss:$16 sps:$4 sm:$0xff]   ;;  %v6511_v56 = vld [vmem:[#allocation7 + $0x28] ss:$16 sps:$4 sm:$0xff]  }
 0x515   :  { %v2789_v46 = vadd.f32 %v2772_v37, %v2720_v57  ;;  %v2763_v50 = vadd.f32 %v2762_v52, %v2680_v39  ;;  %v2791_v2 = vadd.f32 %v2780_v29, %v2761_v0  ;;  %v2722_v4 = vadd.f32 %v2721_v47, %v2672_v53  ;;  %v6495_v37 = vld [vmem:[#allocation7 + $0x4c] ss:$16 sps:$4 sm:$0xff]   ;;  %v6497_v39 = vld [vmem:[#allocation7 + $0x40] ss:$16 sps:$4 sm:$0xff]   ;;  %v6517_v47 = vld [vmem:[#allocation7 + $0x4] ss:$16 sps:$4 sm:$0xff]  }
 0x516   :  { %v2723_v43 = vpop.f32.mrf.mxu0  ;;  %v2764_v62 = vpop.f32.mrf.mxu1  ;;  %v6507_v57 = vld [vmem:[#allocation7 + $0x2c] ss:$16 sps:$4 sm:$0xff]   ;;  %v6537_v29 = vld [vmem:[#allocation7 + $0x1c4] ss:$16 sps:$4 sm:$0xff]  }
 0x517   :  { %v4883_v49 = vmul.f32 -1.442695, %v2789_v46  ;;  %v6426_v55 = vadd.f32 %v2784_v51, %v2763_v50  ;;  %v4884_v59 = vmul.f32 -1.442695, %v2791_v2  ;;  %v2790_v61 = vadd.f32 %v2776_v3, %v2722_v4  ;;  %v6509_v51 = vld [vmem:[#allocation7 + $0x20] ss:$16 sps:$4 sm:$0xff]  }
 0x518   :  { %v2724_v44 = vpop.f32.mrf.mxu0  ;;  %v2765_v58 = vpop.f32.mrf.mxu1  ;;  %v6519_v52 = vld [vmem:[#allocation7 + $0xc] ss:$16 sps:$4 sm:$0xff]   ;;  %v6521_v46 = vld [vmem:[#allocation7] ss:$16 sps:$4 sm:$0xff]   ;;  %v6523_v50 = vld [vmem:[#allocation7 + $0x8] ss:$16 sps:$4 sm:$0xff]  }
 0x519   :  { %7052 = vst [vmem:[#allocation20_spill] sm:$0xff] %v6426_v55  ;;  %5436 = vpow2.f32 %v4883_v49  ;;  %v2809_v9 = vsel %vm597_vm0, %v6426_v55, -inf  ;;  %v6529_v43 = vld [vmem:[#allocation7 + $0x1e0] ss:$16 sps:$4 sm:$0xff]   ;;  %v6531_v62 = vld [vmem:[#allocation7 + $0x1e4] ss:$16 sps:$4 sm:$0xff]  }
 0x51a   :  { %2810 = vmax.xlane.f32.xlu0 %v2809_v9  ;;  %5438 = vpow2.f32 %v4884_v59  ;;  %v6533_v49 = vld [vmem:[#allocation7 + $0x1e8] ss:$16 sps:$4 sm:$0xff]   ;;  %v6535_v0 = vld [vmem:[#allocation7 + $0x1ec] ss:$16 sps:$4 sm:$0xff]   ;;  %v6545_v58 = vld [vmem:[#allocation7 + $0x1c0] ss:$16 sps:$4 sm:$0xff]  }
 0x51b   :  { %5440 = vtanh.f32 %v2790_v61  ;;  %v6540_v44 = vld [vmem:[#allocation7 + $0x1cc] ss:$16 sps:$4 sm:$0xff]   ;;  %v6547_v9 = vld [vmem:[#allocation7 + $0x1c8] ss:$16 sps:$4 sm:$0xff]   ;;  %v6551_v2 = vld [vmem:[#allocation7 + $0x1a4] ss:$16 sps:$4 sm:$0xff]  }
 0x51c   :  { %v6553_v53 = vld [vmem:[#allocation7 + $0x1ac] ss:$16 sps:$4 sm:$0xff]   ;;  %v6557_v59 = vld [vmem:[#allocation7 + $0x1a0] ss:$16 sps:$4 sm:$0xff]   ;;  %v6559_v4 = vld [vmem:[#allocation7 + $0x1a8] ss:$16 sps:$4 sm:$0xff]  }
 0x51d   :  { %7053 = vst [vmem:[#allocation21_spill] sm:$0xff] %v6553_v53  ;;  %7054 = vst [vmem:[#allocation22_spill] sm:$0xff] %v6557_v59  ;;  %v6563_v3 = vld [vmem:[#allocation7 + $0x184] ss:$16 sps:$4 sm:$0xff]   ;;  %v6565_v61 = vld [vmem:[#allocation7 + $0x18c] ss:$16 sps:$4 sm:$0xff]  }
 0x51e   :  { %7055 = vst [vmem:[#allocation23_spill] sm:$0xff] %v6559_v4  ;;  %7056 = vst [vmem:[#allocation24_spill] sm:$0xff] %v6563_v3  ;;  %v6607_v55 = vld [vmem:[#allocation7 + $0x128] ss:$16 sps:$4 sm:$0xff]  }
 0x51f   :  { %7057 = vst [vmem:[#allocation25_spill] sm:$0xff] %v6565_v61  ;;  %7071 = vst [vmem:[#allocation39_spill] sm:$0xff] %v6607_v55 }
 0x526   :  { %v5437_v45 = vpop.eup %5436 }
 0x527   :  { %v2796_v54 = vadd.f32 1.0, %v5437_v45  ;;  %v5439_v1 = vpop.eup %5438  ;;  %v6569_v45 = vld [vmem:[#allocation7 + $0x180] ss:$16 sps:$4 sm:$0xff]  }
 0x528   :  { %v2803_v60 = vadd.f32 1.0, %v5439_v1  ;;  %v5441_v26 = vpop.eup %5440  ;;  %7058 = vst [vmem:[#allocation26_spill] sm:$0xff] %v6569_v45  ;;  %v6575_v1 = vld [vmem:[#allocation7 + $0x164] ss:$16 sps:$4 sm:$0xff]  }
 0x529   :  { %5442 = vrcp.f32 %v2796_v54  ;;  %v6571_v54 = vld [vmem:[#allocation7 + $0x188] ss:$16 sps:$4 sm:$0xff]   ;;  %7060 = vst [vmem:[#allocation28_spill] sm:$0xff] %v6575_v1 }
 0x52a   :  { %5444 = vrcp.f32 %v2803_v60  ;;  %7059 = vst [vmem:[#allocation27_spill] sm:$0xff] %v6571_v54  ;;  %v6579_v60 = vld [vmem:[#allocation7 + $0x160] ss:$16 sps:$4 sm:$0xff]  }
 0x52b   :  { %7061 = vst [vmem:[#allocation31_spill] sm:$0xff] %v6579_v60 }
 0x536   :  { %v5443_v7 = vpop.eup %5442 }
 0x537   :  { %v2806_v8 = vmul.f32 %v5443_v7, %v5441_v26  ;;  %v5445_v11 = vpop.eup %5444  ;;  %v6582_v26 = vld [vmem:[#allocation7 + $0x168] ss:$16 sps:$4 sm:$0xff]   ;;  %v6584_v7 = vld [vmem:[#allocation7 + $0x16c] ss:$16 sps:$4 sm:$0xff]  }
 0x538   :  { %7062 = vst [vmem:[#allocation29_spill] sm:$0xff] %v6582_v26  ;;  %7063 = vst [vmem:[#allocation30_spill] sm:$0xff] %v6584_v7 }
 0x539   :  { %5446 = vtanh.f32 %v2806_v8  ;;  %v2825_v10 = vpack.c.bf16 %v2806_v8, %v2806_v8  ;;  %v6586_v8 = vld [vmem:[#allocation7 + $0x144] ss:$16 sps:$4 sm:$0xff]  }
 0x53a   :  { %7064 = vst [vmem:[#allocation32_spill] sm:$0xff] %v6586_v8 }
 0x53b   :  { %3270 = vmatprep.mubr.bf16.mxu0 %v2825_v10  ;;  %3311 = vmatprep.mubr.bf16.mxu1 %v2825_v10  ;;  %v6588_v10 = vld [vmem:[#allocation7 + $0x14c] ss:$16 sps:$4 sm:$0xff]  }
 0x53c   :  { %7065 = vst [vmem:[#allocation33_spill] sm:$0xff] %v6588_v10 }
 0x546   :  { %v5447_v12 = vpop.eup %5446 }
 0x547   :  { %v2808_v13 = vmul.f32 %v5447_v12, %v5445_v11  ;;  %v6593_v11 = vld [vmem:[#allocation7 + $0x140] ss:$16 sps:$4 sm:$0xff]   ;;  %v6595_v12 = vld [vmem:[#allocation7 + $0x148] ss:$16 sps:$4 sm:$0xff]  }
 0x548   :  { %7066 = vst [vmem:[#allocation34_spill] sm:$0xff] %v6593_v11  ;;  %7067 = vst [vmem:[#allocation35_spill] sm:$0xff] %v6595_v12 }
 0x549   :  { %v2824_v16 = vpack.c.bf16 %v2808_v13, %v2808_v13  ;;  %v6599_v13 = vld [vmem:[#allocation7 + $0x124] ss:$16 sps:$4 sm:$0xff]  }
 0x54a   :  { %7068 = vst [vmem:[#allocation36_spill] sm:$0xff] %v6599_v13 }
 0x54b   :  { %3271 = vmatmul.mubr.bf16.vlgmr.msra.gmra.mxu0 %v2824_v16  ;;  %3312 = vmatmul.mubr.bf16.vlgmr.msra.gmra.mxu1 %v2824_v16  ;;  %v6601_v16 = vld [vmem:[#allocation7 + $0x12c] ss:$16 sps:$4 sm:$0xff]  }
 0x54c   :  { %3792 = vmatpush1.bf16.msra.mxu0 %v6439_v14  ;;  %3833 = vmatpush1.bf16.msra.mxu1 %v6441_v15  ;;  %7069 = vst [vmem:[#allocation37_spill] sm:$0xff] %v6601_v16 }
 0x54d   :  { %3793 = vmatprep.subr.bf16.mxu0 %v6443_v17  ;;  %3834 = vmatprep.subr.bf16.mxu1 %v6445_v18 }
 0x550   :  { %3794 = vmatpush1.bf16.msra.mxu0 %v6449_v19  ;;  %3835 = vmatpush1.bf16.msra.mxu1 %v6451_v20 }
 0x551   :  { %3795 = vmatprep.subr.bf16.mxu0 %v6457_v21  ;;  %3836 = vmatprep.subr.bf16.mxu1 %v6459_v22 }
 0x554   :  { %3796 = vmatpush1.bf16.msra.mxu0 %v6461_v23  ;;  %3837 = vmatpush1.bf16.msra.mxu1 %v6463_v24 }
 0x555   :  { %3797 = vmatprep.subr.bf16.mxu0 %v6469_v25  ;;  %3838 = vmatprep.subr.bf16.mxu1 %v6471_v27 }
 0x558   :  { %3798 = vmatpush1.bf16.msra.mxu0 %v6473_v28  ;;  %3839 = vmatpush1.bf16.msra.mxu1 %v6475_v30 }
 0x559   :  { %3799 = vmatprep.subr.bf16.mxu0 %v6481_v31  ;;  %3840 = vmatprep.subr.bf16.mxu1 %v6483_v32 }
 0x55c   :  { %3800 = vmatpush1.bf16.msra.mxu0 %v6485_v33  ;;  %3841 = vmatpush1.bf16.msra.mxu1 %v6487_v34 }
 0x55d   :  { %3801 = vmatprep.subr.bf16.mxu0 %v6493_v36  ;;  %3842 = vmatprep.subr.bf16.mxu1 %v6495_v37 }
 0x560   :  { %3802 = vmatpush1.bf16.msra.mxu0 %v6497_v39  ;;  %3843 = vmatpush1.bf16.msra.mxu1 %v6499_v40 }
 0x561   :  { %3803 = vmatprep.subr.bf16.mxu0 %v6505_v41  ;;  %3844 = vmatprep.subr.bf16.mxu1 %v6507_v57 }
 0x564   :  { %3804 = vmatpush1.bf16.msra.mxu0 %v6509_v51  ;;  %3845 = vmatpush1.bf16.msra.mxu1 %v6511_v56 }
 0x565   :  { %3805 = vmatprep.subr.bf16.mxu0 %v6517_v47  ;;  %3846 = vmatprep.subr.bf16.mxu1 %v6519_v52 }
 0x568   :  { %3806 = vmatpush1.bf16.msra.mxu0 %v6521_v46  ;;  %3847 = vmatpush1.bf16.msra.mxu1 %v6523_v50 }
 0x569   :  { %3807 = vmatprep.subr.bf16.mxu0 %v6531_v62  ;;  %3848 = vmatprep.subr.bf16.mxu1 %v6535_v0 }
 0x56c   :  { %3808 = vmatpush2.bf16.msra.mxu0 %v6529_v43  ;;  %3849 = vmatpush2.bf16.msra.mxu1 %v6533_v49 }
 0x56d   :  { %3809 = vmatprep.subr.bf16.mxu0 %v6537_v29  ;;  %3850 = vmatprep.subr.bf16.mxu1 %v6540_v44 }
 0x570   :  { %3810 = vmatpush2.bf16.msra.mxu0 %v6545_v58  ;;  %3851 = vmatpush2.bf16.msra.mxu1 %v6547_v9 }
 0x571   :  { %3811 = vmatprep.subr.bf16.mxu0 %v6551_v2  ;;  %3852 = vmatprep.subr.bf16.mxu1 %v6553_v53 }
 0x574   :  { %3812 = vmatpush2.bf16.msra.mxu0 %v6557_v59  ;;  %3853 = vmatpush2.bf16.msra.mxu1 %v6559_v4 }
 0x575   :  { %3813 = vmatprep.subr.bf16.mxu0 %v6563_v3  ;;  %3854 = vmatprep.subr.bf16.mxu1 %v6565_v61 }
 0x578   :  { %3814 = vmatpush2.bf16.msra.mxu0 %v6569_v45  ;;  %3855 = vmatpush2.bf16.msra.mxu1 %v6571_v54 }
 0x579   :  { %3815 = vmatprep.subr.bf16.mxu0 %v6575_v1  ;;  %3856 = vmatprep.subr.bf16.mxu1 %v6584_v7 }
 0x57c   :  { %3816 = vmatpush2.bf16.msra.mxu0 %v6579_v60  ;;  %3857 = vmatpush2.bf16.msra.mxu1 %v6582_v26  ;;  %v6611_v26 = vld [vmem:[#allocation7 + $0x104] ss:$16 sps:$4 sm:$0xff]  }
 0x57d   :  { %3817 = vmatprep.subr.bf16.mxu0 %v6586_v8  ;;  %3858 = vmatprep.subr.bf16.mxu1 %v6588_v10  ;;  %7072 = vst [vmem:[#allocation43_spill] sm:$0xff] %v6611_v26  ;;  %v6613_v8 = vld [vmem:[#allocation7 + $0x10c] ss:$16 sps:$4 sm:$0xff]   ;;  %v6617_v10 = vld [vmem:[#allocation7 + $0x100] ss:$16 sps:$4 sm:$0xff]  }
 0x57e   :  { %7073 = vst [vmem:[#allocation44_spill] sm:$0xff] %v6613_v8  ;;  %7074 = vst [vmem:[#allocation45_spill] sm:$0xff] %v6617_v10 }
 0x580   :  { %3818 = vmatpush2.bf16.msra.mxu0 %v6593_v11  ;;  %3859 = vmatpush2.bf16.msra.mxu1 %v6595_v12  ;;  %v6619_v11 = vld [vmem:[#allocation7 + $0x108] ss:$16 sps:$4 sm:$0xff]  }
 0x581   :  { %3819 = vmatprep.subr.bf16.mxu0 %v6599_v13  ;;  %3860 = vmatprep.subr.bf16.mxu1 %v6601_v16  ;;  %7075 = vst [vmem:[#allocation46_spill] sm:$0xff] %v6619_v11 }
 0x584   :  { %3820 = vmatpush2.bf16.msra.mxu0 %v6605_v6  ;;  %3861 = vmatpush2.bf16.msra.mxu1 %v6607_v55  ;;  %v2896_v55 = vld [vmem:[%s2895_s24] sm:$0xf] }
 0x585   :  { %3821 = vmatprep.subr.bf16.mxu0 %v6611_v26  ;;  %3862 = vmatprep.subr.bf16.mxu1 %v6613_v8  ;;  %v3320_v6 = vld [vmem:[%s6800_s3] sm:$0xf]  ;;  %v3221_v26 = vrot.slane %v2896_v55, %v7050_v35 }
 0x586   :  { %v3325_v8 = vrot.slane %v3320_v6, %v7050_v35  ;;  %v3333_v35 = vrot.slane %v3320_v6, %v5976_v63 }
 0x588   :  { %3822 = vmatpush2.bf16.msra.mxu0 %v6617_v10  ;;  %3863 = vmatpush2.bf16.msra.mxu1 %v6619_v11  ;;  %v3233_v10 = vrot.slane %v2896_v55, %v7051_v38 }
 0x589   :  { %4344 = vmatprep.subr.bf16.mxu0 %v6433_v5  ;;  %4385 = vmatprep.subr.bf16.mxu1 %v6435_v48  ;;  %v3337_v5 = vrot.slane %v3320_v6, %v7051_v38  ;;  %v3229_v48 = vrot.slane %v2896_v55, %v5976_v63  ;;  %v3225_v38 = vrot.slane %v2896_v55, %v5985_v42 }
 0x60b   :  { %v3272_v16 = vpop.f32.mrf.mxu0  ;;  %v3313_v11 = vpop.f32.mrf.mxu1 }
 0x60c   :  { %v3273_v13 = vadd.f32 %v3272_v16, %v3221_v26  ;;  %v3314_v4 = vadd.f32 %v3313_v11, %v3229_v48 }
 0x60d   :  { %v3274_v12 = vpop.f32.mrf.mxu0  ;;  %v3315_v60 = vpop.f32.mrf.mxu1 }
 0x60e   :  { %v3342_v7 = vadd.f32 %v3325_v8, %v3273_v13  ;;  %v3316_v1 = vadd.f32 %v3315_v60, %v3233_v10  ;;  %v3344_v16 = vadd.f32 %v3333_v35, %v3314_v4  ;;  %v3275_v60 = vadd.f32 %v3274_v12, %v3225_v38 }
 0x60f   :  { %v3276_v54 = vpop.f32.mrf.mxu0  ;;  %v3317_v45 = vpop.f32.mrf.mxu1 }
 0x610   :  { %v4951_v61 = vmul.f32 -1.442695, %v3342_v7  ;;  %v6635_v3 = vadd.f32 %v3337_v5, %v3316_v1  ;;  %v4952_v8 = vmul.f32 -1.442695, %v3344_v16  ;;  %v3329_v45 = vrot.slane %v3320_v6, %v5985_v42  ;;  %v7103_v5 = vld [vmem:[#allocation41_spill] sm:$0xff] }
 0x611   :  { %v3277_v59 = vpop.f32.mrf.mxu0  ;;  %v3318_v53 = vpop.f32.mrf.mxu1 }
 0x612   :  { %5448 = vpow2.f32 %v4951_v61  ;;  %v3362_v26 = vsel %vm597_vm0, %v6635_v3, -inf  ;;  %v3343_v54 = vadd.f32 %v3329_v45, %v3275_v60 }
 0x613   :  { %3363 = vmax.xlane.f32.xlu1 %v3362_v26  ;;  %5450 = vpow2.f32 %v4952_v8 }
 0x614   :  { %5452 = vtanh.f32 %v3343_v54 }
 0x61f   :  { %v5449_v1 = vpop.eup %5448 }
 0x620   :  { %v3349_v7 = vadd.f32 1.0, %v5449_v1  ;;  %v5451_v59 = vpop.eup %5450 }
 0x621   :  { %v3356_v53 = vadd.f32 1.0, %v5451_v59  ;;  %v5453_v61 = vpop.eup %5452 }
 0x622   :  { %5454 = vrcp.f32 %v3349_v7 }
 0x623   :  { %5456 = vrcp.f32 %v3356_v53 }
 0x62f   :  { %v5455_v10 = vpop.eup %5454 }
 0x630   :  { %v3359_v11 = vmul.f32 %v5455_v10, %v5453_v61  ;;  %v5457_v55 = vpop.eup %5456 }
 0x632   :  { %5458 = vtanh.f32 %v3359_v11  ;;  %v3378_v35 = vpack.c.bf16 %v3359_v11, %v3359_v11 }
 0x634   :  { %3823 = vmatprep.mubr.bf16.mxu0 %v3378_v35  ;;  %3864 = vmatprep.mubr.bf16.mxu1 %v3378_v35 }
 0x63f   :  { %v5459_v38 = vpop.eup %5458 }
 0x640   :  { %v3361_v4 = vmul.f32 %v5459_v38, %v5457_v55 }
 0x642   :  { %v3377_v6 = vpack.c.bf16 %v3361_v4, %v3361_v4 }
 0x644   :  { %3824 = vmatmul.mubr.bf16.vlgmr.msra.gmra.mxu0 %v3377_v6  ;;  %3865 = vmatmul.mubr.bf16.vlgmr.msra.gmra.mxu1 %v3377_v6 }
 0x645   :  { %4345 = vmatpush1.bf16.msra.mxu0 %v6439_v14  ;;  %4386 = vmatpush1.bf16.msra.mxu1 %v6441_v15  ;;  %v7076_v14 = vld [vmem:[#allocation21_spill] sm:$0xff]  ;;  %v7077_v15 = vld [vmem:[#allocation22_spill] sm:$0xff] }
 0x646   :  { %4346 = vmatprep.subr.bf16.mxu0 %v6443_v17  ;;  %4387 = vmatprep.subr.bf16.mxu1 %v6445_v18  ;;  %v7078_v17 = vld [vmem:[#allocation23_spill] sm:$0xff]  ;;  %v7079_v18 = vld [vmem:[#allocation24_spill] sm:$0xff] }
 0x649   :  { %4347 = vmatpush1.bf16.msra.mxu0 %v6449_v19  ;;  %4388 = vmatpush1.bf16.msra.mxu1 %v6451_v20  ;;  %v7080_v19 = vld [vmem:[#allocation25_spill] sm:$0xff]  ;;  %v7081_v20 = vld [vmem:[#allocation26_spill] sm:$0xff] }
 0x64a   :  { %4348 = vmatprep.subr.bf16.mxu0 %v6457_v21  ;;  %4389 = vmatprep.subr.bf16.mxu1 %v6459_v22  ;;  %v7082_v21 = vld [vmem:[#allocation27_spill] sm:$0xff]  ;;  %v7083_v22 = vld [vmem:[#allocation28_spill] sm:$0xff] }
 0x64d   :  { %4349 = vmatpush1.bf16.msra.mxu0 %v6461_v23  ;;  %4390 = vmatpush1.bf16.msra.mxu1 %v6463_v24  ;;  %v7084_v23 = vld [vmem:[#allocation30_spill] sm:$0xff]  ;;  %v7085_v24 = vld [vmem:[#allocation31_spill] sm:$0xff] }
 0x64e   :  { %4350 = vmatprep.subr.bf16.mxu0 %v6469_v25  ;;  %4391 = vmatprep.subr.bf16.mxu1 %v6471_v27  ;;  %v7086_v25 = vld [vmem:[#allocation29_spill] sm:$0xff]  ;;  %v7087_v27 = vld [vmem:[#allocation32_spill] sm:$0xff] }
 0x651   :  { %4351 = vmatpush1.bf16.msra.mxu0 %v6473_v28  ;;  %4392 = vmatpush1.bf16.msra.mxu1 %v6475_v30  ;;  %v7088_v28 = vld [vmem:[#allocation33_spill] sm:$0xff]  ;;  %v7089_v30 = vld [vmem:[#allocation34_spill] sm:$0xff] }
 0x652   :  { %4352 = vmatprep.subr.bf16.mxu0 %v6481_v31  ;;  %4393 = vmatprep.subr.bf16.mxu1 %v6483_v32  ;;  %v7090_v31 = vld [vmem:[#allocation35_spill] sm:$0xff]  ;;  %v7091_v32 = vld [vmem:[#allocation36_spill] sm:$0xff] }
 0x655   :  { %4353 = vmatpush1.bf16.msra.mxu0 %v6485_v33  ;;  %4394 = vmatpush1.bf16.msra.mxu1 %v6487_v34  ;;  %v7092_v33 = vld [vmem:[#allocation37_spill] sm:$0xff]  ;;  %v7093_v34 = vld [vmem:[#allocation38_spill] sm:$0xff] }
 0x656   :  { %4354 = vmatprep.subr.bf16.mxu0 %v6493_v36  ;;  %4395 = vmatprep.subr.bf16.mxu1 %v6495_v37  ;;  %v7094_v36 = vld [vmem:[#allocation39_spill] sm:$0xff] }
 0x657   :  { %v7095_v37 = vld [vmem:[#allocation43_spill] sm:$0xff] }
 0x659   :  { %4355 = vmatpush1.bf16.msra.mxu0 %v6497_v39  ;;  %4396 = vmatpush1.bf16.msra.mxu1 %v6499_v40  ;;  %v7096_v39 = vld [vmem:[#allocation44_spill] sm:$0xff]  ;;  %v7097_v40 = vld [vmem:[#allocation45_spill] sm:$0xff] }
 0x65a   :  { %4356 = vmatprep.subr.bf16.mxu0 %v6505_v41  ;;  %4397 = vmatprep.subr.bf16.mxu1 %v6507_v57  ;;  %v7098_v41 = vld [vmem:[#allocation46_spill] sm:$0xff]  ;;  %v6704_v57 = vpop.xlane.xlu0 %599 }
 0x65d   :  { %4357 = vmatpush1.bf16.msra.mxu0 %v6509_v51  ;;  %4398 = vmatpush1.bf16.msra.mxu1 %v6511_v56  ;;  %v7099_v51 = vld [vmem:[#allocation42_spill] sm:$0xff] }
 0x65e   :  { %4358 = vmatprep.subr.bf16.mxu0 %v6517_v47  ;;  %4399 = vmatprep.subr.bf16.mxu1 %v6519_v52  ;;  %v601_v56 = vsub.f32 %v7099_v51, %v6704_v57  ;;  %v6708_v47 = vpop.xlane.xlu0 %1151  ;;  %v6710_v52 = vpop.xlane.xlu1 %1704 }
 0x661   :  { %4359 = vmatpush1.bf16.msra.mxu0 %v6521_v46  ;;  %4400 = vmatpush1.bf16.msra.mxu1 %v6523_v50  ;;  %v602_v46 = vmul.f32 1.442695, %v601_v56  ;;  %v7100_v50 = vld [vmem:[#allocation47_spill] sm:$0xff] }
 0x662   :  { %4360 = vmatprep.subr.bf16.mxu0 %v6531_v62  ;;  %4401 = vmatprep.subr.bf16.mxu1 %v6535_v0  ;;  %v6714_v62 = vpop.xlane.xlu0 %2810 }
 0x663   :  { %5460 = vpow2.f32 %v602_v46 }
 0x665   :  { %4361 = vmatpush2.bf16.msra.mxu0 %v6529_v43  ;;  %4402 = vmatpush2.bf16.msra.mxu1 %v6533_v49  ;;  %v1706_v43 = vsub.f32 %v7100_v50, %v6710_v52  ;;  %v3449_v49 = vld [vmem:[%s3448_s29] sm:$0xf] }
 0x666   :  { %4362 = vmatprep.subr.bf16.mxu0 %v6537_v29  ;;  %4403 = vmatprep.subr.bf16.mxu1 %v6540_v44  ;;  %v7101_v29 = vld [vmem:[#allocation20_spill] sm:$0xff]  ;;  %v3786_v48 = vrot.slane %v3449_v49, %v7103_v5  ;;  %v3782_v45 = vrot.slane %v3449_v49, %v5976_v63 }
 0x667   :  { %v1707_v0 = vmul.f32 1.442695, %v1706_v43  ;;  %v2812_v44 = vsub.f32 %v7101_v29, %v6714_v62 }
 0x669   :  { %4363 = vmatpush2.bf16.msra.mxu0 %v6545_v58  ;;  %4404 = vmatpush2.bf16.msra.mxu1 %v6547_v9  ;;  %v3873_v58 = vld [vmem:[%s6800_s3] sm:$0xf]  ;;  %5462 = vpow2.f32 %v1707_v0  ;;  %v2813_v12 = vmul.f32 1.442695, %v2812_v44 }
 0x66a   :  { %4364 = vmatprep.subr.bf16.mxu0 %v6551_v2  ;;  %4405 = vmatprep.subr.bf16.mxu1 %v7076_v14  ;;  %v7102_v9 = vld [vmem:[#allocation40_spill] sm:$0xff]  ;;  %v3890_v60 = vrot.slane %v3873_v58, %v7103_v5  ;;  %v3886_v55 = vrot.slane %v3873_v58, %v5976_v63 }
 0x66b   :  { %v3774_v2 = vrot.slane %v3449_v49, %v7102_v9  ;;  %v3878_v13 = vrot.slane %v3873_v58, %v7102_v9  ;;  %5464 = vpow2.f32 %v2813_v12 }
 0x66d   :  { %4365 = vmatpush2.bf16.msra.mxu0 %v7077_v15  ;;  %4406 = vmatpush2.bf16.msra.mxu1 %v7078_v17  ;;  %v3778_v17 = vrot.slane %v3449_v49, %v5985_v42 }
 0x66e   :  { %4366 = vmatprep.subr.bf16.mxu0 %v7079_v18  ;;  %4407 = vmatprep.subr.bf16.mxu1 %v7080_v19 }
 0x670   :  { %v5461_v14 = vpop.eup %5460 }
 0x671   :  { %4367 = vmatpush2.bf16.msra.mxu0 %v7081_v20  ;;  %4408 = vmatpush2.bf16.msra.mxu1 %v7082_v21  ;;  %v604_v18 = vsel %vm597_vm0, %v5461_v14, 0.0 }
 0x672   :  { %4368 = vmatprep.subr.bf16.mxu0 %v7083_v22  ;;  %4409 = vmatprep.subr.bf16.mxu1 %v7084_v23  ;;  %v3882_v22 = vrot.slane %v3873_v58, %v5985_v42 }
 0x675   :  { %4369 = vmatpush2.bf16.msra.mxu0 %v7085_v24  ;;  %4410 = vmatpush2.bf16.msra.mxu1 %v7086_v25 }
 0x676   :  { %4370 = vmatprep.subr.bf16.mxu0 %v7087_v27  ;;  %4411 = vmatprep.subr.bf16.mxu1 %v7088_v28  ;;  %v5463_v19 = vpop.eup %5462 }
 0x677   :  { %v1709_v23 = vsel %vm597_vm0, %v5463_v19, 0.0 }
 0x678   :  { %v5465_v24 = vpop.eup %5464 }
 0x679   :  { %4371 = vmatpush2.bf16.msra.mxu0 %v7089_v30  ;;  %4412 = vmatpush2.bf16.msra.mxu1 %v7090_v31  ;;  %v2815_v27 = vsel %vm597_vm0, %v5465_v24, 0.0 }
 0x67a   :  { %4372 = vmatprep.subr.bf16.mxu0 %v7091_v32  ;;  %4413 = vmatprep.subr.bf16.mxu1 %v7092_v33 }
 0x67d   :  { %4373 = vmatpush2.bf16.msra.mxu0 %v7093_v34  ;;  %4414 = vmatpush2.bf16.msra.mxu1 %v7094_v36 }
 0x67e   :  { %4374 = vmatprep.subr.bf16.mxu0 %v7095_v37  ;;  %4415 = vmatprep.subr.bf16.mxu1 %v7096_v39 }
 0x681   :  { %4375 = vmatpush2.bf16.msra.mxu0 %v7097_v40  ;;  %4416 = vmatpush2.bf16.msra.mxu1 %v7098_v41 }
 0x704   :  { %v3825_v26 = vpop.f32.mrf.mxu0  ;;  %v3866_v16 = vpop.f32.mrf.mxu1 }
 0x705   :  { %v3826_v8 = vadd.f32 %v3825_v26, %v3774_v2  ;;  %v3867_v35 = vadd.f32 %v3866_v16, %v3782_v45 }
 0x706   :  { %v3827_v54 = vpop.f32.mrf.mxu0  ;;  %v3868_v1 = vpop.f32.mrf.mxu1 }
 0x707   :  { %v3895_v7 = vadd.f32 %v3878_v13, %v3826_v8  ;;  %v3869_v59 = vadd.f32 %v3868_v1, %v3786_v48  ;;  %v3897_v15 = vadd.f32 %v3886_v55, %v3867_v35  ;;  %v3828_v21 = vadd.f32 %v3827_v54, %v3778_v17 }
 0x708   :  { %v3829_v53 = vpop.f32.mrf.mxu0  ;;  %v3870_v61 = vpop.f32.mrf.mxu1 }
 0x709   :  { %v5019_v10 = vmul.f32 -1.442695, %v3895_v7  ;;  %v6726_v11 = vadd.f32 %v3890_v60, %v3869_v59  ;;  %v5020_v20 = vmul.f32 -1.442695, %v3897_v15  ;;  %v3896_v25 = vadd.f32 %v3882_v22, %v3828_v21  ;;  %v7104_v61 = vld [vmem:[#allocation18_spill] sm:$0xff] }
 0x70a   :  { %v3830_v38 = vpop.f32.mrf.mxu0  ;;  %v3871_v4 = vpop.f32.mrf.mxu1 }
 0x70b   :  { %5466 = vpow2.f32 %v5019_v10  ;;  %v3915_v6 = vsel %vm597_vm0, %v6726_v11, -inf  ;;  %v6749_v10 = vpop.xlane.xlu1 %2257  ;;  %v4426_v38 = vld [vmem:[%s6800_s3] sm:$0xf]  ;;  %s5645_s3 = smov [#allocation10]  }
 0x70c   :  { %3916 = vmax.xlane.f32.xlu0 %v3915_v6  ;;  %5468 = vpow2.f32 %v5020_v20  ;;  %v4431_v14 = vrot.slane %v4426_v38, %v7102_v9  ;;  %v4443_v20 = vrot.slane %v4426_v38, %v7103_v5  ;;  %s4503_s14 = sshll.u32 %s5645_s3, 4  ;;  %s4504_s14 = int_to_ptr.vmem [resolvable:$true] %s4503_s14 }
 0x70d   :  { %5470 = vtanh.f32 %v3896_v25  ;;  %s5568_s15 = scalar_lea.vmem %s4504_s14, 16  ;;  %s5572_s16 = scalar_lea.vmem %s4504_s14, 32 }
 0x70e   :  { %p5569_p1 = scmp.ne.s32.totalorder %s4504_s14, %s5568_s15  ;;  %p5573_p2 = scmp.lt.s32.totalorder %s4504_s14, %s4504_s14 }
 0x70f   :  { %v6753_v55 = vpop.xlane.xlu1 %3363  ;;  %p5574_p3 = scmp.lt.s32.totalorder %s5572_s16, %s5568_s15 }
 0x710   :  { %605 = vadd.xlane.f32.xlu0 %v604_v18 }
 0x711   :  { %p5575_p4 = por %p5574_p3, %p5573_p2 }
 0x713   :  { %p5576_p5 = pnand %p5575_p4, %p5569_p1 }
 0x714   :  { %1710 = vadd.xlane.f32.xlu0 %v1709_v23 }
 0x718   :  { %v5467_v28 = vpop.eup %5466  ;;  %2816 = vadd.xlane.f32.xlu0 %v2815_v27 }
 0x719   :  { %v3902_v30 = vadd.f32 1.0, %v5467_v28  ;;  %v5469_v31 = vpop.eup %5468 }
 0x71a   :  { %v3909_v32 = vadd.f32 1.0, %v5469_v31  ;;  %v5471_v33 = vpop.eup %5470 }
 0x71b   :  { %5472 = vrcp.f32 %v3902_v30 }
 0x71c   :  { %5474 = vrcp.f32 %v3909_v32  ;;  %v4439_v32 = vrot.slane %v4426_v38, %v5976_v63 }
 0x728   :  { %v5473_v34 = vpop.eup %5472 }
 0x729   :  { %v3912_v36 = vmul.f32 %v5473_v34, %v5471_v33  ;;  %v5475_v39 = vpop.eup %5474 }
 0x72b   :  { %5476 = vtanh.f32 %v3912_v36  ;;  %v3931_v37 = vpack.c.bf16 %v3912_v36, %v3912_v36 }
 0x72d   :  { %4376 = vmatprep.mubr.bf16.mxu0 %v3931_v37  ;;  %4417 = vmatprep.mubr.bf16.mxu1 %v3931_v37 }
 0x738   :  { %v5477_v40 = vpop.eup %5476 }
 0x739   :  { %v3914_v41 = vmul.f32 %v5477_v40, %v5475_v39 }
 0x73b   :  { %v3930_v56 = vpack.c.bf16 %v3914_v41, %v3914_v41 }
 0x73d   :  { %4377 = vmatmul.mubr.bf16.vlgmr.msra.gmra.mxu0 %v3930_v56  ;;  %4418 = vmatmul.mubr.bf16.vlgmr.msra.gmra.mxu1 %v3930_v56 }
 0x795   :  { %v6736_v46 = vpop.xlane.xlu0 %3916 }
 0x796   :  { %v3918_v43 = vsub.f32 %v6726_v11, %v6736_v46 }
 0x798   :  { %v3919_v49 = vmul.f32 1.442695, %v3918_v43 }
 0x799   :  { %v606_v0 = vpop.xlane.xlu0 %605 }
 0x79a   :  { %5478 = vpow2.f32 %v3919_v49  ;;  %v4435_v49 = vrot.slane %v4426_v38, %v5985_v42 }
 0x79b   :  { %5480 = vlog2.f32 %v606_v0 }
 0x79d   :  { %v1711_v44 = vpop.xlane.xlu0 %1710 }
 0x79e   :  { %5482 = vlog2.f32 %v1711_v44 }
 0x7a1   :  { %v2817_v58 = vpop.xlane.xlu0 %2816 }
 0x7a2   :  { %5484 = vlog2.f32 %v2817_v58 }
 0x7a7   :  { %v5479_v2 = vpop.eup %5478 }
 0x7a8   :  { %v5481_v12 = vpop.eup %5480  ;;  %v3921_v13 = vsel %vm597_vm0, %v5479_v2, 0.0 }
 0x7a9   :  { %v608_v48 = vmul.f32 0.6931472, %v5481_v12  ;;  %3922 = vadd.xlane.f32.xlu0 %v3921_v13 }
 0x7ab   :  { %v5483_v26 = vpop.eup %5482  ;;  %v609_v16 = vadd.f32 %v608_v48, %v6704_v57  ;;  %v1153_v57 = vsub.f32 %v7104_v61, %v6708_v47 }
 0x7ac   :  { %v1713_v8 = vmul.f32 0.6931472, %v5483_v26 }
 0x7ad   :  { %v610_v60 = vsub.f32 %v7099_v51, %v609_v16  ;;  %v1154_v51 = vmul.f32 1.442695, %v1153_v57 }
 0x7ae   :  { %v1714_v45 = vadd.f32 %v1713_v8, %v6710_v52  ;;  %v7105_v52 = vld [vmem:[#allocation19_spill] sm:$0xff] }
 0x7af   :  { %v5485_v54 = vpop.eup %5484  ;;  %611 = vst [vmem:[#allocation9] sm:$0x1] %v610_v60  ;;  %v2259_v35 = vsub.f32 %v7105_v52, %v6749_v10  ;;  %5486 = vpow2.f32 %v1154_v51 }
 0x7b0   :  { %v1715_v1 = vsub.f32 %v7100_v50, %v1714_v45  ;;  %v2819_v7 = vmul.f32 0.6931472, %v5485_v54  ;;  %v4002_v50 = vld [vmem:[%s4001_s0] sm:$0xf] }
 0x7b1   :  { %v4327_v4 = vrot.slane %v4002_v50, %v7102_v9  ;;  %v4339_v15 = vrot.slane %v4002_v50, %v7103_v5  ;;  %v4335_v21 = vrot.slane %v4002_v50, %v5976_v63  ;;  %v4331_v39 = vrot.slane %v4002_v50, %v5985_v42 }
 0x7b2   :  { %1717 = vst [vmem:[#allocation9 + $0x2] sm:$0x1] %v1715_v1  ;;  %v2820_v59 = vadd.f32 %v2819_v7, %v6714_v62  ;;  %v2260_v62 = vmul.f32 1.442695, %v2259_v35 }
 0x7b4   :  { %v2821_v53 = vsub.f32 %v7101_v29, %v2820_v59  ;;  %v3365_v29 = vsub.f32 %v6635_v3, %v6753_v55  ;;  %5488 = vpow2.f32 %v2260_v62 }
 0x7b6   :  { %2823 = vst [vmem:[#allocation9 + $0x4] sm:$0x1] %v2821_v53  ;;  %v3366_v6 = vmul.f32 1.442695, %v3365_v29 }
 0x7b8   :  { %5490 = vpow2.f32 %v3366_v6 }
 0x7bc   :  { %v5487_v36 = vpop.eup %5486 }
 0x7bd   :  { %v1156_v40 = vsel %vm597_vm0, %v5487_v36, 0.0 }
 0x7c1   :  { %v5489_v41 = vpop.eup %5488 }
 0x7c2   :  { %v2262_v63 = vsel %vm597_vm0, %v5489_v41, 0.0 }
 0x7c5   :  { %v5491_v0 = vpop.eup %5490 }
 0x7c6   :  { %v3368_v58 = vsel %vm597_vm0, %v5491_v0, 0.0 }
 0x7fd   :  { %v4378_v17 = vpop.f32.mrf.mxu0  ;;  %v4419_v18 = vpop.f32.mrf.mxu1 }
 0x7fe   :  { %v4379_v19 = vadd.f32 %v4378_v17, %v4327_v4  ;;  %v4420_v9 = vadd.f32 %v4419_v18, %v4335_v21 }
 0x7ff   :  { %v4380_v22 = vpop.f32.mrf.mxu0  ;;  %v4421_v23 = vpop.f32.mrf.mxu1 }
 0x800   :  { %v4448_v24 = vadd.f32 %v4431_v14, %v4379_v19  ;;  %v4422_v25 = vadd.f32 %v4421_v23, %v4339_v15  ;;  %v4450_v37 = vadd.f32 %v4439_v32, %v4420_v9  ;;  %v4381_v43 = vadd.f32 %v4380_v22, %v4331_v39 }
 0x801   :  { %v4382_v27 = vpop.f32.mrf.mxu0  ;;  %v4423_v28 = vpop.f32.mrf.mxu1 }
 0x802   :  { %v5087_v30 = vmul.f32 -1.442695, %v4448_v24  ;;  %v6765_v31 = vadd.f32 %v4443_v20, %v4422_v25  ;;  %v5088_v56 = vmul.f32 -1.442695, %v4450_v37  ;;  %v4449_v44 = vadd.f32 %v4435_v49, %v4381_v43 }
 0x803   :  { %v4383_v33 = vpop.f32.mrf.mxu0  ;;  %v4424_v34 = vpop.f32.mrf.mxu1 }
 0x804   :  { %5492 = vpow2.f32 %v5087_v30  ;;  %v4468_v5 = vsel %vm597_vm0, %v6765_v31, -inf }
 0x805   :  { %4469 = vmax.xlane.f32.xlu1 %v4468_v5  ;;  %5494 = vpow2.f32 %v5088_v56 }
 0x806   :  { %5496 = vtanh.f32 %v4449_v44 }
 0x809   :  { %1157 = vadd.xlane.f32.xlu1 %v1156_v40 }
 0x80d   :  { %2263 = vadd.xlane.f32.xlu1 %v2262_v63 }
 0x811   :  { %v5493_v2 = vpop.eup %5492  ;;  %3369 = vadd.xlane.f32.xlu1 %v3368_v58 }
 0x812   :  { %v4455_v12 = vadd.f32 1.0, %v5493_v2  ;;  %v5495_v13 = vpop.eup %5494 }
 0x813   :  { %v4462_v48 = vadd.f32 1.0, %v5495_v13  ;;  %v5497_v26 = vpop.eup %5496 }
 0x814   :  { %5498 = vrcp.f32 %v4455_v12 }
 0x815   :  { %5500 = vrcp.f32 %v4462_v48 }
 0x821   :  { %v5499_v16 = vpop.eup %5498 }
 0x822   :  { %v4465_v8 = vmul.f32 %v5499_v16, %v5497_v26  ;;  %v5501_v42 = vpop.eup %5500 }
 0x824   :  { %4484 = vst [vmem:[#allocation12] sm:$0x1] %v4465_v8  ;;  %5502 = vtanh.f32 %v4465_v8 }
 0x831   :  { %v5503_v60 = vpop.eup %5502 }
 0x832   :  { %v3923_v45 = vpop.xlane.xlu0 %3922  ;;  %v4467_v54 = vmul.f32 %v5503_v60, %v5501_v42 }
 0x833   :  { %5504 = vlog2.f32 %v3923_v45 }
 0x834   :  { %4483 = vst [vmem:[#allocation10] sm:$0x1] %v4467_v54 }
 0x840   :  { %v5505_v1 = vpop.eup %5504 }
 0x841   :  { %v3925_v7 = vmul.f32 0.6931472, %v5505_v1 }
 0x843   :  { %v3926_v59 = vadd.f32 %v3925_v7, %v6736_v46 }
 0x845   :  { %v3927_v53 = vsub.f32 %v6726_v11, %v3926_v59 }
 0x847   :  { %3929 = vst [vmem:[#allocation9 + $0x6] sm:$0x1] %v3927_v53 }
 0x88e   :  { %v4470_v57 = vpop.xlane.xlu1 %4469 }
 0x88f   :  { %v4471_v51 = vsub.f32 %v6765_v31, %v4470_v57 }
 0x891   :  { %v4472_v35 = vmul.f32 1.442695, %v4471_v51 }
 0x892   :  { %v1158_v50 = vpop.xlane.xlu1 %1157 }
 0x893   :  { %5506 = vpow2.f32 %v4472_v35 }
 0x894   :  { %5508 = vlog2.f32 %v1158_v50 }
 0x896   :  { %v2264_v62 = vpop.xlane.xlu1 %2263 }
 0x897   :  { %5510 = vlog2.f32 %v2264_v62 }
 0x89a   :  { %v3370_v29 = vpop.xlane.xlu1 %3369 }
 0x89b   :  { %5512 = vlog2.f32 %v3370_v29 }
 0x8a0   :  { %v5507_v38 = vpop.eup %5506 }
 0x8a1   :  { %v5509_v4 = vpop.eup %5508  ;;  %v4474_v6 = vsel %vm597_vm0, %v5507_v38, 0.0 }
 0x8a2   :  { %v1160_v14 = vmul.f32 0.6931472, %v5509_v4  ;;  %4475 = vadd.xlane.f32.xlu1 %v4474_v6 }
 0x8a4   :  { %v5511_v46 = vpop.eup %5510  ;;  %v1161_v11 = vadd.f32 %v1160_v14, %v6708_v47 }
 0x8a5   :  { %v2266_v15 = vmul.f32 0.6931472, %v5511_v46 }
 0x8a6   :  { %v1162_v17 = vsub.f32 %v7104_v61, %v1161_v11 }
 0x8a7   :  { %v2267_v18 = vadd.f32 %v2266_v15, %v6749_v10 }
 0x8a8   :  { %v5513_v19 = vpop.eup %5512  ;;  %1164 = vst [vmem:[#allocation9 + $0x1] sm:$0x1] %v1162_v17 }
 0x8a9   :  { %v2268_v20 = vsub.f32 %v7105_v52, %v2267_v18  ;;  %v3372_v21 = vmul.f32 0.6931472, %v5513_v19 }
 0x8ab   :  { %2270 = vst [vmem:[#allocation9 + $0x3] sm:$0x1] %v2268_v20  ;;  %v3373_v22 = vadd.f32 %v3372_v21, %v6753_v55 }
 0x8ad   :  { %v3374_v23 = vsub.f32 %v6635_v3, %v3373_v22 }
 0x8af   :  { %3376 = vst [vmem:[#allocation9 + $0x5] sm:$0x1] %v3374_v23 }
 0x8b0   :  { %5579 = shalt.err (!%p5576_p5)
}
 0x8b1   :  { %4506 = dma.vmem_to_hbm [thread:$0]  %s4504_s14, 16, %s6804_s7, [#allocation11]  }
 0x8b2   :  { %s5646_s19 = smov [#allocation12]  }
 0x8b3   :  { %s4513_s21 = sshll.u32 %s5646_s19, 4  ;;  %s4514_s21 = int_to_ptr.vmem [resolvable:$true] %s4513_s21 }
 0x8b4   :  { %s5588_s22 = scalar_lea.vmem %s4514_s21, 16  ;;  %s5592_s1 = scalar_lea.vmem %s4514_s21, 32 }
 0x8b5   :  { %p5589_p6 = scmp.ne.s32.totalorder %s4514_s21, %s5588_s22  ;;  %p5593_p7 = scmp.lt.s32.totalorder %s4514_s21, %s4514_s21 }
 0x8b6   :  { %p5594_p8 = scmp.lt.s32.totalorder %s5592_s1, %s5588_s22 }
 0x8b8   :  { %p5595_p9 = por %p5594_p8, %p5593_p7 }
 0x8ba   :  { %p5596_p10 = pnand %p5595_p9, %p5589_p6 }
 0x8bc   :  { %5599 = shalt.err (!%p5596_p10)
}
 0x8bd   :  { %4516 = dma.vmem_to_hbm [thread:$0]  %s4514_s21, 16, %s6805_s8, [#allocation11]  }
 0x8be   :  { %s5647_s7 = smov [#allocation9]  }
 0x8bf   :  { %s4490_s23 = sshll.u32 %s5647_s7, 4  ;;  %s4491_s23 = int_to_ptr.vmem [resolvable:$true] %s4490_s23 }
 0x8c0   :  { %s5608_s4 = scalar_lea.vmem %s4491_s23, 128  ;;  %p5613_p12 = scmp.lt.s32.totalorder %s4491_s23, %s4491_s23 }
 0x8c1   :  { %p5609_p11 = scmp.ne.s32.totalorder %s4491_s23, %s5608_s4  ;;  %p5614_p13 = scmp.lt.s32.totalorder %s5608_s4, %s5608_s4 }
 0x8c3   :  { %p5615_p0 = por %p5614_p13, %p5613_p12 }
 0x8c5   :  { %p5616_p1 = pnand %p5615_p0, %p5609_p11 }
 0x92b   :  { %v4476_v3 = vpop.xlane.xlu1 %4475 }
 0x92c   :  { %5514 = vlog2.f32 %v4476_v3 }
 0x939   :  { %v5515_v47 = vpop.eup %5514 }
 0x93a   :  { %v4478_v61 = vmul.f32 0.6931472, %v5515_v47 }
 0x93c   :  { %v4479_v10 = vadd.f32 %v4478_v61, %v4470_v57 }
 0x93e   :  { %v4480_v52 = vsub.f32 %v6765_v31, %v4479_v10 }
 0x940   :  { %4482 = vst [vmem:[#allocation9 + $0x7] sm:$0x1] %v4480_v52 }
 0x941   :  { %5619 = shalt.err (!%p5616_p1)
}
 0x942   :  { %s5648_s24 = smov 1  }
 0x943   :  { %4496 = dma.vmem_to_hbm [thread:$0]  %s4491_s23, 128, %s6803_s6, [#allocation6], %s5644_s20, %s5644_s20, %s5648_s24  }
 0x944   :  { %5634 = dma.done.wait [#allocation6], 128  }
 0x945   :  { %5635 = vsyncadd [#allocation6], 4294967168 }
 0x946   :  { %5636 = dma.done.wait [#allocation11], 32  }
 0x947   :  { %5637 = vsyncadd [#allocation11], 4294967264 }
 0x948   :  { %4526 = vsyncpa [#allocation5], 1 }
 0x949   :  { %4527 = vsyncpa [#allocation8], 1 }
 0x94a   :  { %4528 = vsyncpa [#allocation6], 1 }
 0x94b   :  { %4529 = vsyncpa [#allocation11], 1 }

</bundles_post_ra>
